<compile_context>
chip_gen: v7x
topology: tpu7x:2x2x1
jax: 0.10.0
libtpu: 0.0.40
codegen_flags: <defaults>
</compile_context>

<pallas_src>
import functools

import jax
import jax.numpy as jnp
import numpy as np
from jax import lax
from jax.experimental import pallas as pl
from jax.experimental.pallas import tpu as pltpu

LEAK = 0.3        # LeakyReLU negative_slope
M = 4             # spatial margin (>= max conv padding, 4 for the 9-taps)
KMAX = 88         # widest im2col K (11 union taps x 8-row slots)
BIAS_COL = 88     # bias column inside the packed weight slab


# ------------------------------ kernel --------------------------------------

def _crblock_kernel(x_ref, mask_ref, w_ref, o_ref, pbuf, cbuf, *,
                    nbw, ppad, offs_a, offs_1x9, offs_9x1, offs_5x1):
    f32 = jnp.float32
    R = pbuf.shape[0]          # 16 plane rows

    # Guard slabs at both ends of the plane buffer (taps read up to M*Wp
    # columns outside the chunk).  Zeroed every step so the kernel stays
    # correct when the parallel grid axis is partitioned across TensorCores
    # (each core owns private scratch and may start at program_id > 0).
    pbuf[:, 0:ppad] = jnp.zeros((R, ppad), f32)
    pbuf[:, ppad + nbw:2 * ppad + nbw] = jnp.zeros((R, ppad), f32)

    def lrelu(v):
        return jnp.where(v >= 0, v, LEAK * v)

    def conv(base, offs, w, b):
        # im2col with sublane-aligned 8-row tap slots: tap t owns cbuf rows
        # [8t, 8t+8); the source is always an 8-aligned 8-row pbuf slab, so
        # both loads and stores are full-tile.  Unused rows hold zeros that
        # are matched by zero weight columns.
        for t, off in enumerate(offs):
            s = ppad + off                       # static lane offset
            cbuf[8 * t:8 * (t + 1), :] = pbuf[base:base + 8, s:s + nbw]
        k = 8 * len(offs)
        return jnp.dot(w, cbuf[0:k, :], preferred_element_type=f32) + b

    # Packed weight slab (see _build_weight_slab): row blocks are 8-aligned,
    # bias lives in column BIAS_COL of each block.
    wA, bA = w_ref[0:16, 0:88],  w_ref[0:16, 88:89]     # fused conv3x3+conv1x5
    w2, b2 = w_ref[16:24, 0:72], w_ref[16:24, 88:89]    # conv1x9
    w3, b3 = w_ref[24:32, 0:72], w_ref[24:32, 88:89]    # conv9x1
    w5, b5 = w_ref[32:40, 0:40], w_ref[32:40, 88:89]    # conv5x1
    w6a, w6b = w_ref[40:42, 0:8], w_ref[40:42, 8:16]    # conv1x1 halves
    b6 = w_ref[40:42, 88:89]

    # x arrives as an 8-row slab (channels in rows 0:C, zeros below): one
    # aligned full-tile store and no separate zeroing of rows C:8.
    pbuf[0:8, ppad:ppad + nbw] = x_ref[0]

    # Fused first layer: conv3x3 -> rows 0:7, conv1x5 -> rows 8:15, sharing a
    # single im2col over the union of their taps.  Rows 7/15 have zero weights
    # and bias so they come out exactly 0, keeping pbuf's filler rows clean
    # for the 8-row slab reads below.  Margins are re-masked because the
    # downstream convs read them.
    y = lrelu(conv(0, offs_a, wA, bA)) * mask_ref[...]          # (16, nbw)
    pbuf[:, ppad:ppad + nbw] = y                                # aligned 16-row store

    # Path2: conv5x1 (8-aligned base row 8), immediately reduced through its
    # half of the 1x1 to keep the live intermediate small.
    p2 = lrelu(conv(8, offs_5x1, w5, b5))                       # (8, nbw), row 7 == 0
    acc = jnp.dot(w6b, p2, preferred_element_type=f32)          # (2, nbw)

    # Path1: conv1x9 -> lrelu (re-masked: conv9x1 reads margins) -> conv9x1.
    y1 = lrelu(conv(0, offs_1x9, w2, b2)) * mask_ref[0:8, :]    # (8, nbw), row 7 == 0
    pbuf[0:8, ppad:ppad + nbw] = y1                             # aligned 8-row store
    p1 = lrelu(conv(0, offs_9x1, w3, b3))                       # (8, nbw)
    acc = acc + jnp.dot(w6a, p1, preferred_element_type=f32)

    # 1x1 bias + residual add + final LeakyReLU.  Margin / lane-pad columns
    # hold garbage and are discarded by the wrapper slice.
    nres = o_ref.shape[1]
    o_ref[0] = lrelu(acc + b6 + x_ref[0, 0:nres, :]).astype(o_ref.dtype)


# ------------------------------ wrapper --------------------------------------

def _num_tensorcores():
    try:
        kind = jax.devices()[0].device_kind.lower()
    except Exception:
        return 1
    return 2 if ("v7" in kind or "tpu7" in kind.replace(" ", "")) else 1


def _pick_nb(N, C, hpwp, num_cores):
    # Rough per-image f32 VMEM bytes for one chunk: cbuf + pbuf + double-
    # buffered in/out blocks + mask.  Budget leaves headroom on v7x (64 MiB).
    per_image = (KMAX + 16 + 2 * 8 + 2 * C + 16) * hpwp * 4
    cap = max(1, (40 << 20) // per_image)
    divisors = [d for d in range(1, N + 1) if N % d == 0 and d <= cap] or [1]
    # Prefer a grid length that shards evenly across the part's TensorCores
    # (v7x megacore), then the largest chunk (amortizes per-step overhead).
    return max(divisors, key=lambda d: (((N // d) % num_cores) == 0, d))


def _build_weight_slab(folded, C):
    """Pack all folded ConvBN weights/biases into one (48, 89) f32 slab."""
    (w1, b1, _, _), (w2, b2, _, _), (w3, b3, _, _), \
        (w4, b4, _, _), (w5, b5, _, _), (w6, b6, _, _) = folded
    w1n, w2n, w3n, w4n, w5n, w6n = (np.asarray(a) for a in (w1, w2, w3, w4, w5, w6))
    b1n, b2n, b3n, b4n, b5n, b6n = (np.asarray(a) for a in (b1, b2, b3, b4, b5, b6))

    slab = np.zeros((48, KMAX + 1), np.float32)

    # Fused first layer: conv3x3 -> out rows 0:7, conv1x5 -> out rows 8:15,
    # over the union of their spatial taps; tap t owns weight columns
    # [8t, 8t+8) (input channels at +0..+C-1, zero elsewhere).
    taps3 = [(di, dj) for di in (-1, 0, 1) for dj in (-1, 0, 1)]
    union = taps3 + [(0, -2), (0, 2)]
    for t, (di, dj) in enumerate(union):
        if abs(di) <= 1 and abs(dj) <= 1:
            slab[0:7, 8 * t:8 * t + C] = w1n[:, :, di + 1, dj + 1]
        if di == 0 and abs(dj) <= 2:
            slab[8:15, 8 * t:8 * t + C] = w4n[:, :, 0, dj + 2]
    slab[0:7, BIAS_COL] = b1n
    slab[8:15, BIAS_COL] = b4n

    def put(row0, w, b):
        cout, cin, kh, kw = w.shape
        for t, (i, j) in enumerate((i, j) for i in range(kh) for j in range(kw)):
            slab[row0:row0 + cout, 8 * t:8 * t + cin] = w[:, :, i, j]
        slab[row0:row0 + cout, BIAS_COL] = b

    put(16, w2n, b2n)   # conv1x9 (path1)
    put(24, w3n, b3n)   # conv9x1 (path1)
    put(32, w5n, b5n)   # conv5x1 (path2)

    w6m = w6n.reshape(w6n.shape[0], -1)        # (2, 14)
    slab[40:42, 0:7] = w6m[:, 0:7]             # w6a (path1 half), column 7 stays 0
    slab[40:42, 8:15] = w6m[:, 7:14]           # w6b (path2 half), column 15 stays 0
    slab[40:42, BIAS_COL] = b6n
    return jnp.asarray(slab), union


def crblock_forward(x, folded, nb=None):
    """x: (N, C, H, W) f32; folded: [(w_fold OIHW, bias (O,), kh, kw), ...] in
    the order [conv3x3, conv1x9, conv9x1, conv1x5, conv5x1, conv1x1]."""
    N, C, H, W = x.shape
    assert 1 <= C <= 8
    Hp, Wp = H + 2 * M, W + 2 * M
    hpwp = Hp * Wp
    if nb is None:
        nb = _pick_nb(N, C, hpwp, _num_tensorcores())
    assert N % nb == 0, "batch must be divisible by the images-per-step chunk"
    G = N // nb
    nbw = nb * hpwp
    nbw_pad = -(-nbw // 128) * 128                 # enforced lane-dense minor dim
    lane_pad = nbw_pad - nbw
    ppad = max(128, -(-(M * Wp) // 128) * 128)     # guard width >= max |tap offset|
    pw_total = nbw_pad + 2 * ppad

    # Padded-plane input layout: (G, 8, nb*Hp*Wp + lane_pad); channels in rows
    # 0:C, zeros elsewhere, images of a chunk laid side by side along lanes.
    # TODO(synk): these wrapper-side pad/reshape/transpose passes (and their
    # inverse on the output) materialize an extra HBM copy; for large H*W the
    # un-/re-padding could be moved into the kernel as row-scatter DMAs.
    xp = jnp.pad(x, ((0, 0), (0, 0), (M, M), (M, M))).reshape(N, C, hpwp)
    xp = xp.reshape(G, nb, C, hpwp).transpose(0, 2, 1, 3).reshape(G, C, nbw)
    xp = jnp.pad(xp, ((0, 0), (0, 8 - C), (0, lane_pad)))

    # Valid-pixel mask over one chunk, pre-broadcast to 16 sublanes.
    r = np.arange(hpwp) // Wp
    c = np.arange(hpwp) % Wp
    m1 = ((r >= M) & (r < M + H) & (c >= M) & (c < M + W)).astype(np.float32)
    mrow = np.concatenate([np.tile(m1, nb), np.zeros(lane_pad, np.float32)])
    mask = jnp.asarray(np.tile(mrow, (16, 1)))

    wslab, union = _build_weight_slab(folded, C)

    offs_a = tuple(di * Wp + dj for (di, dj) in union)
    offs_1x9 = tuple(j - 4 for j in range(9))
    offs_9x1 = tuple((i - 4) * Wp for i in range(9))
    offs_5x1 = tuple((i - 2) * Wp for i in range(5))

    kernel = functools.partial(
        _crblock_kernel, nbw=nbw_pad, ppad=ppad, offs_a=offs_a,
        offs_1x9=offs_1x9, offs_9x1=offs_9x1, offs_5x1=offs_5x1)

    # Explicit VMEM budget: scratch + double-buffered io blocks + constants.
    est = 4 * (16 * pw_total + KMAX * nbw_pad
               + 2 * 8 * nbw_pad + 2 * C * nbw_pad
               + 16 * nbw_pad + 48 * 128)
    vmem_limit = int(min(60 << 20, max(32 << 20, 2 * est)))

    out_flat = pl.pallas_call(
        kernel,
        out_shape=jax.ShapeDtypeStruct((G, C, nbw_pad), jnp.float32),
        grid_spec=pltpu.PrefetchScalarGridSpec(
            num_scalar_prefetch=0,
            grid=(G,),
            in_specs=[
                pl.BlockSpec((1, 8, nbw_pad), lambda g: (g, 0, 0)),   # x planes
                pl.BlockSpec((16, nbw_pad), lambda g: (0, 0)),        # mask
                pl.BlockSpec((48, KMAX + 1), lambda g: (0, 0)),       # weight slab
            ],
            out_specs=pl.BlockSpec((1, C, nbw_pad), lambda g: (g, 0, 0)),
            scratch_shapes=[
                pltpu.VMEM((16, pw_total), jnp.float32),    # padded plane buffer
                pltpu.VMEM((KMAX, nbw_pad), jnp.float32),   # im2col buffer
            ],
        ),
        compiler_params=pltpu.CompilerParams(
            dimension_semantics=("parallel",),
            vmem_limit_bytes=vmem_limit),
    )(xp, mask, wslab)

    out = out_flat[:, :, :nbw].reshape(G, C, nb, Hp, Wp).transpose(0, 2, 1, 3, 4)
    return out.reshape(N, C, Hp, Wp)[:, :, M:M + H, M:M + W]


# ---------------- deterministic parameter construction (ConvBN folding) -----

def make_convbn_folded(key, cin, cout, kh, kw):
    kw_, kg, kb, km, kv = jax.random.split(key, 5)
    fan_in = cin * kh * kw
    w = jax.random.normal(kw_, (cout, cin, kh, kw), jnp.float32) / np.sqrt(fan_in)
    gamma = 1.0 + 0.1 * jax.random.normal(kg, (cout,), jnp.float32)
    beta = 0.1 * jax.random.normal(kb, (cout,), jnp.float32)
    mean = 0.1 * jax.random.normal(km, (cout,), jnp.float32)
    var = 1.0 + 0.5 * jax.random.uniform(kv, (cout,), jnp.float32)
    eps = 1e-5
    # TODO(synk): training-mode BatchNorm (batch statistics + running-stat
    # updates) is not implemented; inference-mode BN is folded into the conv.
    scale = gamma / jnp.sqrt(var + eps)
    w_fold = w * scale[:, None, None, None]
    bias = beta - mean * scale
    return w_fold, bias


# ---------------- pure-JAX reference (for correctness check) ----------------

def crblock_reference(x, folded):
    def lrelu(v):
        return jnp.where(v >= 0, v, LEAK * v)

    def cbn(inp, idx):
        w, b, kh, kw = folded[idx]
        ph, pw = (kh - 1) // 2, (kw - 1) // 2
        y = lax.conv_general_dilated(inp, w, (1, 1), [(ph, ph), (pw, pw)],
                                     dimension_numbers=('NCHW', 'OIHW', 'NCHW'))
        return y + b[None, :, None, None]

    p1 = cbn(x, 0)
    p1 = lrelu(p1)
    p1 = cbn(p1, 1)
    p1 = lrelu(p1)
    p1 = cbn(p1, 2)

    p2 = cbn(x, 3)
    p2 = lrelu(p2)
    p2 = cbn(p2, 4)

    out = lrelu(jnp.concatenate([p1, p2], axis=1))
    out = cbn(out, 5)
    return lrelu(out + x)


if __name__ == "__main__":
    key = jax.random.PRNGKey(0)
    keys = jax.random.split(key, 7)

    N, C, H, W = 2, 2, 16, 16
    x = jax.random.normal(keys[0], (N, C, H, W), jnp.float32)

    # (cin, cout, kh, kw) for: conv3x3, conv1x9, conv9x1, conv1x5, conv5x1, conv1x1
    layer_defs = [(2, 7, 3, 3), (7, 7, 1, 9), (7, 7, 9, 1),
                  (2, 7, 1, 5), (7, 7, 5, 1), (14, 2, 1, 1)]
    folded = []
    for k, (cin, cout, kh, kw) in zip(keys[1:], layer_defs):
        w_fold, bias = make_convbn_folded(k, cin, cout, kh, kw)
        folded.append((w_fold, bias, kh, kw))

    out = jax.block_until_ready(crblock_forward(x, folded))
    ref = jax.block_until_ready(crblock_reference(x, folded))

    if not np.allclose(np.asarray(out), np.asarray(ref), atol=1e-3, rtol=1e-3):
        raise AssertionError("Pallas CRBlock output does not match reference")
    print("KERNEL_OK")
</pallas_src>

<mosaic_0001>
module attributes {stable_mosaic.version = 11 : i64} {
  func.func @_crblock_kernel(%arg0: i32, %arg1: memref<1x8x1152xf32, #tpu.memory_space<vmem>>, %arg2: memref<16x1152xf32, #tpu.memory_space<vmem>>, %arg3: memref<48x89xf32, #tpu.memory_space<vmem>>, %arg4: memref<1x2x1152xf32, #tpu.memory_space<vmem>>, %arg5: memref<16x1408xf32, #tpu.memory_space<vmem>>, %arg6: memref<88x1152xf32, #tpu.memory_space<vmem>>) attributes {dimension_semantics = [#tpu.dimension_semantics<parallel>], iteration_bounds = array<i64: 1>, scalar_prefetch = 0 : i64, scratch_operands = 2 : i64, tpu.core_type = #tpu.core_type<tc>, window_params = [{transform_indices = @transform_0, window_bounds = array<i64: 1, 8, 1152>}, {pipeline_mode = #tpu.pipeline_mode<synchronous>, transform_indices = @transform_1, window_bounds = array<i64: 16, 1152>}, {pipeline_mode = #tpu.pipeline_mode<synchronous>, transform_indices = @transform_2, window_bounds = array<i64: 48, 89>}, {transform_indices = @transform_3, window_bounds = array<i64: 1, 2, 1152>}]} {
    %cst = arith.constant 0.000000e+00 : f32
    %0 = vector.broadcast %cst : f32 to vector<16x128xf32>
    %c0 = arith.constant 0 : index
    %c0_0 = arith.constant 0 : index
    %1 = vector.load %arg5[%c0, %c0_0] : memref<16x1408xf32, #tpu.memory_space<vmem>>, vector<16x128xf32>
    tpu.vector_store %arg5[%c0, %c0_0], %0 {strides = array<i32>} : memref<16x1408xf32, #tpu.memory_space<vmem>>, vector<16x128xf32>,
    %cst_1 = arith.constant 0.000000e+00 : f32
    %2 = vector.broadcast %cst_1 : f32 to vector<16x128xf32>
    %c0_2 = arith.constant 0 : index
    %c1280 = arith.constant 1280 : index
    %3 = vector.load %arg5[%c0_2, %c1280] : memref<16x1408xf32, #tpu.memory_space<vmem>>, vector<16x128xf32>
    tpu.vector_store %arg5[%c0_2, %c1280], %2 {strides = array<i32>} : memref<16x1408xf32, #tpu.memory_space<vmem>>, vector<16x128xf32>,
    %c0_3 = arith.constant 0 : index
    %c0_4 = arith.constant 0 : index
    %4 = vector.load %arg3[%c0_3, %c0_4] : memref<48x89xf32, #tpu.memory_space<vmem>>, vector<16x88xf32>
    %c0_5 = arith.constant 0 : index
    %c88 = arith.constant 88 : index
    %5 = vector.load %arg3[%c0_5, %c88] : memref<48x89xf32, #tpu.memory_space<vmem>>, vector<16x1xf32>
    %c16 = arith.constant 16 : index
    %c0_6 = arith.constant 0 : index
    %6 = vector.load %arg3[%c16, %c0_6] : memref<48x89xf32, #tpu.memory_space<vmem>>, vector<8x72xf32>
    %c16_7 = arith.constant 16 : index
    %c88_8 = arith.constant 88 : index
    %7 = vector.load %arg3[%c16_7, %c88_8] : memref<48x89xf32, #tpu.memory_space<vmem>>, vector<8x1xf32>
    %c24 = arith.constant 24 : index
    %c0_9 = arith.constant 0 : index
    %8 = vector.load %arg3[%c24, %c0_9] : memref<48x89xf32, #tpu.memory_space<vmem>>, vector<8x72xf32>
    %c24_10 = arith.constant 24 : index
    %c88_11 = arith.constant 88 : index
    %9 = vector.load %arg3[%c24_10, %c88_11] : memref<48x89xf32, #tpu.memory_space<vmem>>, vector<8x1xf32>
    %c32 = arith.constant 32 : index
    %c0_12 = arith.constant 0 : index
    %10 = vector.load %arg3[%c32, %c0_12] : memref<48x89xf32, #tpu.memory_space<vmem>>, vector<8x40xf32>
    %c32_13 = arith.constant 32 : index
    %c88_14 = arith.constant 88 : index
    %11 = vector.load %arg3[%c32_13, %c88_14] : memref<48x89xf32, #tpu.memory_space<vmem>>, vector<8x1xf32>
    %c40 = arith.constant 40 : index
    %c0_15 = arith.constant 0 : index
    %12 = vector.load %arg3[%c40, %c0_15] : memref<48x89xf32, #tpu.memory_space<vmem>>, vector<2x8xf32>
    %c40_16 = arith.constant 40 : index
    %c8 = arith.constant 8 : index
    %13 = vector.load %arg3[%c40_16, %c8] : memref<48x89xf32, #tpu.memory_space<vmem>>, vector<2x8xf32>
    %c40_17 = arith.constant 40 : index
    %c88_18 = arith.constant 88 : index
    %14 = vector.load %arg3[%c40_17, %c88_18] : memref<48x89xf32, #tpu.memory_space<vmem>>, vector<2x1xf32>
    %c0_19 = arith.constant 0 : index
    %c0_20 = arith.constant 0 : index
    %c0_21 = arith.constant 0 : index
    %15 = vector.load %arg1[%c0_19, %c0_20, %c0_21] : memref<1x8x1152xf32, #tpu.memory_space<vmem>>, vector<1x8x1152xf32>
    %16 = vector.shape_cast %15 : vector<1x8x1152xf32> to vector<8x1152xf32>
    %c0_22 = arith.constant 0 : index
    %c128 = arith.constant 128 : index
    %17 = vector.load %arg5[%c0_22, %c128] : memref<16x1408xf32, #tpu.memory_space<vmem>>, vector<8x1152xf32>
    tpu.vector_store %arg5[%c0_22, %c128], %16 {strides = array<i32>} : memref<16x1408xf32, #tpu.memory_space<vmem>>, vector<8x1152xf32>,
    %c0_23 = arith.constant 0 : index
    %c103 = arith.constant 103 : index
    %18 = vector.load %arg5[%c0_23, %c103] : memref<16x1408xf32, #tpu.memory_space<vmem>>, vector<8x1152xf32>
    %c0_24 = arith.constant 0 : index
    %c0_25 = arith.constant 0 : index
    %19 = vector.load %arg6[%c0_24, %c0_25] : memref<88x1152xf32, #tpu.memory_space<vmem>>, vector<8x1152xf32>
    tpu.vector_store %arg6[%c0_24, %c0_25], %18 {strides = array<i32>} : memref<88x1152xf32, #tpu.memory_space<vmem>>, vector<8x1152xf32>,
    %c0_26 = arith.constant 0 : index
    %c104 = arith.constant 104 : index
    %20 = vector.load %arg5[%c0_26, %c104] : memref<16x1408xf32, #tpu.memory_space<vmem>>, vector<8x1152xf32>
    %c8_27 = arith.constant 8 : index
    %c0_28 = arith.constant 0 : index
    %21 = vector.load %arg6[%c8_27, %c0_28] : memref<88x1152xf32, #tpu.memory_space<vmem>>, vector<8x1152xf32>
    tpu.vector_store %arg6[%c8_27, %c0_28], %20 {strides = array<i32>} : memref<88x1152xf32, #tpu.memory_space<vmem>>, vector<8x1152xf32>,
    %c0_29 = arith.constant 0 : index
    %c105 = arith.constant 105 : index
    %22 = vector.load %arg5[%c0_29, %c105] : memref<16x1408xf32, #tpu.memory_space<vmem>>, vector<8x1152xf32>
    %c16_30 = arith.constant 16 : index
    %c0_31 = arith.constant 0 : index
    %23 = vector.load %arg6[%c16_30, %c0_31] : memref<88x1152xf32, #tpu.memory_space<vmem>>, vector<8x1152xf32>
    tpu.vector_store %arg6[%c16_30, %c0_31], %22 {strides = array<i32>} : memref<88x1152xf32, #tpu.memory_space<vmem>>, vector<8x1152xf32>,
    %c0_32 = arith.constant 0 : index
    %c127 = arith.constant 127 : index
    %24 = vector.load %arg5[%c0_32, %c127] : memref<16x1408xf32, #tpu.memory_space<vmem>>, vector<8x1152xf32>
    %c24_33 = arith.constant 24 : index
    %c0_34 = arith.constant 0 : index
    %25 = vector.load %arg6[%c24_33, %c0_34] : memref<88x1152xf32, #tpu.memory_space<vmem>>, vector<8x1152xf32>
    tpu.vector_store %arg6[%c24_33, %c0_34], %24 {strides = array<i32>} : memref<88x1152xf32, #tpu.memory_space<vmem>>, vector<8x1152xf32>,
    %c0_35 = arith.constant 0 : index
    %c128_36 = arith.constant 128 : index
    %26 = vector.load %arg5[%c0_35, %c128_36] : memref<16x1408xf32, #tpu.memory_space<vmem>>, vector<8x1152xf32>
    %c32_37 = arith.constant 32 : index
    %c0_38 = arith.constant 0 : index
    %27 = vector.load %arg6[%c32_37, %c0_38] : memref<88x1152xf32, #tpu.memory_space<vmem>>, vector<8x1152xf32>
    tpu.vector_store %arg6[%c32_37, %c0_38], %26 {strides = array<i32>} : memref<88x1152xf32, #tpu.memory_space<vmem>>, vector<8x1152xf32>,
    %c0_39 = arith.constant 0 : index
    %c129 = arith.constant 129 : index
    %28 = vector.load %arg5[%c0_39, %c129] : memref<16x1408xf32, #tpu.memory_space<vmem>>, vector<8x1152xf32>
    %c40_40 = arith.constant 40 : index
    %c0_41 = arith.constant 0 : index
    %29 = vector.load %arg6[%c40_40, %c0_41] : memref<88x1152xf32, #tpu.memory_space<vmem>>, vector<8x1152xf32>
    tpu.vector_store %arg6[%c40_40, %c0_41], %28 {strides = array<i32>} : memref<88x1152xf32, #tpu.memory_space<vmem>>, vector<8x1152xf32>,
    %c0_42 = arith.constant 0 : index
    %c151 = arith.constant 151 : index
    %30 = vector.load %arg5[%c0_42, %c151] : memref<16x1408xf32, #tpu.memory_space<vmem>>, vector<8x1152xf32>
    %c48 = arith.constant 48 : index
    %c0_43 = arith.constant 0 : index
    %31 = vector.load %arg6[%c48, %c0_43] : memref<88x1152xf32, #tpu.memory_space<vmem>>, vector<8x1152xf32>
    tpu.vector_store %arg6[%c48, %c0_43], %30 {strides = array<i32>} : memref<88x1152xf32, #tpu.memory_space<vmem>>, vector<8x1152xf32>,
    %c0_44 = arith.constant 0 : index
    %c152 = arith.constant 152 : index
    %32 = vector.load %arg5[%c0_44, %c152] : memref<16x1408xf32, #tpu.memory_space<vmem>>, vector<8x1152xf32>
    %c56 = arith.constant 56 : index
    %c0_45 = arith.constant 0 : index
    %33 = vector.load %arg6[%c56, %c0_45] : memref<88x1152xf32, #tpu.memory_space<vmem>>, vector<8x1152xf32>
    tpu.vector_store %arg6[%c56, %c0_45], %32 {strides = array<i32>} : memref<88x1152xf32, #tpu.memory_space<vmem>>, vector<8x1152xf32>,
    %c0_46 = arith.constant 0 : index
    %c153 = arith.constant 153 : index
    %34 = vector.load %arg5[%c0_46, %c153] : memref<16x1408xf32, #tpu.memory_space<vmem>>, vector<8x1152xf32>
    %c64 = arith.constant 64 : index
    %c0_47 = arith.constant 0 : index
    %35 = vector.load %arg6[%c64, %c0_47] : memref<88x1152xf32, #tpu.memory_space<vmem>>, vector<8x1152xf32>
    tpu.vector_store %arg6[%c64, %c0_47], %34 {strides = array<i32>} : memref<88x1152xf32, #tpu.memory_space<vmem>>, vector<8x1152xf32>,
    %c0_48 = arith.constant 0 : index
    %c126 = arith.constant 126 : index
    %36 = vector.load %arg5[%c0_48, %c126] : memref<16x1408xf32, #tpu.memory_space<vmem>>, vector<8x1152xf32>
    %c72 = arith.constant 72 : index
    %c0_49 = arith.constant 0 : index
    %37 = vector.load %arg6[%c72, %c0_49] : memref<88x1152xf32, #tpu.memory_space<vmem>>, vector<8x1152xf32>
    tpu.vector_store %arg6[%c72, %c0_49], %36 {strides = array<i32>} : memref<88x1152xf32, #tpu.memory_space<vmem>>, vector<8x1152xf32>,
    %c0_50 = arith.constant 0 : index
    %c130 = arith.constant 130 : index
    %38 = vector.load %arg5[%c0_50, %c130] : memref<16x1408xf32, #tpu.memory_space<vmem>>, vector<8x1152xf32>
    %c80 = arith.constant 80 : index
    %c0_51 = arith.constant 0 : index
    %39 = vector.load %arg6[%c80, %c0_51] : memref<88x1152xf32, #tpu.memory_space<vmem>>, vector<8x1152xf32>
    tpu.vector_store %arg6[%c80, %c0_51], %38 {strides = array<i32>} : memref<88x1152xf32, #tpu.memory_space<vmem>>, vector<8x1152xf32>,
    %c0_52 = arith.constant 0 : index
    %c0_53 = arith.constant 0 : index
    %40 = vector.load %arg6[%c0_52, %c0_53] : memref<88x1152xf32, #tpu.memory_space<vmem>>, vector<88x1152xf32>
    %cst_54 = arith.constant dense<0.000000e+00> : vector<16x1152xf32>
    %41 = tpu.matmul %4, %40, %cst_54 {dimension_numbers = #tpu.dot_dimension_numbers<[1], [0], [0], [1], [0, 0, 1, 1], [], []>} : vector<16x88xf32>, vector<88x1152xf32>, vector<16x1152xf32> -> vector<16x1152xf32>
    %42 = vector.broadcast %5 : vector<16x1xf32> to vector<16x1152xf32>
    %43 = arith.addf %41, %42 : vector<16x1152xf32>
    %cst_55 = arith.constant 0.000000e+00 : f32
    %44 = vector.broadcast %cst_55 : f32 to vector<16x1152xf32>
    %45 = arith.cmpf oge, %43, %44 : vector<16x1152xf32>
    %cst_56 = arith.constant 3.000000e-01 : f32
    %46 = vector.broadcast %cst_56 : f32 to vector<16x1152xf32>
    %47 = arith.mulf %46, %43 : vector<16x1152xf32>
    %48 = arith.select %45, %43, %47 : vector<16x1152xi1>, vector<16x1152xf32>
    %c0_57 = arith.constant 0 : index
    %c0_58 = arith.constant 0 : index
    %49 = vector.load %arg2[%c0_57, %c0_58] : memref<16x1152xf32, #tpu.memory_space<vmem>>, vector<16x1152xf32>
    %50 = arith.mulf %48, %49 : vector<16x1152xf32>
    %c0_59 = arith.constant 0 : index
    %c128_60 = arith.constant 128 : index
    %51 = vector.load %arg5[%c0_59, %c128_60] : memref<16x1408xf32, #tpu.memory_space<vmem>>, vector<16x1152xf32>
    tpu.vector_store %arg5[%c0_59, %c128_60], %50 {strides = array<i32>} : memref<16x1408xf32, #tpu.memory_space<vmem>>, vector<16x1152xf32>,
    %c8_61 = arith.constant 8 : index
    %c80_62 = arith.constant 80 : index
    %52 = vector.load %arg5[%c8_61, %c80_62] : memref<16x1408xf32, #tpu.memory_space<vmem>>, vector<8x1152xf32>
    %c0_63 = arith.constant 0 : index
    %c0_64 = arith.constant 0 : index
    %53 = vector.load %arg6[%c0_63, %c0_64] : memref<88x1152xf32, #tpu.memory_space<vmem>>, vector<8x1152xf32>
    tpu.vector_store %arg6[%c0_63, %c0_64], %52 {strides = array<i32>} : memref<88x1152xf32, #tpu.memory_space<vmem>>, vector<8x1152xf32>,
    %c8_65 = arith.constant 8 : index
    %c104_66 = arith.constant 104 : index
    %54 = vector.load %arg5[%c8_65, %c104_66] : memref<16x1408xf32, #tpu.memory_space<vmem>>, vector<8x1152xf32>
    %c8_67 = arith.constant 8 : index
    %c0_68 = arith.constant 0 : index
    %55 = vector.load %arg6[%c8_67, %c0_68] : memref<88x1152xf32, #tpu.memory_space<vmem>>, vector<8x1152xf32>
    tpu.vector_store %arg6[%c8_67, %c0_68], %54 {strides = array<i32>} : memref<88x1152xf32, #tpu.memory_space<vmem>>, vector<8x1152xf32>,
    %c8_69 = arith.constant 8 : index
    %c128_70 = arith.constant 128 : index
    %56 = vector.load %arg5[%c8_69, %c128_70] : memref<16x1408xf32, #tpu.memory_space<vmem>>, vector<8x1152xf32>
    %c16_71 = arith.constant 16 : index
    %c0_72 = arith.constant 0 : index
    %57 = vector.load %arg6[%c16_71, %c0_72] : memref<88x1152xf32, #tpu.memory_space<vmem>>, vector<8x1152xf32>
    tpu.vector_store %arg6[%c16_71, %c0_72], %56 {strides = array<i32>} : memref<88x1152xf32, #tpu.memory_space<vmem>>, vector<8x1152xf32>,
    %c8_73 = arith.constant 8 : index
    %c152_74 = arith.constant 152 : index
    %58 = vector.load %arg5[%c8_73, %c152_74] : memref<16x1408xf32, #tpu.memory_space<vmem>>, vector<8x1152xf32>
    %c24_75 = arith.constant 24 : index
    %c0_76 = arith.constant 0 : index
    %59 = vector.load %arg6[%c24_75, %c0_76] : memref<88x1152xf32, #tpu.memory_space<vmem>>, vector<8x1152xf32>
    tpu.vector_store %arg6[%c24_75, %c0_76], %58 {strides = array<i32>} : memref<88x1152xf32, #tpu.memory_space<vmem>>, vector<8x1152xf32>,
    %c8_77 = arith.constant 8 : index
    %c176 = arith.constant 176 : index
    %60 = vector.load %arg5[%c8_77, %c176] : memref<16x1408xf32, #tpu.memory_space<vmem>>, vector<8x1152xf32>
    %c32_78 = arith.constant 32 : index
    %c0_79 = arith.constant 0 : index
    %61 = vector.load %arg6[%c32_78, %c0_79] : memref<88x1152xf32, #tpu.memory_space<vmem>>, vector<8x1152xf32>
    tpu.vector_store %arg6[%c32_78, %c0_79], %60 {strides = array<i32>} : memref<88x1152xf32, #tpu.memory_space<vmem>>, vector<8x1152xf32>,
    %c0_80 = arith.constant 0 : index
    %c0_81 = arith.constant 0 : index
    %62 = vector.load %arg6[%c0_80, %c0_81] : memref<88x1152xf32, #tpu.memory_space<vmem>>, vector<40x1152xf32>
    %cst_82 = arith.constant dense<0.000000e+00> : vector<8x1152xf32>
    %63 = tpu.matmul %10, %62, %cst_82 {dimension_numbers = #tpu.dot_dimension_numbers<[1], [0], [0], [1], [0, 0, 1, 1], [], []>} : vector<8x40xf32>, vector<40x1152xf32>, vector<8x1152xf32> -> vector<8x1152xf32>
    %64 = vector.broadcast %11 : vector<8x1xf32> to vector<8x1152xf32>
    %65 = arith.addf %63, %64 : vector<8x1152xf32>
    %cst_83 = arith.constant 0.000000e+00 : f32
    %66 = vector.broadcast %cst_83 : f32 to vector<8x1152xf32>
    %67 = arith.cmpf oge, %65, %66 : vector<8x1152xf32>
    %cst_84 = arith.constant 3.000000e-01 : f32
    %68 = vector.broadcast %cst_84 : f32 to vector<8x1152xf32>
    %69 = arith.mulf %68, %65 : vector<8x1152xf32>
    %70 = arith.select %67, %65, %69 : vector<8x1152xi1>, vector<8x1152xf32>
    %cst_85 = arith.constant dense<0.000000e+00> : vector<2x1152xf32>
    %71 = tpu.matmul %13, %70, %cst_85 {dimension_numbers = #tpu.dot_dimension_numbers<[1], [0], [0], [1], [0, 0, 1, 1], [], []>} : vector<2x8xf32>, vector<8x1152xf32>, vector<2x1152xf32> -> vector<2x1152xf32>
    %c0_86 = arith.constant 0 : index
    %c124 = arith.constant 124 : index
    %72 = vector.load %arg5[%c0_86, %c124] : memref<16x1408xf32, #tpu.memory_space<vmem>>, vector<8x1152xf32>
    %c0_87 = arith.constant 0 : index
    %c0_88 = arith.constant 0 : index
    %73 = vector.load %arg6[%c0_87, %c0_88] : memref<88x1152xf32, #tpu.memory_space<vmem>>, vector<8x1152xf32>
    tpu.vector_store %arg6[%c0_87, %c0_88], %72 {strides = array<i32>} : memref<88x1152xf32, #tpu.memory_space<vmem>>, vector<8x1152xf32>,
    %c0_89 = arith.constant 0 : index
    %c125 = arith.constant 125 : index
    %74 = vector.load %arg5[%c0_89, %c125] : memref<16x1408xf32, #tpu.memory_space<vmem>>, vector<8x1152xf32>
    %c8_90 = arith.constant 8 : index
    %c0_91 = arith.constant 0 : index
    %75 = vector.load %arg6[%c8_90, %c0_91] : memref<88x1152xf32, #tpu.memory_space<vmem>>, vector<8x1152xf32>
    tpu.vector_store %arg6[%c8_90, %c0_91], %74 {strides = array<i32>} : memref<88x1152xf32, #tpu.memory_space<vmem>>, vector<8x1152xf32>,
    %c0_92 = arith.constant 0 : index
    %c126_93 = arith.constant 126 : index
    %76 = vector.load %arg5[%c0_92, %c126_93] : memref<16x1408xf32, #tpu.memory_space<vmem>>, vector<8x1152xf32>
    %c16_94 = arith.constant 16 : index
    %c0_95 = arith.constant 0 : index
    %77 = vector.load %arg6[%c16_94, %c0_95] : memref<88x1152xf32, #tpu.memory_space<vmem>>, vector<8x1152xf32>
    tpu.vector_store %arg6[%c16_94, %c0_95], %76 {strides = array<i32>} : memref<88x1152xf32, #tpu.memory_space<vmem>>, vector<8x1152xf32>,
    %c0_96 = arith.constant 0 : index
    %c127_97 = arith.constant 127 : index
    %78 = vector.load %arg5[%c0_96, %c127_97] : memref<16x1408xf32, #tpu.memory_space<vmem>>, vector<8x1152xf32>
    %c24_98 = arith.constant 24 : index
    %c0_99 = arith.constant 0 : index
    %79 = vector.load %arg6[%c24_98, %c0_99] : memref<88x1152xf32, #tpu.memory_space<vmem>>, vector<8x1152xf32>
    tpu.vector_store %arg6[%c24_98, %c0_99], %78 {strides = array<i32>} : memref<88x1152xf32, #tpu.memory_space<vmem>>, vector<8x1152xf32>,
    %c0_100 = arith.constant 0 : index
    %c128_101 = arith.constant 128 : index
    %80 = vector.load %arg5[%c0_100, %c128_101] : memref<16x1408xf32, #tpu.memory_space<vmem>>, vector<8x1152xf32>
    %c32_102 = arith.constant 32 : index
    %c0_103 = arith.constant 0 : index
    %81 = vector.load %arg6[%c32_102, %c0_103] : memref<88x1152xf32, #tpu.memory_space<vmem>>, vector<8x1152xf32>
    tpu.vector_store %arg6[%c32_102, %c0_103], %80 {strides = array<i32>} : memref<88x1152xf32, #tpu.memory_space<vmem>>, vector<8x1152xf32>,
    %c0_104 = arith.constant 0 : index
    %c129_105 = arith.constant 129 : index
    %82 = vector.load %arg5[%c0_104, %c129_105] : memref<16x1408xf32, #tpu.memory_space<vmem>>, vector<8x1152xf32>
    %c40_106 = arith.constant 40 : index
    %c0_107 = arith.constant 0 : index
    %83 = vector.load %arg6[%c40_106, %c0_107] : memref<88x1152xf32, #tpu.memory_space<vmem>>, vector<8x1152xf32>
    tpu.vector_store %arg6[%c40_106, %c0_107], %82 {strides = array<i32>} : memref<88x1152xf32, #tpu.memory_space<vmem>>, vector<8x1152xf32>,
    %c0_108 = arith.constant 0 : index
    %c130_109 = arith.constant 130 : index
    %84 = vector.load %arg5[%c0_108, %c130_109] : memref<16x1408xf32, #tpu.memory_space<vmem>>, vector<8x1152xf32>
    %c48_110 = arith.constant 48 : index
    %c0_111 = arith.constant 0 : index
    %85 = vector.load %arg6[%c48_110, %c0_111] : memref<88x1152xf32, #tpu.memory_space<vmem>>, vector<8x1152xf32>
    tpu.vector_store %arg6[%c48_110, %c0_111], %84 {strides = array<i32>} : memref<88x1152xf32, #tpu.memory_space<vmem>>, vector<8x1152xf32>,
    %c0_112 = arith.constant 0 : index
    %c131 = arith.constant 131 : index
    %86 = vector.load %arg5[%c0_112, %c131] : memref<16x1408xf32, #tpu.memory_space<vmem>>, vector<8x1152xf32>
    %c56_113 = arith.constant 56 : index
    %c0_114 = arith.constant 0 : index
    %87 = vector.load %arg6[%c56_113, %c0_114] : memref<88x1152xf32, #tpu.memory_space<vmem>>, vector<8x1152xf32>
    tpu.vector_store %arg6[%c56_113, %c0_114], %86 {strides = array<i32>} : memref<88x1152xf32, #tpu.memory_space<vmem>>, vector<8x1152xf32>,
    %c0_115 = arith.constant 0 : index
    %c132 = arith.constant 132 : index
    %88 = vector.load %arg5[%c0_115, %c132] : memref<16x1408xf32, #tpu.memory_space<vmem>>, vector<8x1152xf32>
    %c64_116 = arith.constant 64 : index
    %c0_117 = arith.constant 0 : index
    %89 = vector.load %arg6[%c64_116, %c0_117] : memref<88x1152xf32, #tpu.memory_space<vmem>>, vector<8x1152xf32>
    tpu.vector_store %arg6[%c64_116, %c0_117], %88 {strides = array<i32>} : memref<88x1152xf32, #tpu.memory_space<vmem>>, vector<8x1152xf32>,
    %c0_118 = arith.constant 0 : index
    %c0_119 = arith.constant 0 : index
    %90 = vector.load %arg6[%c0_118, %c0_119] : memref<88x1152xf32, #tpu.memory_space<vmem>>, vector<72x1152xf32>
    %cst_120 = arith.constant dense<0.000000e+00> : vector<8x1152xf32>
    %91 = tpu.matmul %6, %90, %cst_120 {dimension_numbers = #tpu.dot_dimension_numbers<[1], [0], [0], [1], [0, 0, 1, 1], [], []>} : vector<8x72xf32>, vector<72x1152xf32>, vector<8x1152xf32> -> vector<8x1152xf32>
    %92 = vector.broadcast %7 : vector<8x1xf32> to vector<8x1152xf32>
    %93 = arith.addf %91, %92 : vector<8x1152xf32>
    %cst_121 = arith.constant 0.000000e+00 : f32
    %94 = vector.broadcast %cst_121 : f32 to vector<8x1152xf32>
    %95 = arith.cmpf oge, %93, %94 : vector<8x1152xf32>
    %cst_122 = arith.constant 3.000000e-01 : f32
    %96 = vector.broadcast %cst_122 : f32 to vector<8x1152xf32>
    %97 = arith.mulf %96, %93 : vector<8x1152xf32>
    %98 = arith.select %95, %93, %97 : vector<8x1152xi1>, vector<8x1152xf32>
    %c0_123 = arith.constant 0 : index
    %c0_124 = arith.constant 0 : index
    %99 = vector.load %arg2[%c0_123, %c0_124] : memref<16x1152xf32, #tpu.memory_space<vmem>>, vector<8x1152xf32>
    %100 = arith.mulf %98, %99 : vector<8x1152xf32>
    %c0_125 = arith.constant 0 : index
    %c128_126 = arith.constant 128 : index
    %101 = vector.load %arg5[%c0_125, %c128_126] : memref<16x1408xf32, #tpu.memory_space<vmem>>, vector<8x1152xf32>
    tpu.vector_store %arg5[%c0_125, %c128_126], %100 {strides = array<i32>} : memref<16x1408xf32, #tpu.memory_space<vmem>>, vector<8x1152xf32>,
    %c0_127 = arith.constant 0 : index
    %c32_128 = arith.constant 32 : index
    %102 = vector.load %arg5[%c0_127, %c32_128] : memref<16x1408xf32, #tpu.memory_space<vmem>>, vector<8x1152xf32>
    %c0_129 = arith.constant 0 : index
    %c0_130 = arith.constant 0 : index
    %103 = vector.load %arg6[%c0_129, %c0_130] : memref<88x1152xf32, #tpu.memory_space<vmem>>, vector<8x1152xf32>
    tpu.vector_store %arg6[%c0_129, %c0_130], %102 {strides = array<i32>} : memref<88x1152xf32, #tpu.memory_space<vmem>>, vector<8x1152xf32>,
    %c0_131 = arith.constant 0 : index
    %c56_132 = arith.constant 56 : index
    %104 = vector.load %arg5[%c0_131, %c56_132] : memref<16x1408xf32, #tpu.memory_space<vmem>>, vector<8x1152xf32>
    %c8_133 = arith.constant 8 : index
    %c0_134 = arith.constant 0 : index
    %105 = vector.load %arg6[%c8_133, %c0_134] : memref<88x1152xf32, #tpu.memory_space<vmem>>, vector<8x1152xf32>
    tpu.vector_store %arg6[%c8_133, %c0_134], %104 {strides = array<i32>} : memref<88x1152xf32, #tpu.memory_space<vmem>>, vector<8x1152xf32>,
    %c0_135 = arith.constant 0 : index
    %c80_136 = arith.constant 80 : index
    %106 = vector.load %arg5[%c0_135, %c80_136] : memref<16x1408xf32, #tpu.memory_space<vmem>>, vector<8x1152xf32>
    %c16_137 = arith.constant 16 : index
    %c0_138 = arith.constant 0 : index
    %107 = vector.load %arg6[%c16_137, %c0_138] : memref<88x1152xf32, #tpu.memory_space<vmem>>, vector<8x1152xf32>
    tpu.vector_store %arg6[%c16_137, %c0_138], %106 {strides = array<i32>} : memref<88x1152xf32, #tpu.memory_space<vmem>>, vector<8x1152xf32>,
    %c0_139 = arith.constant 0 : index
    %c104_140 = arith.constant 104 : index
    %108 = vector.load %arg5[%c0_139, %c104_140] : memref<16x1408xf32, #tpu.memory_space<vmem>>, vector<8x1152xf32>
    %c24_141 = arith.constant 24 : index
    %c0_142 = arith.constant 0 : index
    %109 = vector.load %arg6[%c24_141, %c0_142] : memref<88x1152xf32, #tpu.memory_space<vmem>>, vector<8x1152xf32>
    tpu.vector_store %arg6[%c24_141, %c0_142], %108 {strides = array<i32>} : memref<88x1152xf32, #tpu.memory_space<vmem>>, vector<8x1152xf32>,
    %c0_143 = arith.constant 0 : index
    %c128_144 = arith.constant 128 : index
    %110 = vector.load %arg5[%c0_143, %c128_144] : memref<16x1408xf32, #tpu.memory_space<vmem>>, vector<8x1152xf32>
    %c32_145 = arith.constant 32 : index
    %c0_146 = arith.constant 0 : index
    %111 = vector.load %arg6[%c32_145, %c0_146] : memref<88x1152xf32, #tpu.memory_space<vmem>>, vector<8x1152xf32>
    tpu.vector_store %arg6[%c32_145, %c0_146], %110 {strides = array<i32>} : memref<88x1152xf32, #tpu.memory_space<vmem>>, vector<8x1152xf32>,
    %c0_147 = arith.constant 0 : index
    %c152_148 = arith.constant 152 : index
    %112 = vector.load %arg5[%c0_147, %c152_148] : memref<16x1408xf32, #tpu.memory_space<vmem>>, vector<8x1152xf32>
    %c40_149 = arith.constant 40 : index
    %c0_150 = arith.constant 0 : index
    %113 = vector.load %arg6[%c40_149, %c0_150] : memref<88x1152xf32, #tpu.memory_space<vmem>>, vector<8x1152xf32>
    tpu.vector_store %arg6[%c40_149, %c0_150], %112 {strides = array<i32>} : memref<88x1152xf32, #tpu.memory_space<vmem>>, vector<8x1152xf32>,
    %c0_151 = arith.constant 0 : index
    %c176_152 = arith.constant 176 : index
    %114 = vector.load %arg5[%c0_151, %c176_152] : memref<16x1408xf32, #tpu.memory_space<vmem>>, vector<8x1152xf32>
    %c48_153 = arith.constant 48 : index
    %c0_154 = arith.constant 0 : index
    %115 = vector.load %arg6[%c48_153, %c0_154] : memref<88x1152xf32, #tpu.memory_space<vmem>>, vector<8x1152xf32>
    tpu.vector_store %arg6[%c48_153, %c0_154], %114 {strides = array<i32>} : memref<88x1152xf32, #tpu.memory_space<vmem>>, vector<8x1152xf32>,
    %c0_155 = arith.constant 0 : index
    %c200 = arith.constant 200 : index
    %116 = vector.load %arg5[%c0_155, %c200] : memref<16x1408xf32, #tpu.memory_space<vmem>>, vector<8x1152xf32>
    %c56_156 = arith.constant 56 : index
    %c0_157 = arith.constant 0 : index
    %117 = vector.load %arg6[%c56_156, %c0_157] : memref<88x1152xf32, #tpu.memory_space<vmem>>, vector<8x1152xf32>
    tpu.vector_store %arg6[%c56_156, %c0_157], %116 {strides = array<i32>} : memref<88x1152xf32, #tpu.memory_space<vmem>>, vector<8x1152xf32>,
    %c0_158 = arith.constant 0 : index
    %c224 = arith.constant 224 : index
    %118 = vector.load %arg5[%c0_158, %c224] : memref<16x1408xf32, #tpu.memory_space<vmem>>, vector<8x1152xf32>
    %c64_159 = arith.constant 64 : index
    %c0_160 = arith.constant 0 : index
    %119 = vector.load %arg6[%c64_159, %c0_160] : memref<88x1152xf32, #tpu.memory_space<vmem>>, vector<8x1152xf32>
    tpu.vector_store %arg6[%c64_159, %c0_160], %118 {strides = array<i32>} : memref<88x1152xf32, #tpu.memory_space<vmem>>, vector<8x1152xf32>,
    %c0_161 = arith.constant 0 : index
    %c0_162 = arith.constant 0 : index
    %120 = vector.load %arg6[%c0_161, %c0_162] : memref<88x1152xf32, #tpu.memory_space<vmem>>, vector<72x1152xf32>
    %cst_163 = arith.constant dense<0.000000e+00> : vector<8x1152xf32>
    %121 = tpu.matmul %8, %120, %cst_163 {dimension_numbers = #tpu.dot_dimension_numbers<[1], [0], [0], [1], [0, 0, 1, 1], [], []>} : vector<8x72xf32>, vector<72x1152xf32>, vector<8x1152xf32> -> vector<8x1152xf32>
    %122 = vector.broadcast %9 : vector<8x1xf32> to vector<8x1152xf32>
    %123 = arith.addf %121, %122 : vector<8x1152xf32>
    %cst_164 = arith.constant 0.000000e+00 : f32
    %124 = vector.broadcast %cst_164 : f32 to vector<8x1152xf32>
    %125 = arith.cmpf oge, %123, %124 : vector<8x1152xf32>
    %cst_165 = arith.constant 3.000000e-01 : f32
    %126 = vector.broadcast %cst_165 : f32 to vector<8x1152xf32>
    %127 = arith.mulf %126, %123 : vector<8x1152xf32>
    %128 = arith.select %125, %123, %127 : vector<8x1152xi1>, vector<8x1152xf32>
    %cst_166 = arith.constant dense<0.000000e+00> : vector<2x1152xf32>
    %129 = tpu.matmul %12, %128, %cst_166 {dimension_numbers = #tpu.dot_dimension_numbers<[1], [0], [0], [1], [0, 0, 1, 1], [], []>} : vector<2x8xf32>, vector<8x1152xf32>, vector<2x1152xf32> -> vector<2x1152xf32>
    %130 = arith.addf %71, %129 : vector<2x1152xf32>
    %131 = vector.broadcast %14 : vector<2x1xf32> to vector<2x1152xf32>
    %132 = arith.addf %130, %131 : vector<2x1152xf32>
    %c0_167 = arith.constant 0 : index
    %c0_168 = arith.constant 0 : index
    %c0_169 = arith.constant 0 : index
    %133 = vector.load %arg1[%c0_167, %c0_168, %c0_169] : memref<1x8x1152xf32, #tpu.memory_space<vmem>>, vector<1x2x1152xf32>
    %134 = vector.shape_cast %133 : vector<1x2x1152xf32> to vector<2x1152xf32>
    %135 = arith.addf %132, %134 : vector<2x1152xf32>
    %cst_170 = arith.constant 0.000000e+00 : f32
    %136 = vector.broadcast %cst_170 : f32 to vector<2x1152xf32>
    %137 = arith.cmpf oge, %135, %136 : vector<2x1152xf32>
    %cst_171 = arith.constant 3.000000e-01 : f32
    %138 = vector.broadcast %cst_171 : f32 to vector<2x1152xf32>
    %139 = arith.mulf %138, %135 : vector<2x1152xf32>
    %140 = arith.select %137, %135, %139 : vector<2x1152xi1>, vector<2x1152xf32>
    %c0_172 = arith.constant 0 : index
    %c0_173 = arith.constant 0 : index
    %c0_174 = arith.constant 0 : index
    %141 = vector.load %arg4[%c0_172, %c0_173, %c0_174] : memref<1x2x1152xf32, #tpu.memory_space<vmem>>, vector<1x2x1152xf32>
    %142 = vector.shape_cast %141 : vector<1x2x1152xf32> to vector<2x1152xf32>
    %143 = vector.shape_cast %140 : vector<2x1152xf32> to vector<1x2x1152xf32>
    tpu.vector_store %arg4[%c0_172, %c0_173, %c0_174], %143 {strides = array<i32>} : memref<1x2x1152xf32, #tpu.memory_space<vmem>>, vector<1x2x1152xf32>,
    return
  }
  func.func @transform_0(%arg0: i32) -> (i32, i32, i32) {
    %c0_i32 = arith.constant 0 : i32
    %c0_i32_0 = arith.constant 0 : i32
    %c0_i32_1 = arith.constant 0 : i32
    return %arg0, %c0_i32, %c0_i32_0 : i32, i32, i32
  }
  func.func @transform_1(%arg0: i32) -> (i32, i32) {
    %c0_i32 = arith.constant 0 : i32
    %c0_i32_0 = arith.constant 0 : i32
    %c0_i32_1 = arith.constant 0 : i32
    return %c0_i32, %c0_i32_0 : i32, i32
  }
  func.func @transform_2(%arg0: i32) -> (i32, i32) {
    %c0_i32 = arith.constant 0 : i32
    %c0_i32_0 = arith.constant 0 : i32
    %c0_i32_1 = arith.constant 0 : i32
    return %c0_i32, %c0_i32_0 : i32, i32
  }
  func.func @transform_3(%arg0: i32) -> (i32, i32, i32) {
    %c0_i32 = arith.constant 0 : i32
    %c0_i32_0 = arith.constant 0 : i32
    %c0_i32_1 = arith.constant 0 : i32
    return %arg0, %c0_i32, %c0_i32_0 : i32, i32, i32
  }
}

</mosaic_0001>

<bundles_post_ra>
// kernel: tpu_custom_call.1
= control target key start
LH: loop header
LB: loop body
LE: loop exit
PB: predicated region body
PF: predicated region fallthrough
CT: control target
= control target key end

     0   :  { %8 = vsyncpa [#allocation5], 0  ;;  %s8000_s0 = inlined_call_operand.hbm [shape: f32[1,8,1152], index: 0, kind: input, shape index: {}]   ;;  %s8001_s1 = inlined_call_operand.hbm [shape: f32[16,1152], index: 1, kind: input, shape index: {}]   ;;  %s8002_s2 = inlined_call_operand.hbm [shape: f32[48,89], index: 2, kind: input, shape index: {}]   ;;  %s8003_s3 = inlined_call_operand.hbm [shape: f32[1,2,1152], index: 3, kind: output, shape index: {}]  }
   0x1   :  { %9 = vsyncpa [#allocation8], 0 }
   0x2   :  { %10 = vsyncpa [#allocation6], 0  ;;  %s6206_s12 = smov [#allocation7]   ;;  %s6112_s16 = scalar_lea.hbm %s8001_s1, 2304 }
   0x3   :  { %s26_s13 = sshll.u32 %s6206_s12, 4  ;;  %p6113_p0 = scmp.ne.s32.totalorder %s8001_s1, %s6112_s16  ;;  %s27_s13 = int_to_ptr.vmem [resolvable:$true] %s26_s13 }
   0x4   :  { %p6116_p1 = scmp.lt.u32.totalorder %s6112_s16, %s8001_s1 }
   0x6   :  { %p6118_p2 = pnand %p6116_p1, %p6113_p0 }
   0x8   :  { %6121 = shalt.err (!%p6118_p2)
}
   0x9   :  { %s6122_s21 = scalar_lea.vmem %s27_s13, 2304  ;;  %p6127_p4 = scmp.lt.s32.totalorder %s27_s13, %s27_s13 }
   0xa   :  { %p6123_p3 = scmp.ne.s32.totalorder %s27_s13, %s6122_s21  ;;  %p6128_p5 = scmp.lt.s32.totalorder %s6122_s21, %s6122_s21 }
   0xc   :  { %p6129_p6 = por %p6128_p5, %p6127_p4 }
   0xe   :  { %p6130_p7 = pnand %p6129_p6, %p6123_p3 }
  0x10   :  { %6133 = shalt.err (!%p6130_p7)
}
  0x11   :  { %s6207_s22 = smov 1152   ;;  %s6208_s23 = smov 72  }
  0x12   :  { %32 = dma.hbm_to_vmem [thread:$0]  %s8001_s1, 2304, %s27_s13, [#allocation8], %s6207_s22, %s6207_s22, %s6208_s23  }
  0x13   :  { %s6209_s26 = smov [#allocation4]   ;;  %s6210_s28 = smov [#allocation9]  }
  0x14   :  { %s17_s27 = sshll.u32 %s6209_s26, 4  ;;  %s38_s29 = sshll.u32 %s6210_s28, 4  ;;  %s18_s27 = int_to_ptr.vmem [resolvable:$true] %s17_s27  ;;  %s39_s29 = int_to_ptr.vmem [resolvable:$true] %s38_s29 }
  0x15   :  { %s6134_s5 = scalar_lea.hbm %s8000_s0, 1152 }
  0x16   :  { %p6135_p8 = scmp.ne.s32.totalorder %s8000_s0, %s6134_s5  ;;  %p6138_p9 = scmp.lt.u32.totalorder %s6134_s5, %s8000_s0 }
  0x18   :  { %p6140_p10 = pnand %p6138_p9, %p6135_p8 }
  0x1a   :  { %6143 = shalt.err (!%p6140_p10)
}
  0x1b   :  { %s6144_s1 = scalar_lea.vmem %s18_s27, 1152  ;;  %p6149_p12 = scmp.lt.s32.totalorder %s18_s27, %s18_s27 }
  0x1c   :  { %p6145_p11 = scmp.ne.s32.totalorder %s18_s27, %s6144_s1  ;;  %p6150_p13 = scmp.lt.s32.totalorder %s6144_s1, %s6144_s1 }
  0x1e   :  { %p6151_p0 = por %p6150_p13, %p6149_p12 }
  0x20   :  { %p6152_p1 = pnand %p6151_p0, %p6145_p11 }
  0x22   :  { %6155 = shalt.err (!%p6152_p1)
}
  0x23   :  { %20 = dma.hbm_to_vmem [thread:$0]  %s8000_s0, 1152, %s18_s27, [#allocation5]  }
  0x24   :  { %s6156_s14 = scalar_lea.hbm %s8002_s2, 768 }
  0x25   :  { %p6157_p2 = scmp.ne.s32.totalorder %s8002_s2, %s6156_s14  ;;  %p6160_p3 = scmp.lt.u32.totalorder %s6156_s14, %s8002_s2 }
  0x27   :  { %p6162_p4 = pnand %p6160_p3, %p6157_p2 }
  0x29   :  { %6165 = shalt.err (!%p6162_p4)
}
  0x2a   :  { %s6166_s19 = scalar_lea.vmem %s39_s29, 768  ;;  %p6171_p6 = scmp.lt.s32.totalorder %s39_s29, %s39_s29 }
  0x2b   :  { %p6167_p5 = scmp.ne.s32.totalorder %s39_s29, %s6166_s19  ;;  %p6172_p7 = scmp.lt.s32.totalorder %s6166_s19, %s6166_s19 }
  0x2d   :  { %p6173_p8 = por %p6172_p7, %p6171_p6 }
  0x2f   :  { %p6174_p9 = pnand %p6173_p8, %p6167_p5 }
  0x31   :  { %6177 = shalt.err (!%p6174_p9)
}
  0x32   :  { %s6211_s0 = smov 128   ;;  %s6212_s20 = smov 8  }
  0x33   :  { %44 = dma.hbm_to_vmem [thread:$0]  %s8002_s2, 768, %s39_s29, [#allocation8], %s6211_s0, %s6211_s0, %s6212_s20  }
  0x34   :  { %6200 = dma.done.wait [#allocation5], 1152  }
  0x35   :  { %6201 = vsyncadd [#allocation5], 4294966144 }
  0x36   :  { %6202 = dma.done.wait [#allocation8], 3072  }
  0x37   :  { %6203 = vsyncadd [#allocation8], 4294964224  ;;  %v8004_v0 = vmov 0.0   ;;  %v6298_v1 = vld [vmem:[#allocation4 + $0x10] sm:$0xff]  ;;  %v6300_v2 = vld [vmem:[#allocation4] sm:$0xff]  ;;  %s6214_s2 = smov 25  }
  0x38   :  { %958 = vmatprep.mubr.f32.mxu0 %v8004_v0  ;;  %1035 = vmatprep.mubr.f32.mxu1 %v8004_v0  ;;  %v6302_v3 = vld [vmem:[#allocation4 + $0x8] sm:$0xff]  ;;  %v5544_v4 = vpack.i.bf16 %v6298_v1, %v8004_v0  ;;  %s6215_s24 = smov 24   ;;  %s6216_s25 = smov 1   ;;  %v6314_v6 = vld [vmem:[#allocation4 + $0x18] sm:$0xff]  ;;  %v6324_v9 = vld [vmem:[#allocation4 + $0x20] sm:$0xff]  ;;  %v6224_v19 = vmov 88  }
  0x39   :  { %v5534_v5 = vpack.i.bf16 %v6302_v3, %v6300_v2  ;;  %s6217_s26 = smov 23   ;;  %v5579_v7 = vpack.i.bf16 %v6314_v6, %v6300_v2  ;;  %v5574_v8 = vpack.i.bf16 %v6298_v1, %v6302_v3  ;;  %s6218_s27 = smov 127   ;;  %v5599_v10 = vpack.i.bf16 %v6324_v9, %v6314_v6  ;;  %v6338_v11 = vld [vmem:[#allocation4 + $0x28] sm:$0xff]  ;;  %v6340_v12 = vld [vmem:[#allocation4 + $0x30] sm:$0xff]  ;;  %v6361_v15 = vld [vmem:[#allocation4 + $0x38] sm:$0xff]  ;;  %5735 = vset.pattern.permute.xlu1 %v6224_v19 }
  0x3a   :  { %5545 = vrot.lane.b32.xlu1 %v5544_v4, %s6214_s2  ;;  %s6219_s28 = smov 104   ;;  %s6220_s29 = smov 105   ;;  %v5649_v13 = vpack.i.bf16 %v6340_v12, %v6338_v11  ;;  %v5644_v14 = vpack.i.bf16 %v6338_v11, %v6324_v9  ;;  %v5694_v16 = vpack.i.bf16 %v6361_v15, %v6340_v12  ;;  %v6367_v17 = vld [vmem:[#allocation4 + $0x40] sm:$0xff]  ;;  %5734 = vset.pattern.permute.xlu0 %v6224_v19  ;;  %vm122_vm0 = vcmask 203776   ;;  %v6428_v30 = vld [vmem:[#allocation9] sm:$0xff] }
  0x3b   :  { %5535 = vrot.lane.b32.xlu0 %v5534_v5, %s6214_s2  ;;  %s6221_s30 = smov 2   ;;  %s6222_s4 = smov 103   ;;  %v5704_v18 = vpack.i.bf16 %v6367_v17, %v6361_v15  ;;  %vm190_vm1 = vcmask 195584   ;;  %v6430_v31 = vld [vmem:[#allocation9 + $0x8] sm:$0xff]  ;;  %vm258_vm2 = vcmask 187392   ;;  %vm326_vm3 = vcmask 7168  }
  0x3c   :  { %s6223_s5 = smov 126   ;;  %vm412_vm4 = vcmask 1039360   ;;  %vm480_vm5 = vcmask 859136   ;;  %vm548_vm6 = vcmask 850944   ;;  %vm616_vm7 = vcmask 842752   ;;  %s6225_s6 = smov 80  }
  0x3d   :  { %vm684_vm8 = vcmask 15360   ;;  %vm752_vm9 = vcmask 1031168   ;;  %vm889_vm10 = vcmask 719872   ;;  %s6226_s7 = smov 3   ;;  %s6227_s8 = smov 4  }
  0x3e   :  { %5550 = vrot.lane.b32.xlu1 %v5544_v4, %s6215_s24  ;;  %s6228_s9 = smov 125   ;;  %s6229_s1 = smov 48  }
  0x3f   :  { %5540 = vrot.lane.b32.xlu0 %v5534_v5, %s6215_s24  ;;  %s6230_s10 = smov 124   ;;  %s6233_s11 = smov 32  }
  0x40   :  { %s6234_s12 = smov 96   ;;  %s6235_s13 = smov 56  }
  0x41   :  { %s6238_s14 = smov [#allocation10]  }
  0x42   :  { %5560 = vrot.lane.b32.xlu1 %v5534_v5, %s6216_s25  ;;  %s5024_s15 = sshll.u32 %s6238_s14, 4  ;;  %s5025_s15 = int_to_ptr.vmem [resolvable:$true] %s5024_s15 }
  0x43   :  { %5555 = vrot.lane.b32.xlu0 %v5534_v5, %s6217_s26  ;;  %s6178_s16 = scalar_lea.vmem %s5025_s15, 288  ;;  %p6183_p11 = scmp.lt.s32.totalorder %s5025_s15, %s5025_s15 }
  0x44   :  { %p6179_p10 = scmp.ne.s32.totalorder %s5025_s15, %s6178_s16  ;;  %p6184_p12 = scmp.lt.s32.totalorder %s6178_s16, %s6178_s16 }
  0x46   :  { %5570 = vrot.lane.b32.xlu1 %v5544_v4, %s6216_s25  ;;  %p6185_p13 = por %p6184_p12, %p6183_p11 }
  0x47   :  { %5565 = vrot.lane.b32.xlu0 %v5544_v4, %s6217_s26 }
  0x48   :  { %p6186_p0 = pnand %p6185_p13, %p6179_p10 }
  0x4a   :  { %5580 = vrot.lane.b32.xlu1 %v5579_v7, %s6218_s27 }
  0x4b   :  { %5575 = vrot.lane.b32.xlu0 %v5574_v8, %s6218_s27 }
  0x4e   :  { %5590 = vrot.lane.b32.xlu1 %v5574_v8, %s6219_s28 }
  0x4f   :  { %5585 = vrot.lane.b32.xlu0 %v5574_v8, %s6220_s29 }
  0x52   :  { %5600 = vrot.lane.b32.xlu1 %v5599_v10, %s6215_s24 }
  0x53   :  { %5595 = vrot.lane.b32.xlu0 %v5599_v10, %s6214_s2 }
  0x56   :  { %5610 = vrot.lane.b32.xlu1 %v5579_v7, %s6219_s28 }
  0x57   :  { %5605 = vrot.lane.b32.xlu0 %v5579_v7, %s6220_s29 }
  0x5a   :  { %5620 = vrot.lane.b32.xlu1 %v5534_v5, %s6221_s30 }
  0x5b   :  { %5615 = vrot.lane.b32.xlu0 %v5574_v8, %s6222_s4 }
  0x5e   :  { %5630 = vrot.lane.b32.xlu1 %v5599_v10, %s6216_s25 }
  0x5f   :  { %5625 = vrot.lane.b32.xlu0 %v5599_v10, %s6217_s26 }
  0x62   :  { %5640 = vrot.lane.b32.xlu1 %v5544_v4, %s6221_s30 }
  0x63   :  { %5635 = vrot.lane.b32.xlu0 %v5579_v7, %s6222_s4 }
  0x66   :  { %5650 = vrot.lane.b32.xlu1 %v5649_v13, %s6214_s2 }
  0x67   :  { %5645 = vrot.lane.b32.xlu0 %v5644_v14, %s6218_s27 }
  0x6a   :  { %734 = vrot.lane.b32.xlu1 %v6302_v3, %s6223_s5 }
  0x6b   :  { %5655 = vrot.lane.b32.xlu0 %v5649_v13, %s6215_s24 }
  0x6e   :  { %732 = vrot.lane.b32.xlu1 %v6300_v2, %s6223_s5 }
  0x6f   :  { %736 = vrot.lane.b32.xlu0 %v6298_v1, %s6223_s5 }
  0x72   :  { %5665 = vrot.lane.b32.xlu1 %v5644_v14, %s6219_s28 }
  0x73   :  { %5660 = vrot.lane.b32.xlu0 %v5644_v14, %s6220_s29 }
  0x76   :  { %5675 = vrot.lane.b32.xlu1 %v5649_v13, %s6216_s25 }
  0x77   :  { %5670 = vrot.lane.b32.xlu0 %v5649_v13, %s6217_s26 }
  0x7a   :  { %5685 = vrot.lane.b32.xlu1 %v5599_v10, %s6221_s30 }
  0x7b   :  { %5680 = vrot.lane.b32.xlu0 %v5644_v14, %s6222_s4 }
  0x7e   :  { %5695 = vrot.lane.b32.xlu1 %v5694_v16, %s6220_s29 }
  0x7f   :  { %5690 = vrot.lane.b32.xlu0 %v5694_v16, %s6218_s27 }
  0x82   :  { %5705 = vrot.lane.b32.xlu1 %v5704_v18, %s6214_s2 }
  0x83   :  { %5700 = vrot.lane.b32.xlu0 %v5694_v16, %s6219_s28 }
  0x86   :  { %738 = vrot.lane.b32.xlu1 %v6314_v6, %s6223_s5 }
  0x87   :  { %5710 = vrot.lane.b32.xlu0 %v5704_v18, %s6215_s24 }
  0x8a   :  { %608 = vrot.lane.b32.xlu1 %v6340_v12, %s6222_s4 }
  0x8b   :  { %740 = vrot.lane.b32.xlu0 %v6324_v9, %s6223_s5 }
  0x8e   :  { %5715 = vrot.lane.b32.xlu1 %v5704_v18, %s6217_s26 }
  0x8f   :  { %676 = vrot.lane.b32.xlu0 %v6338_v11, %s6221_s30 }
  0x92   :  { %408 = vrot.lane.b32.xlu1 %v6367_v17, %s6218_s27 }
  0x93   :  { %5720 = vrot.lane.b32.xlu0 %v5704_v18, %s6216_s25 }
  0x96   :  { %744 = vrot.lane.b32.xlu1 %v6340_v12, %s6223_s5 }
  0x97   :  { %742 = vrot.lane.b32.xlu0 %v6338_v11, %s6223_s5 }
  0x9a   :  { %544 = vrot.lane.b32.xlu1 %v6367_v17, %s6219_s28 }
  0x9b   :  { %476 = vrot.lane.b32.xlu0 %v6367_v17, %s6220_s29 }
  0x9e   :  { %5730 = vrot.lane.b32.xlu1 %v5694_v16, %s6221_s30 }
  0x9f   :  { %5725 = vrot.lane.b32.xlu0 %v5704_v18, %s6222_s4 }
  0xa2   :  { %478 = vrot.lane.b32.xlu1 %v8004_v0, %s6220_s29 }
  0xa3   :  { %410 = vrot.lane.b32.xlu0 %v8004_v0, %s6218_s27 }
  0xa6   :  { %746 = vrot.lane.b32.xlu1 %v6361_v15, %s6223_s5 }
  0xa7   :  { %546 = vrot.lane.b32.xlu0 %v8004_v0, %s6219_s28 }
  0xaa   :  { %614 = vrot.lane.b32.xlu1 %v8004_v0, %s6222_s4 }
  0xab   :  { %748 = vrot.lane.b32.xlu0 %v6367_v17, %s6223_s5 }
  0xac   :  { %v6410_v20 = vpop.permute.xlu1 %5545 }
  0xad   :  { %v6412_v21 = vpop.permute.xlu0 %5535  ;;  %v5547_v22 = vunpack.i.l.bf16 %v6410_v20  ;;  %v5548_v14 = vunpack.i.h.bf16 %v6410_v20 }
  0xae   :  { %750 = vrot.lane.b32.xlu1 %v8004_v0, %s6223_s5  ;;  %v5538_v23 = vunpack.i.h.bf16 %v6412_v21  ;;  %v5537_v24 = vunpack.i.l.bf16 %v6412_v21 }
  0xaf   :  { %682 = vrot.lane.b32.xlu0 %v6367_v17, %s6221_s30 }
  0xb0   :  { %v6421_v25 = vpop.permute.xlu1 %5550  ;;  %v124_v32 = vsel %vm122_vm0, %v5537_v24, %v5538_v23  ;;  %v123_v34 = vsel %vm122_vm0, %v5547_v22, %v5537_v24 }
  0xb1   :  { %v6423_v26 = vpop.permute.xlu0 %5540  ;;  %v5552_v27 = vunpack.i.l.bf16 %v6421_v25  ;;  %v5553_v13 = vunpack.i.h.bf16 %v6421_v25 }
  0xb2   :  { %v5543_v28 = vunpack.i.h.bf16 %v6423_v26  ;;  %v5542_v29 = vunpack.i.l.bf16 %v6423_v26  ;;  %881 = vperm.xlu1 %5735, %v6428_v30  }
  0xb3   :  { %886 = vperm.xlu0 %5734, %v6430_v31  }
  0xb4   :  { %v192_v33 = vsel %vm190_vm1, %v5542_v29, %v5543_v28  ;;  %v191_v35 = vsel %vm190_vm1, %v5552_v27, %v5542_v29  ;;  %v6442_v36 = vpop.permute.xlu1 %5560  ;;  %v193_v25 = vsel %vm190_vm1, %v5543_v28, %v5553_v13 }
  0xb5   :  { %v6444_v37 = vpop.permute.xlu0 %5555  ;;  %v5203_v38 = vpack.c.bf16 %v192_v33, %v124_v32  ;;  %v5205_v39 = vpack.c.bf16 %v191_v35, %v123_v34  ;;  %v5563_v40 = vunpack.i.h.bf16 %v6442_v36  ;;  %v5562_v41 = vunpack.i.l.bf16 %v6442_v36 }
  0xb6   :  { %v5558_v42 = vunpack.i.h.bf16 %v6444_v37  ;;  %v5557_v43 = vunpack.i.l.bf16 %v6444_v37  ;;  %v125_v34 = vsel %vm122_vm0, %v5538_v23, %v5548_v14  ;;  %1643 = vrot.lane.b32.xlu1 %v8004_v0, %s6225_s6 }
  0xb7   :  { %5204 = vmatprep.subr.bf16.mxu0 %v5203_v38  ;;  %v328_v45 = vsel %vm326_vm3, %v5562_v41, %v5563_v40  ;;  %v5225_v35 = vpack.c.bf16 %v193_v25, %v125_v34 }
  0xb8   :  { %5206 = vmatpush1.bf16.msra.mxu0 %v5205_v39  ;;  %v260_v44 = vsel %vm258_vm2, %v5557_v43, %v5558_v42  ;;  %v6456_v46 = vpop.permute.xlu1 %5570 }
  0xb9   :  { %v6458_v47 = vpop.permute.xlu0 %5565  ;;  %v5207_v48 = vpack.c.bf16 %v328_v45, %v260_v44  ;;  %v5572_v49 = vunpack.i.l.bf16 %v6456_v46 }
  0xba   :  { %v5567_v50 = vunpack.i.l.bf16 %v6458_v47 }
  0xbb   :  { %5208 = vmatprep.subr.bf16.mxu0 %v5207_v48  ;;  %v327_v52 = vsel %vm326_vm3, %v5572_v49, %v5562_v41  ;;  %v5573_v49 = vunpack.i.h.bf16 %v6456_v46 }
  0xbc   :  { %v259_v51 = vsel %vm258_vm2, %v5567_v50, %v5557_v43  ;;  %v6464_v53 = vpop.permute.xlu1 %5580  ;;  %v5568_v50 = vunpack.i.h.bf16 %v6458_v47 }
  0xbd   :  { %v6466_v54 = vpop.permute.xlu0 %5575  ;;  %v5209_v55 = vpack.c.bf16 %v327_v52, %v259_v51  ;;  %v5582_v56 = vunpack.i.l.bf16 %v6464_v53 }
  0xbe   :  { %v5578_v57 = vunpack.i.h.bf16 %v6466_v54  ;;  %v5577_v58 = vunpack.i.l.bf16 %v6466_v54  ;;  %v261_v47 = vsel %vm258_vm2, %v5558_v42, %v5568_v50 }
  0xbf   :  { %5210 = vmatpush1.bf16.msra.mxu0 %v5209_v55 }
  0xc0   :  { %v414_v59 = vsel %vm412_vm4, %v5577_v58, %v5578_v57  ;;  %v413_v60 = vsel %vm412_vm4, %v5582_v56, %v5577_v58  ;;  %v6475_v61 = vpop.permute.xlu1 %5590 }
  0xc1   :  { %v6477_v62 = vpop.permute.xlu0 %5585  ;;  %v5211_v63 = vpack.c.bf16 %v414_v59, %v6302_v3  ;;  %v5213_v4 = vpack.c.bf16 %v413_v60, %v6300_v2  ;;  %v5593_v5 = vunpack.i.h.bf16 %v6475_v61  ;;  %v5592_v7 = vunpack.i.l.bf16 %v6475_v61 }
  0xc2   :  { %v5588_v8 = vunpack.i.h.bf16 %v6477_v62  ;;  %v5587_v10 = vunpack.i.l.bf16 %v6477_v62  ;;  %v329_v60 = vsel %vm326_vm3, %v5563_v40, %v5573_v49  ;;  %v5583_v40 = vunpack.i.h.bf16 %v6464_v53 }
  0xc3   :  { %5212 = vmatprep.subr.bf16.mxu0 %v5211_v63  ;;  %v550_v2 = vsel %vm548_vm6, %v5592_v7, %v5593_v5  ;;  %v5229_v36 = vpack.c.bf16 %v329_v60, %v261_v47 }
  0xc4   :  { %5214 = vmatpush1.bf16.msra.mxu0 %v5213_v4  ;;  %v482_v3 = vsel %vm480_vm5, %v5587_v10, %v5588_v8  ;;  %v6493_v16 = vpop.permute.xlu1 %5600 }
  0xc5   :  { %v6495_v18 = vpop.permute.xlu0 %5595  ;;  %v5215_v19 = vpack.c.bf16 %v550_v2, %v482_v3  ;;  %v5602_v22 = vunpack.i.l.bf16 %v6493_v16 }
  0xc6   :  { %v5597_v24 = vunpack.i.l.bf16 %v6495_v18  ;;  %v5598_v34 = vunpack.i.h.bf16 %v6495_v18 }
  0xc7   :  { %5216 = vmatprep.subr.bf16.mxu0 %v5215_v19  ;;  %v194_v20 = vsel %vm190_vm1, %v5553_v13, %v5602_v22 }
  0xc8   :  { %v126_v27 = vsel %vm122_vm0, %v5548_v14, %v5597_v24  ;;  %v6508_v29 = vpop.permute.xlu1 %5610 }
  0xc9   :  { %v6510_v32 = vpop.permute.xlu0 %5605  ;;  %v5223_v33 = vpack.c.bf16 %v194_v20, %v126_v27  ;;  %v5612_v26 = vunpack.i.l.bf16 %v6508_v29  ;;  %v415_v20 = vsel %vm412_vm4, %v5578_v57, %v5583_v40 }
  0xca   :  { %v5607_v28 = vunpack.i.l.bf16 %v6510_v32  ;;  %v5233_v54 = vpack.c.bf16 %v415_v20, %v6298_v1 }
  0xcb   :  { %5224 = vmatprep.subr.bf16.mxu1 %v5223_v33  ;;  %v549_v39 = vsel %vm548_vm6, %v5612_v26, %v5592_v7  ;;  %v5603_v33 = vunpack.i.h.bf16 %v6493_v16  ;;  %v5613_v16 = vunpack.i.h.bf16 %v6508_v29 }
  0xcc   :  { %5226 = vmatpush1.bf16.msra.mxu1 %v5225_v35  ;;  %v481_v38 = vsel %vm480_vm5, %v5607_v28, %v5587_v10  ;;  %v6519_v41 = vpop.permute.xlu1 %5620 }
  0xcd   :  { %v6521_v43 = vpop.permute.xlu0 %5615  ;;  %v5217_v44 = vpack.c.bf16 %v549_v39, %v481_v38  ;;  %v5623_v21 = vunpack.i.h.bf16 %v6519_v41  ;;  %v5622_v23 = vunpack.i.l.bf16 %v6519_v41 }
  0xce   :  { %v5618_v45 = vunpack.i.h.bf16 %v6521_v43  ;;  %v5617_v48 = vunpack.i.l.bf16 %v6521_v43 }
  0xcf   :  { %5218 = vmatpush1.bf16.msra.mxu0 %v5217_v44  ;;  %v686_v52 = vsel %vm684_vm8, %v5622_v23, %v5623_v21  ;;  %v195_v44 = vsel %vm190_vm1, %v5602_v22, %v5603_v33  ;;  %v5608_v22 = vunpack.i.h.bf16 %v6510_v32 }
  0xd0   :  { %v618_v51 = vsel %vm616_vm7, %v5617_v48, %v5618_v45  ;;  %v6535_v55 = vpop.permute.xlu1 %5630 }
  0xd1   :  { %v6537_v56 = vpop.permute.xlu0 %5625  ;;  %v5219_v58 = vpack.c.bf16 %v686_v52, %v618_v51  ;;  %v5632_v59 = vunpack.i.l.bf16 %v6535_v55  ;;  %v5633_v29 = vunpack.i.h.bf16 %v6535_v55  ;;  %v483_v60 = vsel %vm480_vm5, %v5588_v8, %v5608_v22 }
  0xd2   :  { %v5627_v46 = vunpack.i.l.bf16 %v6537_v56  ;;  %v5628_v32 = vunpack.i.h.bf16 %v6537_v56 }
  0xd3   :  { %5220 = vmatprep.subr.bf16.mxu0 %v5219_v58  ;;  %v330_v4 = vsel %vm326_vm3, %v5573_v49, %v5632_v59  ;;  %v331_v61 = vsel %vm326_vm3, %v5632_v59, %v5633_v29 }
  0xd4   :  { %v262_v63 = vsel %vm258_vm2, %v5568_v50, %v5627_v46  ;;  %v6553_v7 = vpop.permute.xlu1 %5640 }
  0xd5   :  { %v6555_v10 = vpop.permute.xlu0 %5635  ;;  %v5227_v13 = vpack.c.bf16 %v330_v4, %v262_v63  ;;  %v5642_v37 = vunpack.i.l.bf16 %v6553_v7  ;;  %v551_v63 = vsel %vm548_vm6, %v5593_v5, %v5613_v16  ;;  %v263_v5 = vsel %vm258_vm2, %v5627_v46, %v5628_v32 }
  0xd6   :  { %v5637_v42 = vunpack.i.l.bf16 %v6555_v10 }
  0xd7   :  { %5228 = vmatprep.subr.bf16.mxu1 %v5227_v13  ;;  %v685_v2 = vsel %vm684_vm8, %v5642_v37, %v5622_v23 }
  0xd8   :  { %5230 = vmatpush1.bf16.msra.mxu1 %v5229_v36  ;;  %v617_v3 = vsel %vm616_vm7, %v5637_v42, %v5617_v48  ;;  %v6562_v14 = vpop.permute.xlu1 %5650 }
  0xd9   :  { %v6564_v19 = vpop.permute.xlu0 %5645  ;;  %v5221_v25 = vpack.c.bf16 %v685_v2, %v617_v3  ;;  %v5652_v38 = vunpack.i.l.bf16 %v6562_v14  ;;  %v5643_v3 = vunpack.i.h.bf16 %v6553_v7  ;;  %v5638_v2 = vunpack.i.h.bf16 %v6555_v10 }
  0xda   :  { %v5647_v27 = vunpack.i.l.bf16 %v6564_v19  ;;  %v5249_v10 = vpack.c.bf16 %v331_v61, %v263_v5 }
  0xdb   :  { %5222 = vmatpush1.bf16.msra.mxu0 %v5221_v25  ;;  %v128_v50 = vsel %vm122_vm0, %v5598_v34, %v5652_v38 }
  0xdc   :  { %v416_v53 = vsel %vm412_vm4, %v5583_v40, %v5647_v27  ;;  %v735_v26 = vpop.permute.xlu1 %734  ;;  %v5237_v40 = vpack.c.bf16 %v551_v63, %v483_v60 }
  0xdd   :  { %v6575_v28 = vpop.permute.xlu0 %5655  ;;  %v5231_v35 = vpack.c.bf16 %v416_v53, %v6314_v6  ;;  %v127_v6 = vsel %vm122_vm0, %v5597_v24, %v5598_v34  ;;  %v5648_v53 = vunpack.i.h.bf16 %v6564_v19  ;;  %v687_v34 = vsel %vm684_vm8, %v5623_v21, %v5643_v3 }
  0xde   :  { %v5657_v39 = vunpack.i.l.bf16 %v6575_v28  ;;  %v5245_v24 = vpack.c.bf16 %v195_v44, %v127_v6 }
  0xdf   :  { %5232 = vmatprep.subr.bf16.mxu1 %v5231_v35  ;;  %v417_v43 = vsel %vm412_vm4, %v5647_v27, %v5648_v53 }
  0xe0   :  { %5234 = vmatpush1.bf16.msra.mxu1 %v5233_v54  ;;  %v196_v57 = vsel %vm190_vm1, %v5603_v33, %v5657_v39  ;;  %v733_v23 = vpop.permute.xlu1 %732  ;;  %v619_v33 = vsel %vm616_vm7, %v5618_v45, %v5638_v2 }
  0xe1   :  { %v6590_v48 = vpop.permute.xlu0 %736  ;;  %v753_v49 = vsel %vm752_vm9, %v733_v23, %v735_v26  ;;  %v5243_v18 = vpack.c.bf16 %v196_v57, %v128_v50  ;;  %v5241_v23 = vpack.c.bf16 %v687_v34, %v619_v33 }
  0xe2   :  { %v754_v1 = vsel %vm752_vm9, %v735_v26, %v6590_v48 }
  0xe3   :  { %914 = vmatprep.subr.mxu0 %v754_v1 }
  0xe4   :  { %915 = vmatpush1.msra.mxu0 %v753_v49  ;;  %v6600_v51 = vpop.permute.xlu1 %5665 }
  0xe5   :  { %v6602_v52 = vpop.permute.xlu0 %5660  ;;  %5244 = vmatprep.subr.bf16.mxu0 %v5243_v18  ;;  %5034 = vmatmul.mubr.msk.f32.vlgmr.msra.gmra.mrb[0].mxu0 %vm889_vm10, %v6428_v30  ;;  %v5667_v58 = vunpack.i.l.bf16 %v6600_v51  ;;  %v5668_v41 = vunpack.i.h.bf16 %v6600_v51 }
  0xe6   :  { %v5662_v47 = vunpack.i.l.bf16 %v6602_v52  ;;  %5246 = vmatpush1.bf16.msra.mxu0 %v5245_v24  ;;  %964 = vmatprep.mubr.f32.mxu0 %v8004_v0  ;;  %v5663_v21 = vunpack.i.h.bf16 %v6602_v52  ;;  %v5658_v52 = vunpack.i.h.bf16 %v6575_v28 }
  0xe7   :  { %v552_v13 = vsel %vm548_vm6, %v5613_v16, %v5667_v58  ;;  %v5253_v16 = vpack.c.bf16 %v417_v43, %v6324_v9 }
  0xe8   :  { %v484_v4 = vsel %vm480_vm5, %v5608_v22, %v5662_v47  ;;  %v6619_v37 = vpop.permute.xlu1 %5675  ;;  %v553_v22 = vsel %vm548_vm6, %v5667_v58, %v5668_v41  ;;  %v485_v18 = vsel %vm480_vm5, %v5662_v47, %v5663_v21 }
  0xe9   :  { %v6621_v42 = vpop.permute.xlu0 %5670  ;;  %v5235_v36 = vpack.c.bf16 %v552_v13, %v484_v4  ;;  %5035 = vmatmul.mubr.msk.f32.gmra.mrb[2].mxu0 %vm889_vm10, %v6430_v31  ;;  %v5677_v62 = vunpack.i.l.bf16 %v6619_v37  ;;  %v5257_v60 = vpack.c.bf16 %v553_v22, %v485_v18  ;;  %v197_v13 = vsel %vm190_vm1, %v5657_v39, %v5658_v52 }
  0xea   :  { %v5672_v8 = vunpack.i.l.bf16 %v6621_v42  ;;  %1112 = vmatprep.mubr.f32.mxu0 %v8004_v0 }
  0xeb   :  { %5236 = vmatprep.subr.bf16.mxu1 %v5235_v36  ;;  %v332_v55 = vsel %vm326_vm3, %v5633_v29, %v5677_v62 }
  0xec   :  { %5238 = vmatpush1.bf16.msra.mxu1 %v5237_v40  ;;  %v264_v25 = vsel %vm258_vm2, %v5628_v32, %v5672_v8  ;;  %v6642_v20 = vpop.permute.xlu1 %5685 }
  0xed   :  { %v6644_v59 = vpop.permute.xlu0 %5680  ;;  %v5247_v56 = vpack.c.bf16 %v332_v55, %v264_v25  ;;  %v5687_v46 = vunpack.i.l.bf16 %v6642_v20  ;;  %v5688_v36 = vunpack.i.h.bf16 %v6642_v20  ;;  %v5678_v25 = vunpack.i.h.bf16 %v6619_v37 }
  0xee   :  { %v5682_v7 = vunpack.i.l.bf16 %v6644_v59  ;;  %v5683_v40 = vunpack.i.h.bf16 %v6644_v59 }
  0xef   :  { %5248 = vmatprep.subr.bf16.mxu0 %v5247_v56  ;;  %v688_v35 = vsel %vm684_vm8, %v5643_v3, %v5687_v46  ;;  %v689_v55 = vsel %vm684_vm8, %v5687_v46, %v5688_v36  ;;  %v333_v46 = vsel %vm326_vm3, %v5677_v62, %v5678_v25 }
  0xf0   :  { %5250 = vmatpush1.bf16.msra.mxu0 %v5249_v10  ;;  %v620_v26 = vsel %vm616_vm7, %v5638_v2, %v5682_v7  ;;  %v6657_v54 = vpop.permute.xlu1 %5695  ;;  %v621_v20 = vsel %vm616_vm7, %v5682_v7, %v5683_v40 }
  0xf1   :  { %v6659_v57 = vpop.permute.xlu0 %5690  ;;  %v5239_v44 = vpack.c.bf16 %v688_v35, %v620_v26  ;;  %v5697_v45 = vunpack.i.l.bf16 %v6657_v54  ;;  %v5261_v26 = vpack.c.bf16 %v689_v55, %v621_v20 }
  0xf2   :  { %v5692_v6 = vunpack.i.l.bf16 %v6659_v57  ;;  %v5693_v37 = vunpack.i.h.bf16 %v6659_v57 }
  0xf3   :  { %5240 = vmatprep.subr.bf16.mxu1 %v5239_v44  ;;  %v486_v24 = vsel %vm480_vm5, %v5663_v21, %v5697_v45 }
  0xf4   :  { %5242 = vmatpush1.bf16.msra.mxu1 %v5241_v23  ;;  %v418_v1 = vsel %vm412_vm4, %v5648_v53, %v5692_v6  ;;  %v6671_v49 = vpop.permute.xlu1 %5705 }
  0xf5   :  { %v6673_v50 = vpop.permute.xlu0 %5700  ;;  %v5251_v19 = vpack.c.bf16 %v418_v1, %v6338_v11  ;;  %v5653_v11 = vunpack.i.h.bf16 %v6562_v14  ;;  %v5707_v58 = vunpack.i.l.bf16 %v6671_v49  ;;  %v5708_v33 = vunpack.i.h.bf16 %v6671_v49 }
  0xf6   :  { %v5702_v27 = vunpack.i.l.bf16 %v6673_v50 }
  0xf7   :  { %5252 = vmatprep.subr.bf16.mxu0 %v5251_v19  ;;  %v129_v4 = vsel %vm122_vm0, %v5652_v38, %v5653_v11  ;;  %v130_v2 = vsel %vm122_vm0, %v5653_v11, %v5707_v58  ;;  %v5673_v38 = vunpack.i.h.bf16 %v6621_v42  ;;  %v5698_v42 = vunpack.i.h.bf16 %v6657_v54 }
  0xf8   :  { %5254 = vmatpush1.bf16.msra.mxu0 %v5253_v16  ;;  %v554_v51 = vsel %vm548_vm6, %v5668_v41, %v5702_v27  ;;  %v739_v29 = vpop.permute.xlu1 %738  ;;  %v5265_v39 = vpack.c.bf16 %v197_v13, %v129_v4  ;;  %v131_v19 = vsel %vm122_vm0, %v5707_v58, %v5708_v33 }
  0xf9   :  { %v5711_v9 = vpop.permute.xlu0 %5710  ;;  %v5255_v32 = vpack.c.bf16 %v554_v51, %v486_v24  ;;  %v755_v14 = vsel %vm752_vm9, %v6590_v48, %v739_v29  ;;  %v265_v53 = vsel %vm258_vm2, %v5672_v8, %v5673_v38  ;;  %v487_v57 = vsel %vm480_vm5, %v5697_v45, %v5698_v42 }
  0xfa   :  { %v5712_v47 = vunpack.i.l.bf16 %v5711_v9  ;;  %v5713_v35 = vunpack.i.h.bf16 %v5711_v9  ;;  %v5269_v8 = vpack.c.bf16 %v333_v46, %v265_v53 }
  0xfb   :  { %5256 = vmatprep.subr.bf16.mxu0 %v5255_v32 }
  0xfc   :  { %5258 = vmatpush1.bf16.msra.mxu0 %v5257_v60  ;;  %v198_v63 = vsel %vm190_vm1, %v5658_v52, %v5712_v47  ;;  %v6698_v61 = vpop.permute.xlu1 %608  ;;  %v199_v24 = vsel %vm190_vm1, %v5712_v47, %v5713_v35  ;;  %v419_v52 = vsel %vm412_vm4, %v5692_v6, %v5693_v37 }
  0xfd   :  { %v741_v5 = vpop.permute.xlu0 %740  ;;  %v5263_v28 = vpack.c.bf16 %v198_v63, %v130_v2  ;;  %v622_v10 = vsel %vm616_vm7, %v5683_v40, %v6698_v61  ;;  %v5283_v47 = vpack.c.bf16 %v199_v24, %v131_v19  ;;  %v5273_v4 = vpack.c.bf16 %v419_v52, %v6340_v12 }
  0xfe   :  { %v756_v3 = vsel %vm752_vm9, %v739_v29, %v741_v5  ;;  %v5703_v29 = vunpack.i.h.bf16 %v6673_v50 }
  0xff   :  { %991 = vmatprep.subr.mxu1 %v756_v3 }
 0x100   :  { %992 = vmatpush1.msra.mxu1 %v755_v14  ;;  %v5716_v59 = vpop.permute.xlu1 %5715 }
 0x101   :  { %v6708_v56 = vpop.permute.xlu0 %676  ;;  %5036 = vmatmul.mubr.msk.f32.vlgmr.msra.gmra.mrb[0].mxu1 %vm889_vm10, %v6428_v30  ;;  %5264 = vmatprep.subr.bf16.mxu1 %v5263_v28  ;;  %v5717_v34 = vunpack.i.l.bf16 %v5716_v59  ;;  %v5718_v44 = vunpack.i.h.bf16 %v5716_v59 }
 0x102   :  { %v690_v48 = vsel %vm684_vm8, %v5688_v36, %v6708_v56  ;;  %5266 = vmatpush1.bf16.msra.mxu1 %v5265_v39  ;;  %1041 = vmatprep.mubr.f32.mxu1 %v8004_v0 }
 0x103   :  { %v5259_v7 = vpack.c.bf16 %v690_v48, %v622_v10  ;;  %v266_v1 = vsel %vm258_vm2, %v5673_v38, %v5717_v34  ;;  %v267_v51 = vsel %vm258_vm2, %v5717_v34, %v5718_v44 }
 0x104   :  { %v6724_v23 = vpop.permute.xlu1 %408 }
 0x105   :  { %v5721_v43 = vpop.permute.xlu0 %5720  ;;  %5260 = vmatprep.subr.bf16.mxu0 %v5259_v7  ;;  %5037 = vmatmul.mubr.msk.f32.gmra.mrb[2].mxu1 %vm889_vm10, %v6430_v31  ;;  %v420_v21 = vsel %vm412_vm4, %v5693_v37, %v6724_v23 }
 0x106   :  { %v5723_v62 = vunpack.i.h.bf16 %v5721_v43  ;;  %v5722_v41 = vunpack.i.l.bf16 %v5721_v43  ;;  %5262 = vmatpush1.bf16.msra.mxu0 %v5261_v26  ;;  %1189 = vmatprep.mubr.f32.mxu1 %v8004_v0  ;;  %v5271_v58 = vpack.c.bf16 %v420_v21, %v6361_v15  ;;  %v555_v15 = vsel %vm548_vm6, %v5702_v27, %v5703_v29 }
 0x107   :  { %v5277_v40 = vpack.c.bf16 %v555_v15, %v487_v57 }
 0x108   :  { %v334_v49 = vsel %vm326_vm3, %v5678_v25, %v5722_v41  ;;  %v6736_v16 = vpop.permute.xlu1 %744  ;;  %v335_v11 = vsel %vm326_vm3, %v5722_v41, %v5723_v62 }
 0x109   :  { %v743_v22 = vpop.permute.xlu0 %742  ;;  %v5267_v18 = vpack.c.bf16 %v334_v49, %v266_v1  ;;  %v5287_v60 = vpack.c.bf16 %v335_v11, %v267_v51 }
 0x10a   :  { %v758_v9 = vsel %vm752_vm9, %v743_v22, %v6736_v16  ;;  %v757_v32 = vsel %vm752_vm9, %v741_v5, %v743_v22  ;;  %v1333_v22 = vld [vmem:[#allocation7 + $0x10] sm:$0xff] }
 0x10b   :  { %1068 = vmatprep.subr.mxu0 %v758_v9  ;;  %5268 = vmatprep.subr.bf16.mxu1 %v5267_v18 }
 0x10c   :  { %1069 = vmatpush1.msra.mxu0 %v757_v32  ;;  %5270 = vmatpush1.bf16.msra.mxu1 %v5269_v8  ;;  %v545_v6 = vpop.permute.xlu1 %544  ;;  %v1331_v32 = vld [vmem:[#allocation7] sm:$0xff] }
 0x10d   :  { %v477_v63 = vpop.permute.xlu0 %476  ;;  %5038 = vmatmul.mubr.msk.f32.vlgmr.msra.gmra.mrb[4].mxu0 %vm889_vm10, %v6428_v30  ;;  %5272 = vmatprep.subr.bf16.mxu1 %v5271_v58  ;;  %v556_v13 = vsel %vm548_vm6, %v5703_v29, %v545_v6 }
 0x10e   :  { %v488_v36 = vsel %vm480_vm5, %v5698_v42, %v477_v63  ;;  %5284 = vmatprep.subr.bf16.mxu0 %v5283_v47  ;;  %1118 = vmatprep.mubr.f32.mxu0 %v8004_v0 }
 0x10f   :  { %5286 = vmatpush3.bf16.msra.mxu0 %v5283_v47  ;;  %v5275_v54 = vpack.c.bf16 %v556_v13, %v488_v36 }
 0x110   :  { %5274 = vmatpush1.bf16.msra.mxu1 %v5273_v4  ;;  %5288 = vmatprep.subr.bf16.mxu0 %v5287_v60  ;;  %v5731_v5 = vpop.permute.xlu1 %5730 }
 0x111   :  { %v5726_v45 = vpop.permute.xlu0 %5725  ;;  %5276 = vmatprep.subr.bf16.mxu1 %v5275_v54  ;;  %5039 = vmatmul.mubr.msk.f32.gmra.mrb[6].mxu0 %vm889_vm10, %v6430_v31  ;;  %v5733_v27 = vunpack.i.h.bf16 %v5731_v5  ;;  %v5732_v3 = vunpack.i.l.bf16 %v5731_v5 }
 0x112   :  { %v5728_v12 = vunpack.i.h.bf16 %v5726_v45  ;;  %v5727_v50 = vunpack.i.l.bf16 %v5726_v45  ;;  %5135 = vmatprep.mubr.msk.f32.mxu0 %vm889_vm10, %v6428_v30 }
 0x113   :  { %5290 = vmatpush3.bf16.msra.mxu0 %v5287_v60  ;;  %v691_v25 = vsel %vm684_vm8, %v6708_v56, %v5732_v3  ;;  %v692_v28 = vsel %vm684_vm8, %v5732_v3, %v5733_v27  ;;  %v1332_v60 = vld [vmem:[#allocation7 + $0x8] sm:$0xff] }
 0x114   :  { %v623_v2 = vsel %vm616_vm7, %v6698_v61, %v5727_v50  ;;  %5278 = vmatpush1.bf16.msra.mxu1 %v5277_v40  ;;  %v624_v14 = vsel %vm616_vm7, %v5727_v50, %v5728_v12  ;;  %v479_v39 = vpop.permute.xlu1 %478  ;;  %v1334_v40 = vld [vmem:[#allocation7 + $0x18] sm:$0xff] }
 0x115   :  { %v411_v38 = vpop.permute.xlu0 %410  ;;  %v5279_v55 = vpack.c.bf16 %v692_v28, %v624_v14  ;;  %v5281_v20 = vpack.c.bf16 %v691_v25, %v623_v2  ;;  %v489_v61 = vsel %vm480_vm5, %v477_v63, %v479_v39  ;;  %v1342_v28 = vld [vmem:[#allocation7 + $0x58] sm:$0xff] }
 0x116   :  { %v421_v59 = vsel %vm412_vm4, %v6724_v23, %v411_v38 }
 0x117   :  { %v5291_v10 = vpack.c.bf16 %v421_v59, %v6367_v17  ;;  %5280 = vmatprep.subr.bf16.mxu1 %v5279_v55 }
 0x118   :  { %5282 = vmatpush1.bf16.msra.mxu1 %v5281_v20  ;;  %v747_v46 = vpop.permute.xlu1 %746 }
 0x119   :  { %v547_v48 = vpop.permute.xlu0 %546  ;;  %5292 = vmatprep.subr.bf16.mxu0 %v5291_v10  ;;  %v759_v33 = vsel %vm752_vm9, %v6736_v16, %v747_v46 }
 0x11a   :  { %v557_v56 = vsel %vm548_vm6, %v545_v6, %v547_v48  ;;  %5294 = vmatpush3.bf16.msra.mxu0 %v5291_v10 }
 0x11b   :  { %v5295_v7 = vpack.c.bf16 %v557_v56, %v489_v61 }
 0x11c   :  { %v615_v34 = vpop.permute.xlu1 %614 }
 0x11d   :  { %v749_v53 = vpop.permute.xlu0 %748  ;;  %5296 = vmatprep.subr.bf16.mxu0 %v5295_v7  ;;  %v625_v17 = vsel %vm616_vm7, %v5728_v12, %v615_v34 }
 0x11e   :  { %v760_v26 = vsel %vm752_vm9, %v747_v46, %v749_v53  ;;  %5298 = vmatpush3.bf16.msra.mxu0 %v5295_v7 }
 0x11f   :  { %1145 = vmatprep.subr.mxu1 %v760_v26  ;;  %v1340_v26 = vld [vmem:[#allocation7 + $0x48] sm:$0xff] }
 0x120   :  { %1146 = vmatpush1.msra.mxu1 %v759_v33  ;;  %v751_v44 = vpop.permute.xlu1 %750 }
 0x121   :  { %v683_v35 = vpop.permute.xlu0 %682  ;;  %5040 = vmatmul.mubr.msk.f32.vlgmr.msra.gmra.mrb[4].mxu1 %vm889_vm10, %v6428_v30  ;;  %v761_v37 = vsel %vm752_vm9, %v749_v53, %v751_v44 }
 0x122   :  { %v693_v23 = vsel %vm684_vm8, %v5733_v27, %v683_v35  ;;  %1195 = vmatprep.mubr.f32.mxu1 %v8004_v0  ;;  %v1341_v35 = vld [vmem:[#allocation7 + $0x50] sm:$0xff] }
 0x123   :  { %v5299_v43 = vpack.c.bf16 %v693_v23, %v625_v17 }
 0x125   :  { %5041 = vmatmul.mubr.msk.f32.gmra.mrb[6].mxu1 %vm889_vm10, %v6430_v31  ;;  %5300 = vmatprep.subr.bf16.mxu0 %v5299_v43 }
 0x126   :  { %5302 = vmatpush3.bf16.msra.mxu0 %v5299_v43  ;;  %1790 = vmatprep.mubr.f32.mxu1 %v8004_v0 }
 0x127   :  { %5133 = vmatprep.subr.mxu0 %v761_v37 }
 0x12a   :  { %5134 = vmatpush3.msra.mxu0 %v761_v37 }
 0x12b   :  { %5136 = vmatmul.mubr.msk.f32.vlgmr.msra.gmra.mrb[8].mxu0 %vm889_vm10, %v6430_v31 }
 0x12c   :  { %2003 = vmatprep.mubr.f32.mxu0 %v8004_v0 }
 0x131   :  { %v6793_v8 = vpop.permute.xlu1 %881 }
 0x132   :  { %v6821_v12 = vpop.permute.xlu0 %886 }
 0x1b8   :  { %v960_v30 = vpop.f32.mrb[0].mxu0 }
 0x1b9   :  { %v962_v62 = vpop.f32.mrb[1].mxu0  ;;  %v961_v1 = vadd.f32 %v960_v30, %v6793_v8  ;;  %v1343_v30 = vld [vmem:[#allocation7 + $0x60] sm:$0xff] }
 0x1ba   :  { %v963_v49 = vadd.f32 %v962_v62, %v6793_v8 }
 0x1bb   :  { %v1295_v24 = vmul.f32 0.3, %v961_v1  ;;  %vm1277_vm12 = vcmp.ge.f32.partialorder %v961_v1, 0.0 }
 0x1bc   :  { %v966_v41 = vpop.f32.mrb[2].mxu0  ;;  %v1296_v51 = vmul.f32 0.3, %v963_v49  ;;  %vm1278_vm13 = vcmp.ge.f32.partialorder %v963_v49, 0.0 }
 0x1bd   :  { %v968_v42 = vpop.f32.mrb[3].mxu0  ;;  %v1313_v58 = vsel %vm1277_vm12, %v961_v1, %v1295_v24  ;;  %v967_v38 = vadd.f32 %v966_v41, %v6821_v12 }
 0x1be   :  { %v1314_v47 = vsel %vm1278_vm13, %v963_v49, %v1296_v51  ;;  %v6805_v6 = vmul.f32 %v1331_v32, %v1313_v58  ;;  %v969_v39 = vadd.f32 %v968_v42, %v6821_v12  ;;  %v1335_v49 = vld [vmem:[#allocation7 + $0x20] sm:$0xff] }
 0x1bf   :  { %v6807_v63 = vmul.f32 %v1332_v60, %v1314_v47  ;;  %v1304_v61 = vmul.f32 0.3, %v967_v38  ;;  %vm1286_vm0 = vcmp.ge.f32.partialorder %v967_v38, 0.0  ;;  %v1344_v60 = vld [vmem:[#allocation7 + $0x68] sm:$0xff] }
 0x1c0   :  { %v1305_v48 = vmul.f32 0.3, %v969_v39  ;;  %vm1287_vm2 = vcmp.ge.f32.partialorder %v969_v39, 0.0 }
 0x1c1   :  { %v5761_v36 = vpack.i.bf16 %v6807_v63, %v6805_v6  ;;  %v1322_v34 = vsel %vm1286_vm0, %v967_v38, %v1304_v61  ;;  %v1347_v38 = vld [vmem:[#allocation7 + $0x80] sm:$0xff] }
 0x1c2   :  { %v1323_v17 = vsel %vm1287_vm2, %v969_v39, %v1305_v48  ;;  %v6852_v44 = vmul.f32 %v1340_v26, %v1322_v34  ;;  %v1348_v26 = vld [vmem:[#allocation7 + $0x88] sm:$0xff] }
 0x1c3   :  { %v6854_v23 = vmul.f32 %v1341_v35, %v1323_v17 }
 0x1d4   :  { %v1037_v21 = vpop.f32.mrb[0].mxu1 }
 0x1d5   :  { %v1038_v19 = vadd.f32 %v1037_v21, %v6793_v8  ;;  %v1039_v31 = vpop.f32.mrb[1].mxu1  ;;  %v5821_v21 = vpack.i.bf16 %v6854_v23, %v6852_v44 }
 0x1d6   :  { %v1040_v57 = vadd.f32 %v1039_v31, %v6793_v8 }
 0x1d7   :  { %vm1279_vm11 = vcmp.ge.f32.partialorder %v1038_v19, 0.0  ;;  %v1297_v16 = vmul.f32 0.3, %v1038_v19 }
 0x1d8   :  { %v1043_v18 = vpop.f32.mrb[2].mxu1  ;;  %v1298_v15 = vmul.f32 0.3, %v1040_v57  ;;  %vm1280_vm14 = vcmp.ge.f32.partialorder %v1040_v57, 0.0 }
 0x1d9   :  { %v1315_v11 = vsel %vm1279_vm11, %v1038_v19, %v1297_v16  ;;  %v1045_v52 = vpop.f32.mrb[3].mxu1  ;;  %v1044_v27 = vadd.f32 %v1043_v18, %v6821_v12 }
 0x1da   :  { %v6798_v29 = vmul.f32 %v1333_v22, %v1315_v11  ;;  %v1316_v45 = vsel %vm1280_vm14, %v1040_v57, %v1298_v15  ;;  %v1046_v59 = vadd.f32 %v1045_v52, %v6821_v12  ;;  %v1336_v52 = vld [vmem:[#allocation7 + $0x28] sm:$0xff] }
 0x1db   :  { %v6823_v50 = vmul.f32 %v1334_v40, %v1316_v45  ;;  %v1306_v25 = vmul.f32 0.3, %v1044_v27  ;;  %vm1288_vm15 = vcmp.ge.f32.partialorder %v1044_v27, 0.0 }
 0x1dc   :  { %v5741_v9 = vpack.i.bf16 %v6798_v29, %v8004_v0  ;;  %v5776_v2 = vpack.i.bf16 %v6798_v29, %v6807_v63  ;;  %v1307_v53 = vmul.f32 0.3, %v1046_v59  ;;  %vm1289_vm5 = vcmp.ge.f32.partialorder %v1046_v59, 0.0 }
 0x1dd   :  { %v5781_v3 = vpack.i.bf16 %v6823_v50, %v6805_v6  ;;  %v1324_v14 = vsel %vm1288_vm15, %v1044_v27, %v1306_v25 }
 0x1de   :  { %5742 = vrot.lane.b32.xlu0 %v5741_v9, %s6226_s7  ;;  %5737 = vrot.lane.b32.xlu1 %v5741_v9, %s6227_s8  ;;  %v6840_v20 = vmul.f32 %v1342_v28, %v1324_v14  ;;  %v1325_v37 = vsel %vm1289_vm5, %v1046_v59, %v1307_v53  ;;  %v1337_v53 = vld [vmem:[#allocation7 + $0x30] sm:$0xff] }
 0x1df   :  { %v6862_v42 = vmul.f32 %v1343_v30, %v1325_v37 }
 0x1e0   :  { %v1114_v4 = vpop.f32.mrb[4].mxu0  ;;  %v5811_v56 = vpack.i.bf16 %v6840_v20, %v8004_v0  ;;  %v5826_v22 = vpack.i.bf16 %v6840_v20, %v6854_v23 }
 0x1e1   :  { %v6809_v13 = vpop.f32.mrb[5].mxu0  ;;  %v1115_v7 = vadd.f32 %v1114_v4, %v6793_v8  ;;  %v5831_v16 = vpack.i.bf16 %v6862_v42, %v6852_v44 }
 0x1e2   :  { %5752 = vrot.lane.b32.xlu0 %v5741_v9, %s6216_s25  ;;  %5747 = vrot.lane.b32.xlu1 %v5741_v9, %s6221_s30  ;;  %v1117_v19 = vadd.f32 %v6809_v13, %v6793_v8 }
 0x1e3   :  { %v1299_v43 = vmul.f32 0.3, %v1115_v7  ;;  %vm1281_vm7 = vcmp.ge.f32.partialorder %v1115_v7, 0.0 }
 0x1e4   :  { %v6815_v54 = vpop.f32.mrb[6].mxu0  ;;  %v1300_v18 = vmul.f32 0.3, %v1117_v19  ;;  %vm1282_vm10 = vcmp.ge.f32.partialorder %v1117_v19, 0.0 }
 0x1e5   :  { %v6817_v5 = vpop.f32.mrb[7].mxu0  ;;  %v1317_v1 = vsel %vm1281_vm7, %v1115_v7, %v1299_v43  ;;  %v1121_v24 = vadd.f32 %v6815_v54, %v6821_v12  ;;  %vm1425_vm7 = vcmask 392192  }
 0x1e6   :  { %5762 = vrot.lane.b32.xlu0 %v5761_v36, %s6226_s7  ;;  %5757 = vrot.lane.b32.xlu1 %v5761_v36, %s6227_s8  ;;  %v6870_v31 = vmul.f32 %v1335_v49, %v1317_v1  ;;  %v1318_v11 = vsel %vm1282_vm10, %v1117_v19, %v1300_v18  ;;  %v1123_v57 = vadd.f32 %v6817_v5, %v6821_v12  ;;  %v1346_v5 = vld [vmem:[#allocation7 + $0x78] sm:$0xff]  ;;  %vm1645_vm10 = vcmask 654336  }
 0x1e7   :  { %v1308_v9 = vmul.f32 0.3, %v1121_v24  ;;  %vm1290_vm11 = vcmp.ge.f32.partialorder %v1121_v24, 0.0  ;;  %v6885_v32 = vmul.f32 %v1336_v52, %v1318_v11  ;;  %v1338_v1 = vld [vmem:[#allocation7 + $0x38] sm:$0xff] }
 0x1e8   :  { %8032 = vst [vmem:[#allocation14_spill] sm:$0xff] %v6870_v31  ;;  %v5836_v51 = vpack.i.bf16 %v6870_v31, %v6823_v50  ;;  %v1309_v54 = vmul.f32 0.3, %v1123_v57  ;;  %vm1291_vm13 = vcmp.ge.f32.partialorder %v1123_v57, 0.0 }
 0x1e9   :  { %8033 = vst [vmem:[#allocation15_spill] sm:$0xff] %v6885_v32  ;;  %v1326_v47 = vsel %vm1290_vm11, %v1121_v24, %v1308_v9  ;;  %v6895_v4 = vpack.i.bf16 %v6885_v32, %v6870_v31  ;;  %v1339_v24 = vld [vmem:[#allocation7 + $0x40] sm:$0xff]  ;;  %vm1723_vm11 = vcmask 326656  }
 0x1ea   :  { %5772 = vrot.lane.b32.xlu0 %v5761_v36, %s6216_s25  ;;  %5767 = vrot.lane.b32.xlu1 %v5761_v36, %s6221_s30  ;;  %v6897_v15 = vmul.f32 %v1344_v60, %v1326_v47 }
 0x1ec   :  { %v5866_v45 = vpack.i.bf16 %v6897_v15, %v6862_v42 }
 0x1ee   :  { %5782 = vrot.lane.b32.xlu0 %v5781_v3, %s6218_s27  ;;  %5777 = vrot.lane.b32.xlu1 %v5776_v2, %s6218_s27 }
 0x1f2   :  { %5787 = vrot.lane.b32.xlu0 %v5776_v2, %s6223_s5  ;;  %5792 = vrot.lane.b32.xlu1 %v5776_v2, %s6228_s9  ;;  %v1345_v2 = vld [vmem:[#allocation7 + $0x70] sm:$0xff] }
 0x1f4   :  { %v6838_v55 = vpop.f32.mrb[4].mxu1 }
 0x1f5   :  { %v6843_v10 = vpop.f32.mrb[5].mxu1  ;;  %v1192_v14 = vadd.f32 %v6838_v55, %v6793_v8 }
 0x1f6   :  { %5797 = vrot.lane.b32.xlu0 %v5781_v3, %s6223_s5  ;;  %5802 = vrot.lane.b32.xlu1 %v5781_v3, %s6228_s9  ;;  %v1327_v3 = vsel %vm1291_vm13, %v1123_v57, %v1309_v54  ;;  %v1194_v30 = vadd.f32 %v6843_v10, %v6793_v8  ;;  %vm2147_vm13 = vcmask 31744  }
 0x1f7   :  { %v6911_v39 = vmul.f32 %v1345_v2, %v1327_v3  ;;  %v1301_v48 = vmul.f32 0.3, %v1192_v14  ;;  %vm1283_vm15 = vcmp.ge.f32.partialorder %v1192_v14, 0.0  ;;  %v7050_v3 = vld [vmem:[#allocation9 + $0x10] sm:$0xff] }
 0x1f8   :  { %v1197_v46 = vpop.f32.mrb[6].mxu1  ;;  %vm1284_vm2 = vcmp.ge.f32.partialorder %v1194_v30, 0.0  ;;  %8037 = vst [vmem:[#allocation19_spill] sm:$0xff] %v7050_v3 }
 0x1f9   :  { %v1199_v33 = vpop.f32.mrb[7].mxu1  ;;  %v1198_v58 = vadd.f32 %v1197_v46, %v6821_v12  ;;  %v5871_v55 = vpack.i.bf16 %v6911_v39, %v6897_v15  ;;  %v1319_v7 = vsel %vm1283_vm15, %v1192_v14, %v1301_v48  ;;  %vm2569_vm15 = vcmask 1022976  }
 0x1fa   :  { %5812 = vrot.lane.b32.xlu0 %v5811_v56, %s6215_s24  ;;  %5807 = vrot.lane.b32.xlu1 %v5811_v56, %s6229_s1  ;;  %v1200_v36 = vadd.f32 %v1199_v33, %v6821_v12 }
 0x1fb   :  { %v1310_v13 = vmul.f32 0.3, %v1198_v58  ;;  %vm1292_vm12 = vcmp.ge.f32.partialorder %v1198_v58, 0.0 }
 0x1fc   :  { %v1311_v27 = vmul.f32 0.3, %v1200_v36  ;;  %vm1293_vm14 = vcmp.ge.f32.partialorder %v1200_v36, 0.0 }
 0x1fd   :  { %v1328_v40 = vsel %vm1292_vm12, %v1198_v58, %v1310_v13  ;;  %vm2215_vm12 = vcmask 23552  }
 0x1fe   :  { %v5137_v62 = vpop.f32.mrb[8].mxu0  ;;  %1629 = vrot.lane.b32.xlu0 %v6840_v20, %s6225_s6  ;;  %1625 = vrot.lane.b32.xlu1 %v6852_v44, %s6225_s6  ;;  %v6907_v25 = vmul.f32 %v1346_v5, %v1328_v40  ;;  %v1329_v28 = vsel %vm1293_vm14, %v1200_v36, %v1311_v27  ;;  %vm6232_vm14 = vmmov 0  }
 0x1ff   :  { %v6860_v41 = vpop.f32.mrb[9].mxu0  ;;  %v6916_v59 = vmul.f32 %v1347_v38, %v1329_v28  ;;  %v1274_v46 = vadd.f32 %v5137_v62, %v6821_v12  ;;  %v6930_v12 = vmul.f32 %v1337_v53, %v1319_v7  ;;  %v1302_v62 = vmul.f32 0.3, %v1194_v30 }
 0x200   :  { %v5876_v61 = vpack.i.bf16 %v6907_v25, %v6911_v39  ;;  %v1269_v19 = vadd.f32 %v6860_v41, %v6793_v8 }
 0x201   :  { %v5886_v56 = vpack.i.bf16 %v6916_v59, %v6907_v25  ;;  %v1312_v33 = vmul.f32 0.3, %v1274_v46  ;;  %vm1294_vm0 = vcmp.ge.f32.partialorder %v1274_v46, 0.0  ;;  %8034 = vst [vmem:[#allocation16_spill] sm:$0xff] %v6930_v12  ;;  %v5901_v35 = vpack.i.bf16 %v6930_v12, %v6885_v32 }
 0x202   :  { %5822 = vrot.lane.b32.xlu0 %v5821_v21, %s6215_s24  ;;  %5817 = vrot.lane.b32.xlu1 %v5821_v21, %s6229_s1  ;;  %v1320_v21 = vsel %vm1284_vm2, %v1194_v30, %v1302_v62  ;;  %vm1285_vm5 = vcmp.ge.f32.partialorder %v1269_v19, 0.0  ;;  %vm2751_vm2 = vcmask 588800  }
 0x203   :  { %v1330_v34 = vsel %vm1294_vm0, %v1274_v46, %v1312_v33  ;;  %v6964_v10 = vmul.f32 %v1338_v1, %v1320_v21  ;;  %vm2637_vm0 = vcmask 1014784  }
 0x204   :  { %v6935_v17 = vmul.f32 %v1348_v26, %v1330_v34 }
 0x205   :  { %8035 = vst [vmem:[#allocation17_spill] sm:$0xff] %v6964_v10  ;;  %v5936_v49 = vpack.i.bf16 %v6964_v10, %v6930_v12 }
 0x206   :  { %5832 = vrot.lane.b32.xlu0 %v5831_v16, %s6219_s28  ;;  %5827 = vrot.lane.b32.xlu1 %v5826_v22, %s6219_s28  ;;  %v5891_v43 = vpack.i.bf16 %v6935_v17, %v6916_v59  ;;  %v5911_v37 = vpack.i.bf16 %v8004_v0, %v6935_v17  ;;  %v1303_v16 = vmul.f32 0.3, %v1269_v19  ;;  %v6978_v22 = vpop.permute.xlu1 %1643 }
 0x208   :  { %v1321_v18 = vsel %vm1285_vm5, %v1269_v19, %v1303_v16 }
 0x209   :  { %v6984_v8 = vmul.f32 %v1339_v24, %v1321_v18 }
 0x20a   :  { %5837 = vrot.lane.b32.xlu0 %v5836_v51, %s6227_s8  ;;  %1627 = vrot.lane.b32.xlu1 %v6854_v23, %s6225_s6 }
 0x20b   :  { %8036 = vst [vmem:[#allocation18_spill] sm:$0xff] %v6984_v8  ;;  %v5946_v9 = vpack.i.bf16 %v6984_v8, %v6964_v10 }
 0x20e   :  { %5847 = vrot.lane.b32.xlu0 %v5836_v51, %s6221_s30  ;;  %1631 = vrot.lane.b32.xlu1 %v6862_v42, %s6225_s6 }
 0x212   :  { %5857 = vrot.lane.b32.xlu0 %v6895_v4, %s6218_s27  ;;  %5842 = vrot.lane.b32.xlu1 %v5836_v51, %s6226_s7 }
 0x216   :  { %5867 = vrot.lane.b32.xlu0 %v5866_v45, %s6215_s24  ;;  %5852 = vrot.lane.b32.xlu1 %v5836_v51, %s6216_s25 }
 0x21a   :  { %1633 = vrot.lane.b32.xlu0 %v6897_v15, %s6225_s6  ;;  %5862 = vrot.lane.b32.xlu1 %v5866_v45, %s6229_s1 }
 0x21e   :  { %1637 = vrot.lane.b32.xlu0 %v6907_v25, %s6225_s6  ;;  %5877 = vrot.lane.b32.xlu1 %v5876_v61, %s6229_s1 }
 0x222   :  { %5872 = vrot.lane.b32.xlu0 %v5871_v55, %s6219_s28  ;;  %5887 = vrot.lane.b32.xlu1 %v5886_v56, %s6219_s28 }
 0x226   :  { %5882 = vrot.lane.b32.xlu0 %v5876_v61, %s6215_s24  ;;  %1635 = vrot.lane.b32.xlu1 %v6911_v39, %s6225_s6 }
 0x22a   :  { %5902 = vrot.lane.b32.xlu0 %v5901_v35, %s6226_s7  ;;  %1639 = vrot.lane.b32.xlu1 %v6916_v59, %s6225_s6 }
 0x22e   :  { %2621 = vrot.lane.b32.xlu0 %v6798_v29, %s6230_s10  ;;  %5892 = vrot.lane.b32.xlu1 %v5891_v43, %s6229_s1 }
 0x232   :  { %5907 = vrot.lane.b32.xlu0 %v5891_v43, %s6215_s24  ;;  %5897 = vrot.lane.b32.xlu1 %v5901_v35, %s6227_s8 }
 0x236   :  { %5912 = vrot.lane.b32.xlu0 %v5911_v37, %s6219_s28  ;;  %2619 = vrot.lane.b32.xlu1 %v6807_v63, %s6230_s10 }
 0x23a   :  { %1641 = vrot.lane.b32.xlu0 %v6935_v17, %s6225_s6  ;;  %2617 = vrot.lane.b32.xlu1 %v6805_v6, %s6230_s10 }
 0x23e   :  { %5917 = vrot.lane.b32.xlu0 %v6895_v4, %s6223_s5  ;;  %5922 = vrot.lane.b32.xlu1 %v6895_v4, %s6228_s9 }
 0x242   :  { %5927 = vrot.lane.b32.xlu0 %v5901_v35, %s6221_s30  ;;  %5932 = vrot.lane.b32.xlu1 %v5901_v35, %s6216_s25 }
 0x246   :  { %5937 = vrot.lane.b32.xlu0 %v5936_v49, %s6218_s27  ;;  %2623 = vrot.lane.b32.xlu1 %v6823_v50, %s6230_s10 }
 0x24a   :  { %2211 = vrot.lane.b32.xlu0 %v6964_v10, %s6226_s7  ;;  %5942 = vrot.lane.b32.xlu1 %v5936_v49, %s6223_s5 }
 0x24e   :  { %2625 = vrot.lane.b32.xlu0 %v6870_v31, %s6230_s10  ;;  %2279 = vrot.lane.b32.xlu1 %v6964_v10, %s6221_s30 }
 0x250   :  { %v6986_v41 = vpop.permute.xlu0 %5742  ;;  %v6988_v51 = vpop.permute.xlu1 %5737 }
 0x252   :  { %2561 = vrot.lane.b32.xlu0 %v6930_v12, %s6228_s9  ;;  %2629 = vrot.lane.b32.xlu1 %v6930_v12, %s6230_s10 }
 0x254   :  { %v6994_v11 = vpop.permute.xlu0 %5752  ;;  %v6996_v52 = vpop.permute.xlu1 %5747 }
 0x256   :  { %2346 = vrot.lane.b32.xlu0 %v6964_v10, %s6216_s25  ;;  %5947 = vrot.lane.b32.xlu1 %v5946_v9, %s6227_s8 }
 0x258   :  { %v7003_v58 = vpop.permute.xlu0 %5762  ;;  %v7005_v47 = vpop.permute.xlu1 %5757 }
 0x25a   :  { %2627 = vrot.lane.b32.xlu0 %v6885_v32, %s6230_s10  ;;  %2631 = vrot.lane.b32.xlu1 %v6964_v10, %s6230_s10 }
 0x25c   :  { %v7011_v60 = vpop.permute.xlu0 %5772  ;;  %v7013_v57 = vpop.permute.xlu1 %5767 }
 0x25e   :  { %2213 = vrot.lane.b32.xlu0 %v6984_v8, %s6226_s7  ;;  %2431 = vrot.lane.b32.xlu1 %v6984_v8, %s6218_s27 }
 0x260   :  { %v7019_v4 = vpop.permute.xlu0 %5782  ;;  %v7021_v13 = vpop.permute.xlu1 %5777 }
 0x262   :  { %5952 = vrot.lane.b32.xlu0 %v5946_v9, %s6228_s9  ;;  %2498 = vrot.lane.b32.xlu1 %v6984_v8, %s6223_s5 }
 0x264   :  { %v7026_v36 = vpop.permute.xlu0 %5787  ;;  %v7028_v54 = vpop.permute.xlu1 %5792 }
 0x266   :  { %2348 = vrot.lane.b32.xlu0 %v6984_v8, %s6216_s25  ;;  %2281 = vrot.lane.b32.xlu1 %v6984_v8, %s6221_s30 }
 0x268   :  { %v7034_v45 = vpop.permute.xlu0 %5797  ;;  %v7036_v40 = vpop.permute.xlu1 %5802 }
 0x26a   :  { %2633 = vrot.lane.b32.xlu0 %v6984_v8, %s6230_s10  ;;  %2433 = vrot.lane.b32.xlu1 %v8004_v0, %s6218_s27 }
 0x26c   :  { %v7042_v5 = vpop.permute.xlu0 %5812  ;;  %v7044_v27 = vpop.permute.xlu1 %5807 }
 0x26d   :  { %v5814_v28 = vunpack.i.l.bf16 %v7042_v5  ;;  %v5809_v38 = vunpack.i.l.bf16 %v7044_v27 }
 0x26e   :  { %2500 = vrot.lane.b32.xlu0 %v8004_v0, %s6223_s5  ;;  %2567 = vrot.lane.b32.xlu1 %v8004_v0, %s6228_s9 }
 0x270   :  { %v7052_v2 = vpop.permute.xlu0 %1629  ;;  %v1626_v14 = vpop.permute.xlu1 %1625 }
 0x272   :  { %2635 = vrot.lane.b32.xlu0 %v8004_v0, %s6230_s10  ;;  %2748 = vperm.xlu1 %5735, %v7050_v3  }
 0x274   :  { %v5823_v61 = vpop.permute.xlu0 %5822  ;;  %v5818_v48 = vpop.permute.xlu1 %5817 }
 0x275   :  { %v5825_v46 = vunpack.i.h.bf16 %v5823_v61  ;;  %v5824_v55 = vunpack.i.l.bf16 %v5823_v61  ;;  %v5820_v56 = vunpack.i.h.bf16 %v5818_v48  ;;  %v5819_v7 = vunpack.i.l.bf16 %v5818_v48  ;;  %v7073_v48 = vld [vmem:[#allocation9 + $0x20] sm:$0xff] }
 0x277   :  { %v1493_v53 = vsel %vm190_vm1, %v5814_v28, %v5824_v55  ;;  %v1426_v33 = vsel %vm1425_vm7, %v5809_v38, %v5819_v7  ;;  %v1427_v35 = vsel %vm1425_vm7, %v5819_v7, %v5820_v56  ;;  %v1494_v43 = vsel %vm190_vm1, %v5824_v55, %v5825_v46 }
 0x278   :  { %v5833_v34 = vpop.permute.xlu0 %5832  ;;  %v5828_v26 = vpop.permute.xlu1 %5827  ;;  %v5305_v21 = vpack.c.bf16 %v1493_v53, %v1426_v33  ;;  %v5303_v1 = vpack.c.bf16 %v1494_v43, %v1427_v35  ;;  %v5810_v35 = vunpack.i.h.bf16 %v7044_v27 }
 0x279   :  { %v5834_v37 = vunpack.i.l.bf16 %v5833_v34  ;;  %v5830_v30 = vunpack.i.h.bf16 %v5828_v26  ;;  %v5829_v62 = vunpack.i.l.bf16 %v5828_v26  ;;  %v5815_v26 = vunpack.i.h.bf16 %v7042_v5 }
 0x27a   :  { %5304 = vmatprep.subr.bf16.mxu1 %v5303_v1  ;;  %v5835_v5 = vunpack.i.h.bf16 %v5833_v34 }
 0x27b   :  { %v1578_v49 = vsel %vm548_vm6, %v5834_v37, %v5829_v62  ;;  %v1579_v19 = vsel %vm548_vm6, %v5829_v62, %v5830_v30  ;;  %5306 = vmatpush1.bf16.msra.mxu1 %v5305_v21  ;;  %v1495_v62 = vsel %vm190_vm1, %v5825_v46, %v5815_v26  ;;  %v1428_v21 = vsel %vm1425_vm7, %v5820_v56, %v5810_v35 }
 0x27c   :  { %v7065_v16 = vpop.permute.xlu0 %5837  ;;  %v1628_v18 = vpop.permute.xlu1 %1627  ;;  %v5307_v24 = vpack.c.bf16 %v1579_v19, %v6854_v23  ;;  %v5309_v9 = vpack.c.bf16 %v1578_v49, %v6852_v44  ;;  %v1580_v46 = vsel %vm548_vm6, %v5830_v30, %v5835_v5 }
 0x27d   :  { %v1647_v61 = vsel %vm1645_vm10, %v1628_v18, %v7052_v2  ;;  %v1646_v55 = vsel %vm1645_vm10, %v1626_v14, %v1628_v18  ;;  %v5317_v34 = vpack.c.bf16 %v1580_v46, %v6840_v20 }
 0x27e   :  { %5308 = vmatprep.subr.bf16.mxu1 %v5307_v24 }
 0x27f   :  { %5310 = vmatpush1.bf16.msra.mxu1 %v5309_v9  ;;  %v5313_v9 = vpack.c.bf16 %v1495_v62, %v1428_v21 }
 0x280   :  { %v7069_v28 = vpop.permute.xlu0 %5847  ;;  %v1632_v38 = vpop.permute.xlu1 %1631  ;;  %1734 = vmatprep.subr.mxu1 %v1647_v61 }
 0x281   :  { %v1648_v46 = vsel %vm1645_vm10, %v7052_v2, %v1632_v38  ;;  %v8008_v2 = vunpack.i.h.bf16 %v6986_v41 }
 0x283   :  { %1735 = vmatpush1.msra.mxu1 %v1646_v55 }
 0x284   :  { %v7076_v7 = vpop.permute.xlu0 %5857  ;;  %v7078_v23 = vpop.permute.xlu1 %5842  ;;  %5044 = vmatmul.mubr.msk.f32.vlgmr.msra.gmra.mrb[8].mxu1 %vm1723_vm11, %v7073_v48 }
 0x285   :  { %1861 = vmatprep.mubr.f32.mxu1 %v8004_v0 }
 0x288   :  { %v5868_v44 = vpop.permute.xlu0 %5867  ;;  %v7083_v53 = vpop.permute.xlu1 %5852 }
 0x289   :  { %v5869_v33 = vunpack.i.l.bf16 %v5868_v44 }
 0x28b   :  { %v1496_v49 = vsel %vm190_vm1, %v5815_v26, %v5869_v33 }
 0x28c   :  { %v7087_v43 = vpop.permute.xlu0 %1633  ;;  %v5863_v14 = vpop.permute.xlu1 %5862 }
 0x28d   :  { %v5864_v37 = vunpack.i.l.bf16 %v5863_v14  ;;  %v5865_v0 = vunpack.i.h.bf16 %v5863_v14 }
 0x28f   :  { %v1429_v1 = vsel %vm1425_vm7, %v5810_v35, %v5864_v37  ;;  %v5870_v35 = vunpack.i.h.bf16 %v5868_v44  ;;  %v1649_v44 = vsel %vm1645_vm10, %v1632_v38, %v7087_v43  ;;  %v5744_v38 = vunpack.i.l.bf16 %v6986_v41 }
 0x290   :  { %v7093_v19 = vpop.permute.xlu0 %1637  ;;  %v7095_v18 = vpop.permute.xlu1 %5877  ;;  %v5311_v24 = vpack.c.bf16 %v1496_v49, %v1429_v1 }
 0x291   :  { %v8009_v62 = vunpack.i.l.bf16 %v7095_v18  ;;  %v8040_v31 = vunpack.i.l.bf16 %v7095_v18 }
 0x292   :  { %5312 = vmatprep.subr.bf16.mxu1 %v5311_v24  ;;  %v1430_v24 = vsel %vm1425_vm7, %v5864_v37, %v5865_v0 }
 0x293   :  { %5314 = vmatpush1.bf16.msra.mxu1 %v5313_v9  ;;  %v1431_v20 = vsel %vm1425_vm7, %v5865_v0, %v8009_v62 }
 0x294   :  { %v5873_v27 = vpop.permute.xlu0 %5872  ;;  %v7097_v61 = vpop.permute.xlu1 %5887 }
 0x295   :  { %v5874_v55 = vunpack.i.l.bf16 %v5873_v27  ;;  %v5875_v21 = vunpack.i.h.bf16 %v5873_v27  ;;  %v8007_v49 = vunpack.i.l.bf16 %v7097_v61  ;;  %v1497_v27 = vsel %vm190_vm1, %v5869_v33, %v5870_v35 }
 0x296   :  { %v5321_v37 = vpack.c.bf16 %v1497_v27, %v1430_v24  ;;  %v5759_v24 = vunpack.i.l.bf16 %v7005_v47  ;;  %v5890_v62 = vunpack.i.h.bf16 %v7097_v61 }
 0x297   :  { %v1581_v56 = vsel %vm548_vm6, %v5835_v5, %v5874_v55  ;;  %v1583_v9 = vsel %vm548_vm6, %v5875_v21, %v8007_v49 }
 0x298   :  { %v7101_v26 = vpop.permute.xlu0 %5882  ;;  %v7103_v8 = vpop.permute.xlu1 %1635  ;;  %v5315_v1 = vpack.c.bf16 %v1581_v56, %v6862_v42  ;;  %v5323_v33 = vpack.c.bf16 %v1583_v9, %v6911_v39  ;;  %v5739_v39 = vunpack.i.l.bf16 %v6988_v51 }
 0x299   :  { %v5884_v30 = vunpack.i.l.bf16 %v7101_v26 }
 0x29a   :  { %5316 = vmatprep.subr.bf16.mxu1 %v5315_v1  ;;  %v5765_v1 = vunpack.i.h.bf16 %v7003_v58 }
 0x29b   :  { %5318 = vmatpush1.bf16.msra.mxu1 %v5317_v34  ;;  %v1498_v14 = vsel %vm190_vm1, %v5870_v35, %v5884_v30  ;;  %v1582_v34 = vsel %vm548_vm6, %v5874_v55, %v5875_v21  ;;  %v5764_v35 = vunpack.i.l.bf16 %v7003_v58  ;;  %v8013_v55 = vunpack.i.h.bf16 %v6988_v51 }
 0x29c   :  { %v7114_v5 = vpop.permute.xlu0 %5902  ;;  %v7116_v42 = vpop.permute.xlu1 %1639  ;;  %1805 = vmatprep.subr.mxu1 %v1649_v44  ;;  %v5319_v56 = vpack.c.bf16 %v1498_v14, %v1431_v20  ;;  %v8039_v14 = vmov 0.0   ;;  %v5760_v21 = vunpack.i.h.bf16 %v7005_v47  ;;  %v5885_v20 = vunpack.i.h.bf16 %v7101_v26 }
 0x29d   :  { %v5325_v9 = vpack.c.bf16 %v1582_v34, %v6897_v15  ;;  %v5880_v47 = vunpack.i.h.bf16 %v7095_v18  ;;  %v7166_v58 = vsel %vm2147_vm13, %v5739_v39, %v5759_v24  ;;  %v1650_v39 = vsel %vm1645_vm10, %v7087_v43, %v7103_v8 }
 0x29e   :  { %v5774_v18 = vunpack.i.l.bf16 %v7011_v60  ;;  %v8018_v43 = vmov 0.0|0.0  }
 0x29f   :  { %1806 = vmatpush1.msra.mxu1 %v1648_v46 }
 0x2a0   :  { %v7129_v44 = vpop.permute.xlu0 %2621  ;;  %v5893_v0 = vpop.permute.xlu1 %5892  ;;  %5320 = vmatprep.subr.bf16.mxu1 %v5319_v56  ;;  %5045 = vmatmul.mubr.msk.f32.vlgmr.msra.gmra.mrb[10].mxu1 %vm1723_vm11, %v7073_v48  ;;  %v5754_v56 = vunpack.i.l.bf16 %v6994_v11 }
 0x2a1   :  { %8038 = vst [vmem:[#allocation20_spill] sm:$0xff] %v7129_v44  ;;  %5322 = vmatpush1.bf16.msra.mxu1 %v5321_v37  ;;  %1932 = vmatprep.mubr.f32.mxu1 %v8039_v14  ;;  %v5895_v27 = vunpack.i.h.bf16 %v5893_v0  ;;  %v5894_v46 = vunpack.i.l.bf16 %v5893_v0  ;;  %v7149_v37 = vsel %vm2215_vm12, %v5765_v1, %v8008_v2  ;;  %v1651_v0 = vsel %vm1645_vm10, %v7103_v8, %v7093_v19 }
 0x2a2   :  { %5324 = vmatprep.subr.bf16.mxu1 %v5323_v33  ;;  %v7155_v33 = vsel %vm2215_vm12, %v5744_v38, %v5764_v35  ;;  %v7163_v2 = vsel %vm2147_vm13, %v5760_v21, %v8013_v55  ;;  %v1499_v38 = vsel %vm190_vm1, %v5884_v30, %v5885_v20  ;;  %v1432_v55 = vsel %vm1425_vm7, %v8040_v31, %v5880_v47 }
 0x2a3   :  { %v1433_v12 = vsel %vm1425_vm7, %v5880_v47, %v5894_v46  ;;  %v5769_v31 = vunpack.i.l.bf16 %v7013_v57 }
 0x2a4   :  { %v5908_v49 = vpop.permute.xlu0 %5907  ;;  %v7152_v26 = vpop.permute.xlu1 %5897 }
 0x2a5   :  { %v5910_v15 = vunpack.i.h.bf16 %v5908_v49  ;;  %v5909_v34 = vunpack.i.l.bf16 %v5908_v49  ;;  %5326 = vmatpush1.bf16.msra.mxu1 %v5325_v9  ;;  %v1434_v49 = vsel %vm1425_vm7, %v5894_v46, %v5895_v27  ;;  %v5329_v27 = vpack.c.bf16 %v1499_v38, %v1432_v55 }
 0x2a6   :  { %1876 = vmatprep.subr.mxu1 %v1651_v0  ;;  %v7183_v46 = vsel %vm2147_vm13, %v5759_v24, %v5760_v21  ;;  %v5749_v21 = vunpack.i.l.bf16 %v6996_v52  ;;  %v5844_v24 = vunpack.i.l.bf16 %v7078_v23 }
 0x2a7   :  { %v1501_v9 = vsel %vm190_vm1, %v5909_v34, %v5910_v15  ;;  %v1500_v10 = vsel %vm190_vm1, %v5885_v20, %v5909_v34  ;;  %v8041_v20 = vunpack.i.l.bf16 %v7097_v61  ;;  %v5839_v34 = vunpack.i.l.bf16 %v7065_v16 }
 0x2a8   :  { %v5336_v32 = vpack.c.bf16 %v1501_v9, %v1434_v49  ;;  %v5913_v3 = vpop.permute.xlu0 %5912  ;;  %v7180_v30 = vpop.permute.xlu1 %2619  ;;  %v5327_v0 = vpack.c.bf16 %v1500_v10, %v1433_v12  ;;  %v2217_v12 = vsel %vm2215_vm12, %v5764_v35, %v5765_v1  ;;  %v5775_v10 = vunpack.i.h.bf16 %v7011_v60 }
 0x2a9   :  { %v5915_v44 = vunpack.i.h.bf16 %v5913_v3  ;;  %v5914_v15 = vunpack.i.l.bf16 %v5913_v3  ;;  %1877 = vmatpush1.msra.mxu1 %v1650_v39  ;;  %v1584_v8 = vsel %vm548_vm6, %v8041_v20, %v5890_v62  ;;  %v5770_v3 = vunpack.i.h.bf16 %v7013_v57 }
 0x2aa   :  { %5328 = vmatprep.subr.bf16.mxu0 %v5327_v0  ;;  %5335 = vmatprep.subr.bf16.mxu1 %v8018_v43  ;;  %v5750_v57 = vunpack.i.h.bf16 %v6996_v52  ;;  %v5341_v52 = vpack.c.bf16 %v2217_v12, %v7183_v46  ;;  %v8043_v49 = vunpack.i.h.bf16 %v6986_v41  ;;  %v2351_v0 = vsel %vm326_vm3, %v5774_v18, %v5775_v10 }
 0x2ab   :  { %v1586_v55 = vsel %vm548_vm6, %v5914_v15, %v5915_v44  ;;  %5046 = vmatmul.mubr.msk.f32.vlgmr.msra.gmra.mrb[12].mxu1 %vm1723_vm11, %v7073_v48  ;;  %5330 = vmatpush1.bf16.msra.mxu0 %v5329_v27  ;;  %v1585_v61 = vsel %vm548_vm6, %v5890_v62, %v5914_v15  ;;  %v5333_v62 = vpack.c.bf16 %v1584_v8, %v6907_v25  ;;  %v8042_v25 = vunpack.i.h.bf16 %v6994_v11 }
 0x2ac   :  { %v5339_v47 = vpack.c.bf16 %v1586_v55, %v6935_v17  ;;  %5337 = vmatpush3.bf16.msra.mxu1 %v5336_v32  ;;  %v1642_v1 = vpop.permute.xlu0 %1641  ;;  %v7201_v35 = vpop.permute.xlu1 %2617  ;;  %v5331_v60 = vpack.c.bf16 %v1585_v61, %v6916_v59  ;;  %5148 = vmatprep.mubr.msk.f32.mxu1 %vm6232_vm14, %v8039_v14  ;;  %v5343_v44 = vpack.c.bf16 %v7155_v33, %v7166_v58  ;;  %v5780_v27 = vunpack.i.h.bf16 %v7021_v13 }
 0x2ad   :  { %5338 = vmatprep.subr.bf16.mxu1 %v8018_v43  ;;  %v5359_v32 = vpack.c.bf16 %v7149_v37, %v7163_v2  ;;  %v7214_v17 = vsel %vm326_vm3, %v5754_v56, %v5774_v18  ;;  %v7217_v59 = vsel %vm684_vm8, %v5749_v21, %v5769_v31  ;;  %v7224_v38 = vsel %vm326_vm3, %v5775_v10, %v8042_v25 }
 0x2ae   :  { %5332 = vmatprep.subr.bf16.mxu0 %v5331_v60  ;;  %v7227_v58 = vsel %vm684_vm8, %v5770_v3, %v5750_v57  ;;  %v5854_v2 = vunpack.i.l.bf16 %v7083_v53  ;;  %v1653_v56 = vsel %vm1645_vm10, %v7116_v42, %v1642_v1  ;;  %v2219_v9 = vsel %vm2215_vm12, %v8043_v49, %v5844_v24 }
 0x2af   :  { %5334 = vmatpush1.bf16.msra.mxu0 %v5333_v62  ;;  %v2284_v39 = vsel %vm684_vm8, %v5769_v31, %v5770_v3  ;;  %v5779_v15 = vunpack.i.l.bf16 %v7021_v13  ;;  %v5849_v46 = vunpack.i.l.bf16 %v7069_v28  ;;  %v5347_v20 = vpack.c.bf16 %v7214_v17, %v7217_v59 }
 0x2b0   :  { %5340 = vmatpush3.bf16.msra.mxu1 %v5339_v47  ;;  %v7232_v37 = vpop.permute.xlu0 %5917  ;;  %v7234_v33 = vpop.permute.xlu1 %5922  ;;  %1947 = vmatprep.subr.mxu0 %v1653_v56  ;;  %v5785_v8 = vunpack.i.h.bf16 %v7019_v4  ;;  %v5784_v41 = vunpack.i.l.bf16 %v7019_v4  ;;  %v1652_v31 = vsel %vm1645_vm10, %v7093_v19, %v7116_v42  ;;  %v8044_v18 = vunpack.i.h.bf16 %v6988_v51 }
 0x2b1   :  { %5146 = vmatprep.subr.mxu1 %v8039_v14  ;;  %v5859_v12 = vunpack.i.l.bf16 %v7076_v7  ;;  %v1654_v10 = vsel %vm1645_vm10, %v1642_v1, %v6978_v22  ;;  %v8045_v4 = vmov %v8042_v25  ;;  %v5790_v19 = vunpack.i.h.bf16 %v7026_v36 }
 0x2b2   :  { %v2151_v13 = vsel %vm2147_vm13, %v8044_v18, %v5839_v34  ;;  %v2353_v55 = vsel %vm326_vm3, %v8045_v4, %v5854_v2  ;;  %v5789_v42 = vunpack.i.l.bf16 %v7026_v36  ;;  %v5795_v51 = vunpack.i.h.bf16 %v7028_v54 }
 0x2b3   :  { %1948 = vmatpush1.msra.mxu0 %v1652_v31  ;;  %v5357_v3 = vpack.c.bf16 %v2219_v9, %v2151_v13  ;;  %v5794_v61 = vunpack.i.l.bf16 %v7028_v54  ;;  %v5345_v11 = vpack.c.bf16 %v2351_v0, %v2284_v39  ;;  %v2286_v36 = vsel %vm684_vm8, %v5750_v57, %v5849_v46 }
 0x2b4   :  { %5147 = vmatpush3.msra.mxu1 %v1654_v10  ;;  %v7271_v21 = vpop.permute.xlu0 %5927  ;;  %v7273_v22 = vpop.permute.xlu1 %5932  ;;  %5047 = vmatmul.mubr.msk.f32.vlgmr.msra.gmra.mrb[10].mxu0 %vm1723_vm11, %v7073_v48  ;;  %v2436_v47 = vsel %vm412_vm4, %v5779_v15, %v5780_v27  ;;  %v2437_v54 = vsel %vm412_vm4, %v5780_v27, %v5785_v8  ;;  %v5361_v1 = vpack.c.bf16 %v2353_v55, %v2286_v36  ;;  %v5919_v17 = vunpack.i.l.bf16 %v7232_v37 }
 0x2b5   :  { %5342 = vmatprep.subr.bf16.mxu0 %v5341_v52  ;;  %5358 = vmatprep.subr.bf16.mxu1 %v5357_v3  ;;  %v5363_v60 = vpack.c.bf16 %v7224_v38, %v7227_v58  ;;  %v2435_v62 = vsel %vm412_vm4, %v5784_v41, %v5779_v15  ;;  %v5924_v59 = vunpack.i.l.bf16 %v7234_v33  ;;  %v2438_v57 = vsel %vm412_vm4, %v5785_v8, %v5859_v12 }
 0x2b6   :  { %5149 = vmatmul.mubr.msk.f32.vlgmr.msra.gmra.mrb[14].mxu1 %vm1723_vm11, %v7073_v48  ;;  %5344 = vmatpush1.bf16.msra.mxu0 %v5343_v44  ;;  %v5349_v44 = vpack.c.bf16 %v2436_v47, %v6807_v63  ;;  %v2503_v25 = vsel %vm752_vm9, %v5789_v42, %v5790_v19  ;;  %v2571_v38 = vsel %vm2569_vm15, %v5794_v61, %v5795_v51  ;;  %v5799_v58 = vunpack.i.l.bf16 %v7034_v45 }
 0x2b7   :  { %5360 = vmatpush1.bf16.msra.mxu1 %v5359_v32  ;;  %5346 = vmatprep.subr.bf16.mxu0 %v5345_v11  ;;  %v5800_v32 = vunpack.i.h.bf16 %v7034_v45  ;;  %v5805_v56 = vunpack.i.h.bf16 %v7036_v40  ;;  %v5804_v49 = vunpack.i.l.bf16 %v7036_v40  ;;  %v5365_v9 = vpack.c.bf16 %v2438_v57, %v6823_v50 }
 0x2b8   :  { %5362 = vmatprep.subr.bf16.mxu1 %v5361_v1  ;;  %v7292_v52 = vpop.permute.xlu0 %5937  ;;  %v7294_v48 = vpop.permute.xlu1 %2623  ;;  %2818 = vmatprep.mubr.f32.mxu0 %v8039_v14  ;;  %v5351_v40 = vpack.c.bf16 %v2435_v62, %v6805_v6  ;;  %v5367_v27 = vpack.c.bf16 %v2437_v54, %v6798_v29  ;;  %v5353_v50 = vpack.c.bf16 %v2571_v38, %v2503_v25  ;;  %v5899_v18 = vunpack.i.l.bf16 %v7152_v26 }
 0x2b9   :  { %2889 = vmatprep.mubr.f32.mxu1 %v8039_v14  ;;  %v2505_v63 = vsel %vm752_vm9, %v5800_v32, %v5919_v17  ;;  %v2573_v39 = vsel %vm2569_vm15, %v5805_v56, %v5924_v59  ;;  %v2502_v15 = vsel %vm752_vm9, %v5799_v58, %v5789_v42  ;;  %v2570_v8 = vsel %vm2569_vm15, %v5804_v49, %v5794_v61  ;;  %v8046_v61 = vld [vmem:[#allocation20_spill] sm:$0xff]  ;;  %v8047_v49 = vld [vmem:[#allocation19_spill] sm:$0xff] }
 0x2ba   :  { %5348 = vmatpush1.bf16.msra.mxu0 %v5347_v20  ;;  %v2504_v20 = vsel %vm752_vm9, %v5790_v19, %v5800_v32  ;;  %v2572_v41 = vsel %vm2569_vm15, %v5795_v51, %v5805_v56  ;;  %v5369_v31 = vpack.c.bf16 %v2573_v39, %v2505_v63  ;;  %v5845_v6 = vunpack.i.h.bf16 %v7078_v23 }
 0x2bb   :  { %5364 = vmatpush1.bf16.msra.mxu1 %v5363_v60  ;;  %5350 = vmatprep.subr.bf16.mxu0 %v5349_v44  ;;  %v5904_v29 = vunpack.i.l.bf16 %v7114_v5  ;;  %v5355_v3 = vpack.c.bf16 %v2570_v8, %v2502_v15  ;;  %v5371_v4 = vpack.c.bf16 %v2572_v41, %v2504_v20  ;;  %v5840_v55 = vunpack.i.h.bf16 %v7065_v16 }
 0x2bc   :  { %5366 = vmatprep.subr.bf16.mxu1 %v5365_v9  ;;  %v7312_v45 = vpop.permute.xlu0 %2211  ;;  %v7314_v0 = vpop.permute.xlu1 %5942  ;;  %v5929_v19 = vunpack.i.l.bf16 %v7271_v21  ;;  %v5934_v42 = vunpack.i.l.bf16 %v7273_v22  ;;  %v2639_v11 = vsel %vm2637_vm0, %v7180_v30, %v8046_v61  ;;  %v5850_v36 = vunpack.i.h.bf16 %v7069_v28 }
 0x2bd   :  { %v5855_v47 = vunpack.i.h.bf16 %v7083_v53  ;;  %v2153_v54 = vsel %vm2147_vm13, %v5840_v55, %v5899_v18  ;;  %v5860_v1 = vunpack.i.h.bf16 %v7076_v7  ;;  %v2220_v60 = vsel %vm2215_vm12, %v5844_v24, %v5845_v6 }
 0x2be   :  { %5352 = vmatpush1.bf16.msra.mxu0 %v5351_v40  ;;  %v2221_v44 = vsel %vm2215_vm12, %v5845_v6, %v5904_v29  ;;  %v2638_v25 = vsel %vm2637_vm0, %v7201_v35, %v7180_v30  ;;  %v5939_v38 = vunpack.i.l.bf16 %v7292_v52  ;;  %v2288_v23 = vsel %vm684_vm8, %v5850_v36, %v5929_v19 }
 0x2bf   :  { %5368 = vmatpush1.bf16.msra.mxu1 %v5367_v27  ;;  %5354 = vmatprep.subr.bf16.mxu0 %v5353_v50  ;;  %v2355_v24 = vsel %vm326_vm3, %v5855_v47, %v5934_v42  ;;  %v2152_v32 = vsel %vm2147_vm13, %v5839_v34, %v5840_v55  ;;  %v5900_v58 = vunpack.i.h.bf16 %v7152_v26  ;;  %v2640_v30 = vsel %vm2637_vm0, %v8046_v61, %v7294_v48 }
 0x2c0   :  { %5370 = vmatprep.subr.bf16.mxu1 %v5369_v31  ;;  %v7325_v13 = vpop.permute.xlu0 %2625  ;;  %v7327_v10 = vpop.permute.xlu1 %2279  ;;  %v5373_v35 = vpack.c.bf16 %v2221_v44, %v2153_v54  ;;  %v2354_v56 = vsel %vm326_vm3, %v5854_v2, %v5855_v47  ;;  %v5375_v9 = vpack.c.bf16 %v2220_v60, %v2152_v32  ;;  %v2287_v16 = vsel %vm684_vm8, %v5849_v46, %v5850_v36  ;;  %v8049_v54 = vld [vmem:[#allocation14_spill] sm:$0xff] }
 0x2c1   :  { %v2641_v51 = vsel %vm2637_vm0, %v7294_v48, %v7325_v13  ;;  %v5905_v26 = vunpack.i.h.bf16 %v7114_v5  ;;  %v5377_v2 = vpack.c.bf16 %v2355_v24, %v2288_v23  ;;  %v2439_v48 = vsel %vm412_vm4, %v5859_v12, %v5860_v1  ;;  %v8050_v24 = vld [vmem:[#allocation17_spill] sm:$0xff] }
 0x2c2   :  { %5356 = vmatpush1.bf16.msra.mxu0 %v5355_v3  ;;  %v5935_v63 = vunpack.i.h.bf16 %v7273_v22  ;;  %v2440_v5 = vsel %vm412_vm4, %v5860_v1, %v5939_v38  ;;  %v2154_v46 = vsel %vm2147_vm13, %v5899_v18, %v5900_v58  ;;  %v5925_v39 = vunpack.i.h.bf16 %v7234_v33  ;;  %v8048_v18 = vld [vmem:[#allocation15_spill] sm:$0xff] }
 0x2c3   :  { %5372 = vmatpush1.bf16.msra.mxu1 %v5371_v4  ;;  %2770 = vmatprep.subr.mxu0 %v2639_v11  ;;  %v5930_v40 = vunpack.i.h.bf16 %v7271_v21  ;;  %v5379_v7 = vpack.c.bf16 %v2354_v56, %v2287_v16  ;;  %v2223_v12 = vsel %vm2215_vm12, %v5905_v26, %v7312_v45  ;;  %v5944_v27 = vunpack.i.l.bf16 %v7314_v0 }
 0x2c4   :  { %2841 = vmatprep.subr.mxu1 %v2641_v51  ;;  %v7345_v62 = vpop.permute.xlu0 %2561  ;;  %v7347_v57 = vpop.permute.xlu1 %2629  ;;  %v2222_v20 = vsel %vm2215_vm12, %v5904_v29, %v5905_v26  ;;  %v5920_v8 = vunpack.i.h.bf16 %v7232_v37  ;;  %v5381_v6 = vpack.c.bf16 %v2440_v5, %v8048_v18  ;;  %v2356_v61 = vsel %vm326_vm3, %v5934_v42, %v5935_v63 }
 0x2c5   :  { %v5391_v4 = vpack.c.bf16 %v2222_v20, %v2154_v46  ;;  %v2290_v55 = vsel %vm684_vm8, %v5930_v40, %v7327_v10  ;;  %v2575_v51 = vsel %vm2569_vm15, %v5925_v39, %v7345_v62  ;;  %v2289_v29 = vsel %vm684_vm8, %v5929_v19, %v5930_v40 }
 0x2c6   :  { %2771 = vmatpush1.msra.mxu0 %v2638_v25  ;;  %v5940_v11 = vunpack.i.h.bf16 %v7292_v52  ;;  %v2507_v47 = vsel %vm752_vm9, %v5920_v8, %v5944_v27  ;;  %v5383_v1 = vpack.c.bf16 %v2439_v48, %v8049_v54  ;;  %v2506_v21 = vsel %vm752_vm9, %v5919_v17, %v5920_v8 }
 0x2c7   :  { %2842 = vmatpush1.msra.mxu1 %v2640_v30  ;;  %5049 = vmatmul.mubr.msk.f32.vlgmr.msra.gmra.mrb[12].mxu0 %vm2751_vm2, %v8047_v49  ;;  %v2574_v22 = vsel %vm2569_vm15, %v5924_v59, %v5925_v39  ;;  %v5385_v19 = vpack.c.bf16 %v2575_v51, %v2507_v47  ;;  %v5395_v44 = vpack.c.bf16 %v2356_v61, %v2289_v29  ;;  %v5945_v33 = vunpack.i.h.bf16 %v7314_v0  ;;  %v8051_v30 = vld [vmem:[#allocation16_spill] sm:$0xff] }
 0x2c8   :  { %5050 = vmatmul.mubr.msk.f32.vlgmr.msra.gmra.mrb[16].mxu1 %vm2751_vm2, %v8047_v49  ;;  %5374 = vmatprep.subr.bf16.mxu0 %v5373_v35  ;;  %v7378_v34 = vpop.permute.xlu0 %2346  ;;  %v7380_v53 = vpop.permute.xlu1 %5947  ;;  %v2441_v23 = vsel %vm412_vm4, %v5939_v38, %v5940_v11  ;;  %v5387_v17 = vpack.c.bf16 %v2574_v22, %v2506_v21 }
 0x2c9   :  { %5376 = vmatpush1.bf16.msra.mxu0 %v5375_v9  ;;  %v5949_v28 = vunpack.i.l.bf16 %v7380_v53  ;;  %2960 = vmatprep.mubr.f32.mxu0 %v8039_v14  ;;  %v2357_v50 = vsel %vm326_vm3, %v5935_v63, %v7378_v34  ;;  %v5950_v59 = vunpack.i.h.bf16 %v7380_v53  ;;  %v5399_v35 = vpack.c.bf16 %v2441_v23, %v8051_v30 }
 0x2ca   :  { %5378 = vmatprep.subr.bf16.mxu0 %v5377_v2  ;;  %3031 = vmatprep.mubr.f32.mxu1 %v8039_v14  ;;  %v5393_v36 = vpack.c.bf16 %v2357_v50, %v2290_v55  ;;  %v2508_v0 = vsel %vm752_vm9, %v5944_v27, %v5945_v33  ;;  %v8052_v27 = vld [vmem:[#allocation18_spill] sm:$0xff] }
 0x2cb   :  { %v2155_v15 = vsel %vm2147_vm13, %v5900_v58, %v5949_v28  ;;  %v2156_v63 = vsel %vm2147_vm13, %v5949_v28, %v5950_v59 }
 0x2cc   :  { %v2628_v41 = vpop.permute.xlu0 %2627  ;;  %v7405_v31 = vpop.permute.xlu1 %2631  ;;  %v5389_v3 = vpack.c.bf16 %v2223_v12, %v2155_v15 }
 0x2cd   :  { %5380 = vmatpush1.bf16.msra.mxu0 %v5379_v7  ;;  %v2643_v52 = vsel %vm2637_vm0, %v2628_v41, %v7347_v57  ;;  %v2642_v48 = vsel %vm2637_vm0, %v7325_v13, %v2628_v41 }
 0x2ce   :  { %5382 = vmatprep.subr.bf16.mxu0 %v5381_v6  ;;  %5390 = vmatprep.subr.bf16.mxu1 %v5389_v3 }
 0x2cf   :  { %5392 = vmatpush1.bf16.msra.mxu1 %v5391_v4 }
 0x2d0   :  { %v2214_v42 = vpop.permute.xlu0 %2213  ;;  %v2432_v60 = vpop.permute.xlu1 %2431  ;;  %5394 = vmatprep.subr.bf16.mxu1 %v5393_v36 }
 0x2d1   :  { %5384 = vmatpush1.bf16.msra.mxu0 %v5383_v1  ;;  %v2442_v25 = vsel %vm412_vm4, %v5940_v11, %v2432_v60  ;;  %v2224_v38 = vsel %vm2215_vm12, %v7312_v45, %v2214_v42 }
 0x2d2   :  { %v5397_v37 = vpack.c.bf16 %v2442_v25, %v8050_v24  ;;  %5386 = vmatprep.subr.bf16.mxu0 %v5385_v19  ;;  %v5406_v40 = vpack.c.bf16 %v2224_v38, %v2156_v63  ;;  %v3135_v25 = vld [vmem:[#allocation7] sm:$0xff]  ;;  %v3136_v24 = vld [vmem:[#allocation7 + $0x8] sm:$0xff] }
 0x2d3   :  { %5396 = vmatpush1.bf16.msra.mxu1 %v5395_v44 }
 0x2d4   :  { %v5953_v32 = vpop.permute.xlu0 %5952  ;;  %v2499_v58 = vpop.permute.xlu1 %2498  ;;  %5398 = vmatprep.subr.bf16.mxu1 %v5397_v37 }
 0x2d5   :  { %5388 = vmatpush1.bf16.msra.mxu0 %v5387_v17  ;;  %v5955_v56 = vunpack.i.h.bf16 %v5953_v32  ;;  %v5954_v9 = vunpack.i.l.bf16 %v5953_v32  ;;  %v2509_v2 = vsel %vm752_vm9, %v5945_v33, %v2499_v58 }
 0x2d6   :  { %2912 = vmatprep.subr.mxu0 %v2643_v52 }
 0x2d7   :  { %v2576_v16 = vsel %vm2569_vm15, %v7345_v62, %v5954_v9  ;;  %v2577_v26 = vsel %vm2569_vm15, %v5954_v9, %v5955_v56  ;;  %5400 = vmatpush1.bf16.msra.mxu1 %v5399_v35  ;;  %v3137_v35 = vld [vmem:[#allocation7 + $0x10] sm:$0xff] }
 0x2d8   :  { %v5403_v5 = vpack.c.bf16 %v2576_v16, %v2508_v0  ;;  %v5401_v45 = vpack.c.bf16 %v2577_v26, %v2509_v2  ;;  %v2349_v46 = vpop.permute.xlu0 %2348  ;;  %v2282_v39 = vpop.permute.xlu1 %2281 }
 0x2d9   :  { %2913 = vmatpush1.msra.mxu0 %v2642_v48  ;;  %v2358_v62 = vsel %vm326_vm3, %v7378_v34, %v2349_v46  ;;  %v2291_v7 = vsel %vm684_vm8, %v7327_v10, %v2282_v39  ;;  %v2644_v10 = vsel %vm2637_vm0, %v7347_v57, %v7405_v31  ;;  %v3138_v48 = vld [vmem:[#allocation7 + $0x18] sm:$0xff] }
 0x2da   :  { %5051 = vmatmul.mubr.msk.f32.vlgmr.msra.gmra.mrb[14].mxu0 %vm2751_vm2, %v8047_v49  ;;  %5405 = vmatprep.subr.bf16.mxu0 %v8018_v43  ;;  %v5409_v13 = vpack.c.bf16 %v2358_v62, %v2291_v7 }
 0x2db   :  { %5407 = vmatpush3.bf16.msra.mxu0 %v5406_v40  ;;  %5402 = vmatprep.subr.bf16.mxu1 %v5401_v45 }
 0x2dc   :  { %5404 = vmatpush1.bf16.msra.mxu1 %v5403_v5  ;;  %v2634_v53 = vpop.permute.xlu0 %2633  ;;  %v2434_v28 = vpop.permute.xlu1 %2433  ;;  %5408 = vmatprep.subr.bf16.mxu0 %v8018_v43  ;;  %v3139_v5 = vld [vmem:[#allocation7 + $0x20] sm:$0xff] }
 0x2dd   :  { %v2443_v12 = vsel %vm412_vm4, %v2432_v60, %v2434_v28  ;;  %v2645_v34 = vsel %vm2637_vm0, %v7405_v31, %v2634_v53  ;;  %5169 = vmatprep.mubr.msk.f32.mxu0 %vm6232_vm14, %v8039_v14 }
 0x2de   :  { %2983 = vmatprep.subr.mxu1 %v2645_v34  ;;  %v5412_v50 = vpack.c.bf16 %v2443_v12, %v8052_v27  ;;  %v3140_v12 = vld [vmem:[#allocation7 + $0x28] sm:$0xff] }
 0x2df   :  { %5410 = vmatpush3.bf16.msra.mxu0 %v5409_v13 }
 0x2e0   :  { %2984 = vmatpush1.msra.mxu1 %v2644_v10  ;;  %v2501_v15 = vpop.permute.xlu0 %2500  ;;  %v2568_v20 = vpop.permute.xlu1 %2567  ;;  %5411 = vmatprep.subr.bf16.mxu0 %v8018_v43 }
 0x2e1   :  { %v2510_v8 = vsel %vm752_vm9, %v2499_v58, %v2501_v15  ;;  %v2578_v41 = vsel %vm2569_vm15, %v5955_v56, %v2568_v20  ;;  %5052 = vmatmul.mubr.msk.f32.vlgmr.msra.gmra.mrb[18].mxu1 %vm2751_vm2, %v8047_v49 }
 0x2e2   :  { %3871 = vmatprep.mubr.f32.mxu1 %v8039_v14  ;;  %v5415_v18 = vpack.c.bf16 %v2578_v41, %v2510_v8 }
 0x2e3   :  { %5413 = vmatpush3.bf16.msra.mxu0 %v5412_v50 }
 0x2e4   :  { %5414 = vmatprep.subr.bf16.mxu0 %v8018_v43  ;;  %v2636_v57 = vpop.permute.xlu0 %2635 }
 0x2e5   :  { %v2646_v31 = vsel %vm2637_vm0, %v2634_v53, %v2636_v57  ;;  %vm3202_vm0 = vcmask 785408  }
 0x2e7   :  { %5416 = vmatpush3.bf16.msra.mxu0 %v5415_v18  ;;  %v3141_v18 = vld [vmem:[#allocation7 + $0x30] sm:$0xff] }
 0x2e8   :  { %5167 = vmatprep.subr.mxu0 %v8039_v14 }
 0x2eb   :  { %5168 = vmatpush3.msra.mxu0 %v2646_v31 }
 0x2ec   :  { %5170 = vmatmul.mubr.msk.f32.vlgmr.msra.gmra.mrb[16].mxu0 %vm2751_vm2, %v8047_v49 }
 0x2ed   :  { %3942 = vmatprep.mubr.f32.mxu0 %v8039_v14 }
 0x2f1   :  { %v7496_v47 = vpop.permute.xlu1 %2748 }
 0x357   :  { %v7478_v6 = vpop.f32.mrb[8].mxu1 }
 0x358   :  { %v7480_v3 = vpop.f32.mrb[9].mxu1 }
 0x373   :  { %v7482_v4 = vpop.f32.mrb[10].mxu1 }
 0x374   :  { %v7484_v55 = vpop.f32.mrb[11].mxu1 }
 0x37e   :  { %v7486_v51 = vpop.f32.mrb[12].mxu1 }
 0x37f   :  { %v7488_v29 = vpop.f32.mrb[13].mxu1 }
 0x387   :  { %v7490_v61 = vpop.f32.mrb[10].mxu0 }
 0x388   :  { %v7492_v11 = vpop.f32.mrb[11].mxu0 }
 0x389   :  { %v7494_v36 = vpop.f32.mrb[14].mxu1 }
 0x38a   :  { %8053 = vst [vmem:[#allocation20_spill] sm:$0xff] %v7494_v36  ;;  %v5150_v49 = vpop.f32.mrb[15].mxu1 }
 0x39a   :  { %v2820_v54 = vpop.f32.mrb[12].mxu0 }
 0x39b   :  { %v2821_v1 = vadd.f32 %v2820_v54, %v7496_v47  ;;  %v2891_v21 = vpop.f32.mrb[16].mxu1  ;;  %v2822_v22 = vpop.f32.mrb[13].mxu0 }
 0x39c   :  { %v2892_v19 = vadd.f32 %v2891_v21, %v7496_v47  ;;  %v2823_v42 = vadd.f32 %v2822_v22, %v7496_v47  ;;  %v2893_v60 = vpop.f32.mrb[17].mxu1  ;;  %v3142_v21 = vld [vmem:[#allocation7 + $0x38] sm:$0xff] }
 0x39d   :  { %vm3108_vm3 = vcmp.ge.f32.partialorder %v2821_v1, 0.0  ;;  %v3117_v44 = vmul.f32 0.3, %v2821_v1  ;;  %v2894_v9 = vadd.f32 %v2893_v60, %v7496_v47 }
 0x39e   :  { %vm3109_vm4 = vcmp.ge.f32.partialorder %v2823_v42, 0.0  ;;  %v3118_v23 = vmul.f32 0.3, %v2823_v42  ;;  %v3119_v33 = vmul.f32 0.3, %v2892_v19  ;;  %vm3110_vm8 = vcmp.ge.f32.partialorder %v2892_v19, 0.0 }
 0x39f   :  { %v3126_v37 = vsel %vm3108_vm3, %v2821_v1, %v3117_v44  ;;  %v3120_v52 = vmul.f32 0.3, %v2894_v9  ;;  %vm3111_vm9 = vcmp.ge.f32.partialorder %v2894_v9, 0.0  ;;  %vm3623_vm3 = vcmask 457728  }
 0x3a0   :  { %v7501_v17 = vmul.f32 %v3135_v25, %v3126_v37  ;;  %v3127_v59 = vsel %vm3109_vm4, %v2823_v42, %v3118_v23  ;;  %v3128_v30 = vsel %vm3110_vm8, %v2892_v19, %v3119_v33  ;;  %v3143_v25 = vld [vmem:[#allocation7 + $0x40] sm:$0xff]  ;;  %v7612_v33 = vld [vmem:[#allocation9 + $0x18] sm:$0xff]  ;;  %vm3691_vm4 = vcmask 261120  }
 0x3a1   :  { %v7503_v32 = vmul.f32 %v3136_v24, %v3127_v59  ;;  %v7511_v56 = vmul.f32 %v3137_v35, %v3128_v30  ;;  %v3129_v2 = vsel %vm3111_vm9, %v2894_v9, %v3120_v52  ;;  %v6111_v59 = vld [vmem:[#allocation9 + $0x20] sm:$0xff] }
 0x3a2   :  { %3671 = vrot.lane.b32.xlu0 %v7501_v17, %s6233_s11  ;;  %v7526_v39 = vmul.f32 %v3138_v48, %v3129_v2 }
 0x3a3   :  { %v5961_v58 = vpack.i.bf16 %v7503_v32, %v7501_v17  ;;  %v5986_v38 = vpack.i.bf16 %v7511_v56, %v7503_v32 }
 0x3a5   :  { %5962 = vrot.lane.b32.xlu1 %v5961_v58, %s6208_s23 }
 0x3a6   :  { %5957 = vrot.lane.b32.xlu0 %v5961_v58, %s6234_s12 }
 0x3a9   :  { %5972 = vrot.lane.b32.xlu1 %v5961_v58, %s6215_s24 }
 0x3aa   :  { %5967 = vrot.lane.b32.xlu0 %v5961_v58, %s6229_s1  ;;  %v7615_v58 = vld [vmem:[#allocation9 + $0x28] sm:$0x3] }
 0x3ad   :  { %v2962_v0 = vpop.f32.mrb[14].mxu0  ;;  %5987 = vrot.lane.b32.xlu1 %v5986_v38, %s6235_s13 }
 0x3ae   :  { %v2963_v16 = vadd.f32 %v2962_v0, %v7496_v47  ;;  %v2964_v26 = vpop.f32.mrb[15].mxu0  ;;  %3673 = vrot.lane.b32.xlu0 %v7503_v32, %s6233_s11 }
 0x3af   :  { %v2965_v45 = vadd.f32 %v2964_v26, %v7496_v47 }
 0x3b0   :  { %vm3112_vm5 = vcmp.ge.f32.partialorder %v2963_v16, 0.0  ;;  %v3121_v63 = vmul.f32 0.3, %v2963_v16 }
 0x3b1   :  { %3675 = vrot.lane.b32.xlu1 %v7511_v56, %s6233_s11  ;;  %v3122_v62 = vmul.f32 0.3, %v2965_v45  ;;  %vm3113_vm11 = vcmp.ge.f32.partialorder %v2965_v45, 0.0 }
 0x3b2   :  { %v3130_v46 = vsel %vm3112_vm5, %v2963_v16, %v3121_v63  ;;  %5977 = vrot.lane.b32.xlu0 %v5986_v38, %s6219_s28 }
 0x3b3   :  { %v7528_v40 = vmul.f32 %v3139_v5, %v3130_v46  ;;  %v3131_v28 = vsel %vm3113_vm11, %v2965_v45, %v3122_v62 }
 0x3b4   :  { %v3033_v7 = vpop.f32.mrb[18].mxu1  ;;  %v7538_v34 = vmul.f32 %v3140_v12, %v3131_v28 }
 0x3b5   :  { %v3035_v13 = vpop.f32.mrb[19].mxu1  ;;  %3542 = vrot.lane.b32.xlu1 %v7526_v39, %s6225_s6  ;;  %v5996_v53 = vpack.i.bf16 %v7528_v40, %v8039_v14  ;;  %v3034_v15 = vadd.f32 %v3033_v7, %v7496_v47 }
 0x3b6   :  { %5982 = vrot.lane.b32.xlu0 %v5986_v38, %s6225_s6  ;;  %v6011_v27 = vpack.i.bf16 %v7538_v34, %v7501_v17  ;;  %v6031_v20 = vpack.i.bf16 %v7526_v39, %v7538_v34  ;;  %v3036_v57 = vadd.f32 %v3035_v13, %v7496_v47 }
 0x3b7   :  { %v3123_v8 = vmul.f32 0.3, %v3034_v15  ;;  %vm3114_vm12 = vcmp.ge.f32.partialorder %v3034_v15, 0.0 }
 0x3b8   :  { %v3124_v49 = vmul.f32 0.3, %v3036_v57  ;;  %vm3115_vm13 = vcmp.ge.f32.partialorder %v3036_v57, 0.0 }
 0x3b9   :  { %5997 = vrot.lane.b32.xlu1 %v5996_v53, %s6208_s23  ;;  %v3132_v41 = vsel %vm3114_vm12, %v3034_v15, %v3123_v8 }
 0x3ba   :  { %3390 = vrot.lane.b32.xlu0 %v7511_v56, %s6215_s24  ;;  %v7558_v31 = vmul.f32 %v3141_v18, %v3132_v41  ;;  %v3133_v1 = vsel %vm3115_vm13, %v3036_v57, %v3124_v49 }
 0x3bb   :  { %v7567_v22 = vmul.f32 %v3142_v21, %v3133_v1 }
 0x3bc   :  { %v6046_v54 = vpack.i.bf16 %v7528_v40, %v7558_v31 }
 0x3bd   :  { %6007 = vrot.lane.b32.xlu1 %v5996_v53, %s6215_s24  ;;  %v6061_v42 = vpack.i.bf16 %v7567_v22, %v7511_v56 }
 0x3be   :  { %3475 = vrot.lane.b32.xlu0 %v7526_v39, %s6219_s28 }
 0x3bf   :  { %v3104_v10 = vpop.f32.mrb[16].mxu0 }
 0x3c0   :  { %v5171_v50 = vpop.f32.mrb[17].mxu0  ;;  %v3105_v19 = vadd.f32 %v3104_v10, %v7496_v47 }
 0x3c1   :  { %6012 = vrot.lane.b32.xlu1 %v6011_v27, %s6219_s28 }
 0x3c2   :  { %3609 = vrot.lane.b32.xlu0 %v7526_v39, %s6235_s13  ;;  %v3125_v60 = vmul.f32 0.3, %v3105_v19  ;;  %vm3116_vm15 = vcmp.ge.f32.partialorder %v3105_v19, 0.0 }
 0x3c4   :  { %v3134_v44 = vsel %vm3116_vm15, %v3105_v19, %v3125_v60 }
 0x3c5   :  { %6022 = vrot.lane.b32.xlu1 %v6011_v27, %s6235_s13  ;;  %v7579_v47 = vmul.f32 %v3143_v25, %v3134_v44 }
 0x3c6   :  { %5992 = vrot.lane.b32.xlu0 %v5996_v53, %s6234_s12 }
 0x3c7   :  { %v6081_v23 = vpack.i.bf16 %v7558_v31, %v7579_v47  ;;  %v6091_v24 = vpack.i.bf16 %v7579_v47, %v7567_v22  ;;  %v6096_v37 = vpack.i.bf16 %v8039_v14, %v7579_v47 }
 0x3c9   :  { %6032 = vrot.lane.b32.xlu1 %v6031_v20, %s6208_s23 }
 0x3ca   :  { %6002 = vrot.lane.b32.xlu0 %v5996_v53, %s6229_s1 }
 0x3cd   :  { %6037 = vrot.lane.b32.xlu1 %v6031_v20, %s6229_s1 }
 0x3ce   :  { %6017 = vrot.lane.b32.xlu0 %v6011_v27, %s6225_s6 }
 0x3d1   :  { %3681 = vrot.lane.b32.xlu1 %v7538_v34, %s6233_s11 }
 0x3d2   :  { %6027 = vrot.lane.b32.xlu0 %v6031_v20, %s6234_s12 }
 0x3d5   :  { %6047 = vrot.lane.b32.xlu1 %v6046_v54, %s6219_s28 }
 0x3d6   :  { %6042 = vrot.lane.b32.xlu0 %v6031_v20, %s6215_s24 }
 0x3d9   :  { %6052 = vrot.lane.b32.xlu1 %v6046_v54, %s6225_s6 }
 0x3da   :  { %6057 = vrot.lane.b32.xlu0 %v6046_v54, %s6235_s13 }
 0x3dd   :  { %6062 = vrot.lane.b32.xlu1 %v6061_v42, %s6234_s12 }
 0x3de   :  { %6067 = vrot.lane.b32.xlu0 %v6061_v42, %s6208_s23 }
 0x3e1   :  { %6072 = vrot.lane.b32.xlu1 %v6061_v42, %s6229_s1 }
 0x3e2   :  { %3683 = vrot.lane.b32.xlu0 %v7558_v31, %s6233_s11 }
 0x3e5   :  { %3679 = vrot.lane.b32.xlu1 %v7528_v40, %s6233_s11 }
 0x3e6   :  { %3677 = vrot.lane.b32.xlu0 %v7526_v39, %s6233_s11 }
 0x3e9   :  { %3398 = vrot.lane.b32.xlu1 %v7558_v31, %s6215_s24 }
 0x3ea   :  { %6082 = vrot.lane.b32.xlu0 %v6081_v23, %s6208_s23  ;;  %s6236_s23 = smov 120  }
 0x3ed   :  { %6077 = vrot.lane.b32.xlu1 %v6081_v23, %s6234_s12 }
 0x3ee   :  { %3550 = vrot.lane.b32.xlu0 %v7567_v22, %s6225_s6 }
 0x3f1   :  { %6087 = vrot.lane.b32.xlu1 %v6081_v23, %s6229_s1 }
 0x3f2   :  { %6092 = vrot.lane.b32.xlu0 %v6091_v24, %s6215_s24 }
 0x3f5   :  { %3483 = vrot.lane.b32.xlu1 %v7567_v22, %s6219_s28 }
 0x3f6   :  { %6097 = vrot.lane.b32.xlu0 %v6096_v37, %s6219_s28 }
 0x3f9   :  { %6107 = vrot.lane.b32.xlu1 %v6096_v37, %s6235_s13 }
 0x3fa   :  { %6102 = vrot.lane.b32.xlu0 %v6096_v37, %s6225_s6 }
 0x3fd   :  { %3617 = vrot.lane.b32.xlu1 %v7567_v22, %s6235_s13 }
 0x3fe   :  { %3687 = vrot.lane.b32.xlu0 %v7579_v47, %s6233_s11 }
 0x401   :  { %3689 = vrot.lane.b32.xlu1 %v8039_v14, %s6233_s11 }
 0x402   :  { %3685 = vrot.lane.b32.xlu0 %v7567_v22, %s6233_s11 }
 0x405   :  { %3802 = vperm.xlu1 %5735, %v7612_v33  }
 0x406   :  { %1720 = vperm.xlu0 %5734, %v6111_v59  }
 0x409   :  { %4546 = vrot.lane.b32.xlu1 %v7615_v58, %s6236_s23 }
 0x40a   :  { %4905 = vperm.xlu0 %5734, %v7615_v58  }
 0x414   :  { %v7619_v30 = vpop.permute.xlu0 %3671 }
 0x417   :  { %v7621_v35 = vpop.permute.xlu1 %5962 }
 0x418   :  { %v8026_v9 = vunpack.i.h.bf16 %v7621_v35  ;;  %v5964_v52 = vunpack.i.l.bf16 %v7621_v35  ;;  %v7625_v38 = vpop.permute.xlu0 %5957 }
 0x419   :  { %v8028_v0 = vunpack.i.h.bf16 %v7625_v38  ;;  %v5959_v16 = vunpack.i.l.bf16 %v7625_v38 }
 0x41a   :  { %v3271_v26 = vsel %vm2751_vm2, %v5964_v52, %v8026_v9 }
 0x41b   :  { %v7632_v2 = vpop.permute.xlu1 %5972  ;;  %v3204_v48 = vsel %vm3202_vm0, %v5959_v16, %v8028_v0 }
 0x41c   :  { %v7637_v63 = vpop.permute.xlu0 %5967  ;;  %v5417_v5 = vpack.c.bf16 %v3271_v26, %v3204_v48  ;;  %v8020_v20 = vunpack.i.h.bf16 %v7632_v2  ;;  %v5974_v8 = vunpack.i.l.bf16 %v7632_v2 }
 0x41d   :  { %v8021_v41 = vunpack.i.h.bf16 %v7637_v63  ;;  %v5969_v18 = vunpack.i.l.bf16 %v7637_v63 }
 0x41e   :  { %5418 = vmatprep.subr.bf16.mxu1 %v5417_v5  ;;  %v3405_v60 = vsel %vm190_vm1, %v5974_v8, %v8020_v20 }
 0x41f   :  { %v7639_v45 = vpop.permute.xlu1 %5987  ;;  %v3338_v42 = vsel %vm1425_vm7, %v5969_v18, %v8021_v41 }
 0x420   :  { %v7641_v46 = vpop.permute.xlu0 %3673  ;;  %v5421_v5 = vpack.c.bf16 %v3405_v60, %v3338_v42  ;;  %v5989_v42 = vunpack.i.l.bf16 %v7639_v45 }
 0x423   :  { %v7643_v62 = vpop.permute.xlu1 %3675 }
 0x424   :  { %v7645_v7 = vpop.permute.xlu0 %5977 }
 0x425   :  { %v8022_v21 = vunpack.i.h.bf16 %v7645_v7  ;;  %v5979_v19 = vunpack.i.l.bf16 %v7645_v7 }
 0x427   :  { %v7647_v13 = vpop.permute.xlu1 %3542 }
 0x428   :  { %v7649_v53 = vpop.permute.xlu0 %5982 }
 0x429   :  { %v8023_v43 = vunpack.i.h.bf16 %v7649_v53  ;;  %v5984_v20 = vunpack.i.l.bf16 %v7649_v53 }
 0x42b   :  { %v7651_v28 = vpop.permute.xlu1 %5997 }
 0x42c   :  { %v7653_v12 = vpop.permute.xlu0 %3390  ;;  %v5999_v57 = vunpack.i.l.bf16 %v7651_v28 }
 0x42e   :  { %v3270_v44 = vsel %vm2751_vm2, %v5999_v57, %v5964_v52  ;;  %v3490_v52 = vsel %vm548_vm6, %v5979_v19, %v8022_v21 }
 0x42f   :  { %v7655_v10 = vpop.permute.xlu1 %6007  ;;  %v5425_v21 = vpack.c.bf16 %v3490_v52, %v7503_v32 }
 0x430   :  { %v7657_v27 = vpop.permute.xlu0 %3475  ;;  %v6009_v25 = vunpack.i.l.bf16 %v7655_v10 }
 0x433   :  { %v7659_v50 = vpop.permute.xlu1 %6012 }
 0x434   :  { %v7661_v15 = vpop.permute.xlu0 %3609  ;;  %v6014_v26 = vunpack.i.l.bf16 %v7659_v50 }
 0x437   :  { %v7668_v49 = vpop.permute.xlu1 %6022 }
 0x438   :  { %v7670_v54 = vpop.permute.xlu0 %5992 }
 0x439   :  { %v5994_v1 = vunpack.i.l.bf16 %v7670_v54 }
 0x43b   :  { %v3203_v23 = vsel %vm3202_vm0, %v5994_v1, %v5959_v16  ;;  %v7684_v24 = vpop.permute.xlu1 %6032  ;;  %v3404_v16 = vsel %vm190_vm1, %v6009_v25, %v5974_v8  ;;  %v3557_v8 = vsel %vm1645_vm10, %v5984_v20, %v8023_v43 }
 0x43c   :  { %v5419_v37 = vpack.c.bf16 %v3270_v44, %v3203_v23  ;;  %v7686_v59 = vpop.permute.xlu0 %6002  ;;  %v8024_v44 = vunpack.i.h.bf16 %v7639_v45 }
 0x43d   :  { %v6004_v48 = vunpack.i.l.bf16 %v7686_v59 }
 0x43e   :  { %5420 = vmatpush1.bf16.msra.mxu1 %v5419_v37  ;;  %v3489_v37 = vsel %vm548_vm6, %v6014_v26, %v5979_v19  ;;  %v3625_v19 = vsel %vm3623_vm3, %v5989_v42, %v8024_v44  ;;  %v6005_v44 = vunpack.i.h.bf16 %v7686_v59 }
 0x43f   :  { %v3337_v57 = vsel %vm1425_vm7, %v6004_v48, %v5969_v18  ;;  %v7697_v1 = vpop.permute.xlu1 %6037  ;;  %5422 = vmatprep.subr.bf16.mxu1 %v5421_v5  ;;  %v6024_v18 = vunpack.i.l.bf16 %v7668_v49  ;;  %v5427_v48 = vpack.c.bf16 %v3489_v37, %v7501_v17  ;;  %v5429_v26 = vpack.c.bf16 %v3625_v19, %v3557_v8 }
 0x440   :  { %v5423_v60 = vpack.c.bf16 %v3404_v16, %v3337_v57  ;;  %v7701_v23 = vpop.permute.xlu0 %6017  ;;  %v5995_v17 = vunpack.i.h.bf16 %v7670_v54 }
 0x441   :  { %v6019_v41 = vunpack.i.l.bf16 %v7701_v23  ;;  %v3624_v16 = vsel %vm3623_vm3, %v6024_v18, %v5989_v42  ;;  %v3693_v42 = vsel %vm3691_vm4, %v7641_v46, %v7643_v62  ;;  %v6010_v18 = vunpack.i.h.bf16 %v7655_v10 }
 0x442   :  { %5424 = vmatpush1.bf16.msra.mxu1 %v5423_v60  ;;  %v6015_v10 = vunpack.i.h.bf16 %v7659_v50 }
 0x443   :  { %v7710_v25 = vpop.permute.xlu1 %3681  ;;  %5426 = vmatprep.subr.bf16.mxu1 %v5425_v21  ;;  %v3556_v32 = vsel %vm1645_vm10, %v6019_v41, %v5984_v20  ;;  %v8027_v21 = vunpack.i.l.bf16 %v7684_v24  ;;  %v6000_v20 = vunpack.i.h.bf16 %v7651_v28  ;;  %v6035_v41 = vunpack.i.h.bf16 %v7684_v24 }
 0x444   :  { %v7713_v5 = vpop.permute.xlu0 %6027  ;;  %v5431_v37 = vpack.c.bf16 %v3624_v16, %v3556_v32  ;;  %v3692_v28 = vsel %vm3691_vm4, %v7619_v30, %v7641_v46 }
 0x445   :  { %v8025_v52 = vunpack.i.l.bf16 %v7713_v5  ;;  %v6030_v57 = vunpack.i.h.bf16 %v7713_v5  ;;  %v3274_v46 = vsel %vm2751_vm2, %v6035_v41, %v6000_v20 }
 0x446   :  { %5428 = vmatpush1.bf16.msra.mxu1 %v5427_v48  ;;  %v8031_v48 = vunpack.i.l.bf16 %v7697_v1 }
 0x447   :  { %v7722_v60 = vpop.permute.xlu1 %6047  ;;  %5430 = vmatprep.subr.bf16.mxu1 %v5429_v26  ;;  %v3208_v19 = vsel %vm3202_vm0, %v5995_v17, %v8025_v52  ;;  %v3207_v32 = vsel %vm3202_vm0, %v6030_v57, %v5995_v17  ;;  %v3275_v52 = vsel %vm2751_vm2, %v6000_v20, %v8027_v21  ;;  %v6040_v17 = vunpack.i.h.bf16 %v7697_v1 }
 0x448   :  { %v7726_v43 = vpop.permute.xlu0 %6042  ;;  %v8030_v54 = vunpack.i.l.bf16 %v7722_v60  ;;  %v5449_v9 = vpack.c.bf16 %v3275_v52, %v3208_v19  ;;  %v5451_v50 = vpack.c.bf16 %v3274_v46, %v3207_v32  ;;  %v3342_v59 = vsel %vm1425_vm7, %v6005_v44, %v8031_v48 }
 0x449   :  { %v8029_v8 = vunpack.i.l.bf16 %v7726_v43  ;;  %v6045_v26 = vunpack.i.h.bf16 %v7726_v43  ;;  %v6025_v19 = vunpack.i.h.bf16 %v7668_v49 }
 0x44a   :  { %5432 = vmatpush1.bf16.msra.mxu1 %v5431_v37  ;;  %v3494_v21 = vsel %vm548_vm6, %v6015_v10, %v8030_v54 }
 0x44b   :  { %v7745_v16 = vpop.permute.xlu1 %6052  ;;  %3823 = vmatprep.subr.mxu1 %v3693_v42  ;;  %v3409_v30 = vsel %vm190_vm1, %v6010_v18, %v8029_v8  ;;  %v6050_v42 = vunpack.i.h.bf16 %v7722_v60  ;;  %v3408_v0 = vsel %vm190_vm1, %v6045_v26, %v6010_v18  ;;  %v3341_v18 = vsel %vm1425_vm7, %v6040_v17, %v6005_v44 }
 0x44c   :  { %v7749_v37 = vpop.permute.xlu0 %6057  ;;  %v5453_v52 = vpack.c.bf16 %v3409_v30, %v3342_v59  ;;  %v5457_v49 = vpack.c.bf16 %v3494_v21, %v7538_v34  ;;  %v5455_v30 = vpack.c.bf16 %v3408_v0, %v3341_v18  ;;  %v8054_v59 = vunpack.i.h.bf16 %v7625_v38 }
 0x44d   :  { %v3493_v48 = vsel %vm548_vm6, %v6050_v42, %v6015_v10  ;;  %v6060_v8 = vunpack.i.h.bf16 %v7749_v37  ;;  %v8055_v44 = vunpack.i.h.bf16 %v7621_v35  ;;  %v8056_v34 = vunpack.i.l.bf16 %v7745_v16 }
 0x44e   :  { %3824 = vmatpush1.msra.mxu1 %v3692_v28  ;;  %v6020_v28 = vunpack.i.h.bf16 %v7701_v23  ;;  %v6055_v23 = vunpack.i.h.bf16 %v7745_v16 }
 0x44f   :  { %v7768_v20 = vpop.permute.xlu1 %6062  ;;  %5054 = vmatmul.mubr.msk.f32.vlgmr.msra.gmra.mrb[20].mxu1 %vm2751_vm2, %v7612_v33  ;;  %5450 = vmatprep.subr.bf16.mxu1 %v5449_v9 }
 0x450   :  { %v6064_v46 = vunpack.i.l.bf16 %v7768_v20  ;;  %v7776_v54 = vpop.permute.xlu0 %6067  ;;  %5452 = vmatpush1.bf16.msra.mxu1 %v5451_v50  ;;  %4013 = vmatprep.mubr.f32.mxu1 %v8039_v14  ;;  %v3561_v0 = vsel %vm1645_vm10, %v6020_v28, %v8056_v34 }
 0x451   :  { %v6069_v9 = vunpack.i.l.bf16 %v7776_v54  ;;  %5454 = vmatprep.subr.bf16.mxu1 %v5453_v52 }
 0x452   :  { %v3205_v32 = vsel %vm3202_vm0, %v8054_v59, %v6064_v46  ;;  %v3206_v50 = vsel %vm3202_vm0, %v6064_v46, %v6030_v57  ;;  %v8057_v46 = vunpack.i.l.bf16 %v7749_v37  ;;  %v3492_v59 = vsel %vm548_vm6, %v7657_v27, %v6050_v42 }
 0x453   :  { %v3272_v10 = vsel %vm2751_vm2, %v8055_v44, %v6069_v9  ;;  %v7792_v36 = vpop.permute.xlu1 %6072  ;;  %v3273_v52 = vsel %vm2751_vm2, %v6069_v9, %v6035_v41  ;;  %v5459_v41 = vpack.c.bf16 %v3493_v48, %v7528_v40  ;;  %v8058_v9 = vunpack.i.h.bf16 %v7637_v63 }
 0x454   :  { %v5435_v21 = vpack.c.bf16 %v3272_v10, %v3205_v32  ;;  %v6074_v38 = vunpack.i.l.bf16 %v7792_v36  ;;  %v7799_v18 = vpop.permute.xlu0 %3683  ;;  %5456 = vmatpush1.bf16.msra.mxu1 %v5455_v30  ;;  %v5433_v57 = vpack.c.bf16 %v3273_v52, %v3206_v50  ;;  %v3629_v35 = vsel %vm3623_vm3, %v6025_v19, %v8057_v46 }
 0x455   :  { %5458 = vmatprep.subr.bf16.mxu1 %v5457_v49  ;;  %v3407_v30 = vsel %vm190_vm1, %v7653_v12, %v6045_v26  ;;  %v3560_v50 = vsel %vm1645_vm10, %v6055_v23, %v6020_v28  ;;  %v3628_v10 = vsel %vm3623_vm3, %v6060_v8, %v6025_v19  ;;  %v5461_v42 = vpack.c.bf16 %v3629_v35, %v3561_v0 }
 0x456   :  { %v3339_v32 = vsel %vm1425_vm7, %v8058_v9, %v6074_v38  ;;  %5434 = vmatprep.subr.bf16.mxu0 %v5433_v57  ;;  %v3340_v44 = vsel %vm1425_vm7, %v6074_v38, %v6040_v17  ;;  %v8059_v40 = vunpack.i.h.bf16 %v7632_v2  ;;  %v8060_v26 = vunpack.i.h.bf16 %v7645_v7 }
 0x457   :  { %v3680_v49 = vpop.permute.xlu1 %3679  ;;  %5436 = vmatpush1.bf16.msra.mxu0 %v5435_v21  ;;  %v5437_v52 = vpack.c.bf16 %v3407_v30, %v3340_v44  ;;  %v5463_v19 = vpack.c.bf16 %v3628_v10, %v3560_v50  ;;  %v5441_v28 = vpack.c.bf16 %v3492_v59, %v7526_v39  ;;  %v3559_v2 = vsel %vm1645_vm10, %v7647_v13, %v6055_v23 }
 0x458   :  { %v3406_v63 = vsel %vm190_vm1, %v8059_v40, %v7653_v12  ;;  %v3678_v48 = vpop.permute.xlu0 %3677  ;;  %5460 = vmatpush1.bf16.msra.mxu1 %v5459_v41  ;;  %v3491_v17 = vsel %vm548_vm6, %v8060_v26, %v7657_v27  ;;  %v3627_v12 = vsel %vm3623_vm3, %v7661_v15, %v6060_v8  ;;  %v3697_v7 = vsel %vm3691_vm4, %v7710_v25, %v7799_v18 }
 0x459   :  { %v5439_v34 = vpack.c.bf16 %v3406_v63, %v3339_v32  ;;  %5438 = vmatprep.subr.bf16.mxu0 %v5437_v52  ;;  %5462 = vmatprep.subr.bf16.mxu1 %v5461_v42  ;;  %v5443_v27 = vpack.c.bf16 %v3491_v17, %v7511_v56  ;;  %v8061_v39 = vunpack.i.h.bf16 %v7639_v45  ;;  %v5445_v23 = vpack.c.bf16 %v3627_v12, %v3559_v2 }
 0x45a   :  { %v8062_v8 = vunpack.i.h.bf16 %v7649_v53  ;;  %v3696_v35 = vsel %vm3691_vm4, %v3680_v49, %v7710_v25  ;;  %v6065_v56 = vunpack.i.h.bf16 %v7768_v20  ;;  %v6070_v41 = vunpack.i.h.bf16 %v7776_v54 }
 0x45b   :  { %v7824_v21 = vpop.permute.xlu1 %3398  ;;  %5440 = vmatpush1.bf16.msra.mxu0 %v5439_v34  ;;  %v3626_v38 = vsel %vm3623_vm3, %v8061_v39, %v7661_v15  ;;  %v3695_v30 = vsel %vm3691_vm4, %v3678_v48, %v3680_v49  ;;  %v6075_v10 = vunpack.i.h.bf16 %v7792_v36  ;;  %v8064_v52 = vunpack.i.l.bf16 %v7713_v5 }
 0x45c   :  { %v6083_v0 = vpop.permute.xlu0 %6082  ;;  %5442 = vmatprep.subr.bf16.mxu0 %v5441_v28  ;;  %5464 = vmatpush1.bf16.msra.mxu1 %v5463_v19  ;;  %v3558_v46 = vsel %vm1645_vm10, %v8062_v8, %v7647_v13  ;;  %v8063_v13 = vmov 0.0|0.0   ;;  %v3694_v26 = vsel %vm3691_vm4, %v7643_v62, %v3678_v48  ;;  %v8065_v28 = vunpack.i.l.bf16 %v7684_v24 }
 0x45d   :  { %3965 = vmatprep.subr.mxu1 %v3697_v7  ;;  %v6084_v57 = vunpack.i.l.bf16 %v6083_v0  ;;  %v5447_v15 = vpack.c.bf16 %v3626_v38, %v3558_v46  ;;  %v6085_v44 = vunpack.i.h.bf16 %v6083_v0  ;;  %v8067_v46 = vunpack.i.l.bf16 %v7726_v43 }
 0x45f   :  { %v6078_v59 = vpop.permute.xlu1 %6077  ;;  %5444 = vmatpush1.bf16.msra.mxu0 %v5443_v27  ;;  %v3278_v53 = vsel %vm2751_vm2, %v6070_v41, %v6084_v57  ;;  %v3277_v49 = vsel %vm2751_vm2, %v6085_v44, %v6070_v41  ;;  %v3276_v36 = vsel %vm2751_vm2, %v8065_v28, %v6085_v44  ;;  %v8066_v27 = vunpack.i.l.bf16 %v7697_v1 }
 0x460   :  { %v6080_v9 = vunpack.i.h.bf16 %v6078_v59  ;;  %v6079_v45 = vunpack.i.l.bf16 %v6078_v59  ;;  %v7846_v32 = vpop.permute.xlu0 %3550  ;;  %5446 = vmatprep.subr.bf16.mxu0 %v5445_v23  ;;  %3966 = vmatpush1.msra.mxu1 %v3696_v35  ;;  %v3410_v35 = vsel %vm190_vm1, %v8067_v46, %v7824_v21  ;;  %v8068_v59 = vunpack.i.l.bf16 %v7722_v60 }
 0x461   :  { %5056 = vmatmul.mubr.msk.f32.vlgmr.msra.gmra.mrb[22].mxu1 %vm2751_vm2, %v7612_v33  ;;  %5481 = vmatprep.subr.bf16.mxu1 %v8063_v13 }
 0x462   :  { %v3211_v25 = vsel %vm3202_vm0, %v6065_v56, %v6079_v45  ;;  %5190 = vmatprep.mubr.msk.f32.mxu1 %vm6232_vm14, %v8039_v14  ;;  %v3210_v50 = vsel %vm3202_vm0, %v6080_v9, %v6065_v56  ;;  %v3209_v42 = vsel %vm3202_vm0, %v8064_v52, %v6080_v9 }
 0x463   :  { %v5482_v54 = vpack.c.bf16 %v3278_v53, %v3211_v25  ;;  %v6088_v20 = vpop.permute.xlu1 %6087  ;;  %5448 = vmatpush1.bf16.msra.mxu0 %v5447_v15  ;;  %v5465_v2 = vpack.c.bf16 %v3277_v49, %v3210_v50  ;;  %v5467_v0 = vpack.c.bf16 %v3276_v36, %v3209_v42 }
 0x464   :  { %v6090_v40 = vunpack.i.h.bf16 %v6088_v20  ;;  %v6089_v63 = vunpack.i.l.bf16 %v6088_v20  ;;  %v6093_v34 = vpop.permute.xlu0 %6092  ;;  %3894 = vmatprep.subr.mxu0 %v3695_v30 }
 0x465   :  { %v6095_v17 = vunpack.i.h.bf16 %v6093_v34  ;;  %v6094_v19 = vunpack.i.l.bf16 %v6093_v34  ;;  %5483 = vmatpush3.bf16.msra.mxu1 %v5482_v54 }
 0x466   :  { %v3345_v5 = vsel %vm1425_vm7, %v6075_v10, %v6089_v63  ;;  %5484 = vmatprep.subr.bf16.mxu1 %v8063_v13  ;;  %v3344_v12 = vsel %vm1425_vm7, %v6090_v40, %v6075_v10  ;;  %v3343_v24 = vsel %vm1425_vm7, %v8066_v27, %v6090_v40  ;;  %vm4188_vm7 = vcmask 64512  }
 0x467   :  { %v3412_v7 = vsel %vm190_vm1, %v6094_v19, %v6095_v17  ;;  %v3484_v62 = vpop.permute.xlu1 %3483  ;;  %3895 = vmatpush1.msra.mxu0 %v3694_v26  ;;  %v3411_v48 = vsel %vm190_vm1, %v7824_v21, %v6094_v19  ;;  %v5471_v1 = vpack.c.bf16 %v3410_v35, %v3343_v24 }
 0x468   :  { %v5485_v39 = vpack.c.bf16 %v3412_v7, %v3345_v5  ;;  %v6098_v38 = vpop.permute.xlu0 %6097  ;;  %5055 = vmatmul.mubr.msk.f32.vlgmr.msra.gmra.mrb[18].mxu0 %vm2751_vm2, %v7612_v33  ;;  %5466 = vmatprep.subr.bf16.mxu0 %v5465_v2  ;;  %v5469_v57 = vpack.c.bf16 %v3411_v48, %v3344_v12  ;;  %v3495_v56 = vsel %vm548_vm6, %v8068_v59, %v3484_v62 }
 0x469   :  { %v6100_v23 = vunpack.i.h.bf16 %v6098_v38  ;;  %v6099_v8 = vunpack.i.l.bf16 %v6098_v38  ;;  %5468 = vmatpush1.bf16.msra.mxu0 %v5467_v0  ;;  %4084 = vmatprep.mubr.f32.mxu0 %v8039_v14  ;;  %v5475_v20 = vpack.c.bf16 %v3495_v56, %v7558_v31  ;;  %v8070_v31 = vunpack.i.l.bf16 %v7745_v16 }
 0x46a   :  { %5470 = vmatprep.subr.bf16.mxu0 %v5469_v57  ;;  %5486 = vmatpush3.bf16.msra.mxu1 %v5485_v39 }
 0x46b   :  { %v3497_v41 = vsel %vm548_vm6, %v6099_v8, %v6100_v23  ;;  %v6108_v9 = vpop.permute.xlu1 %6107  ;;  %5487 = vmatprep.subr.bf16.mxu1 %v8063_v13  ;;  %v3496_v45 = vsel %vm548_vm6, %v3484_v62, %v6099_v8  ;;  %v3562_v34 = vsel %vm1645_vm10, %v8070_v31, %v7846_v32 }
 0x46c   :  { %v5488_v15 = vpack.c.bf16 %v3497_v41, %v7579_v47  ;;  %v6110_v44 = vunpack.i.h.bf16 %v6108_v9  ;;  %v6109_v43 = vunpack.i.l.bf16 %v6108_v9  ;;  %v6103_v53 = vpop.permute.xlu0 %6102  ;;  %v5473_v21 = vpack.c.bf16 %v3496_v45, %v7567_v22 }
 0x46d   :  { %v6105_v25 = vunpack.i.h.bf16 %v6103_v53  ;;  %v6104_v54 = vunpack.i.l.bf16 %v6103_v53  ;;  %5472 = vmatpush1.bf16.msra.mxu0 %v5471_v1  ;;  %v8069_v22 = vunpack.i.l.bf16 %v7749_v37 }
 0x46e   :  { %v3632_v60 = vsel %vm3623_vm3, %v6109_v43, %v6110_v44  ;;  %5474 = vmatprep.subr.bf16.mxu0 %v5473_v21  ;;  %5489 = vmatpush3.bf16.msra.mxu1 %v5488_v15 }
 0x46f   :  { %v3564_v30 = vsel %vm1645_vm10, %v6104_v54, %v6105_v25  ;;  %v3618_v50 = vpop.permute.xlu1 %3617  ;;  %v3563_v47 = vsel %vm1645_vm10, %v7846_v32, %v6104_v54  ;;  %5490 = vmatprep.subr.bf16.mxu1 %v8063_v13 }
 0x470   :  { %v5491_v10 = vpack.c.bf16 %v3632_v60, %v3564_v30  ;;  %v3630_v52 = vsel %vm3623_vm3, %v8069_v22, %v3618_v50  ;;  %v3631_v42 = vsel %vm3623_vm3, %v3618_v50, %v6109_v43  ;;  %v3688_v40 = vpop.permute.xlu0 %3687 }
 0x471   :  { %v5477_v63 = vpack.c.bf16 %v3631_v42, %v3563_v47  ;;  %5476 = vmatpush1.bf16.msra.mxu0 %v5475_v20  ;;  %v5479_v26 = vpack.c.bf16 %v3630_v52, %v3562_v34 }
 0x472   :  { %5492 = vmatpush3.bf16.msra.mxu1 %v5491_v10 }
 0x473   :  { %v3690_v17 = vpop.permute.xlu1 %3689  ;;  %5478 = vmatprep.subr.bf16.mxu0 %v5477_v63  ;;  %5188 = vmatprep.subr.mxu1 %v8039_v14 }
 0x474   :  { %v3700_v37 = vsel %vm3691_vm4, %v3688_v40, %v3690_v17  ;;  %v3686_v13 = vpop.permute.xlu0 %3685 }
 0x475   :  { %5480 = vmatpush1.bf16.msra.mxu0 %v5479_v26  ;;  %v3699_v19 = vsel %vm3691_vm4, %v3686_v13, %v3688_v40  ;;  %v3698_v16 = vsel %vm3691_vm4, %v7799_v18, %v3686_v13 }
 0x476   :  { %4036 = vmatprep.subr.mxu0 %v3699_v19  ;;  %5189 = vmatpush3.msra.mxu1 %v3700_v37 }
 0x477   :  { %5191 = vmatmul.mubr.msk.f32.vlgmr.msra.gmra.mrb[24].mxu1 %vm2751_vm2, %v7612_v33 }
 0x478   :  { %4256 = vmatprep.mubr.f32.mxu1 %v8039_v14 }
 0x479   :  { %4037 = vmatpush1.msra.mxu0 %v3698_v16 }
 0x47a   :  { %5057 = vmatmul.mubr.msk.f32.vlgmr.msra.gmra.mrb[20].mxu0 %vm2751_vm2, %v7612_v33 }
 0x47b   :  { %4327 = vmatprep.mubr.f32.mxu0 %v8039_v14 }
 0x484   :  { %v7916_v32 = vpop.permute.xlu1 %3802 }
 0x485   :  { %v7929_v41 = vpop.permute.xlu0 %1720 }
 0x486   :  { %v1795_v9 = vadd.f32 %v7480_v3, %v7929_v41  ;;  %v1793_v45 = vadd.f32 %v7478_v6, %v7929_v41  ;;  %v1866_v44 = vadd.f32 %v7484_v55, %v7929_v41  ;;  %v1864_v25 = vadd.f32 %v7482_v4, %v7929_v41 }
 0x487   :  { %v1937_v20 = vadd.f32 %v7488_v29, %v7929_v41  ;;  %v2008_v50 = vadd.f32 %v7492_v11, %v7929_v41  ;;  %v2006_v4 = vadd.f32 %v7490_v61, %v7929_v41  ;;  %v1935_v42 = vadd.f32 %v7486_v51, %v7929_v41 }
 0x488   :  { %vm2081_vm5 = vcmp.ge.f32.partialorder %v1795_v9, 0.0  ;;  %v2090_v21 = vmul.f32 0.3, %v1795_v9  ;;  %v2089_v60 = vmul.f32 0.3, %v1793_v45  ;;  %vm2080_vm12 = vcmp.ge.f32.partialorder %v1793_v45, 0.0  ;;  %v4547_v61 = vpop.permute.xlu1 %4546 }
 0x489   :  { %v2092_v55 = vmul.f32 0.3, %v1866_v44  ;;  %vm2083_vm13 = vcmp.ge.f32.partialorder %v1866_v44, 0.0  ;;  %v2091_v29 = vmul.f32 0.3, %v1864_v25  ;;  %vm2082_vm3 = vcmp.ge.f32.partialorder %v1864_v25, 0.0 }
 0x48a   :  { %v2099_v52 = vsel %vm2081_vm5, %v1795_v9, %v2090_v21  ;;  %v2098_v11 = vsel %vm2080_vm12, %v1793_v45, %v2089_v60  ;;  %v2094_v31 = vmul.f32 0.3, %v1937_v20  ;;  %v2096_v34 = vmul.f32 0.3, %v2008_v50 }
 0x48b   :  { %v2101_v63 = vsel %vm2083_vm13, %v1866_v44, %v2092_v55  ;;  %vm2085_vm4 = vcmp.ge.f32.partialorder %v1937_v20, 0.0  ;;  %v2095_v51 = vmul.f32 0.3, %v2006_v4  ;;  %v2100_v37 = vsel %vm2082_vm3, %v1864_v25, %v2091_v29 }
 0x48c   :  { %v2093_v13 = vmul.f32 0.3, %v1935_v42  ;;  %v2103_v19 = vsel %vm2085_vm4, %v1937_v20, %v2094_v31 }
 0x522   :  { %v3873_v49 = vpop.f32.mrb[20].mxu1 }
 0x523   :  { %v3874_v28 = vadd.f32 %v3873_v49, %v7916_v32  ;;  %v3875_v36 = vpop.f32.mrb[21].mxu1 }
 0x524   :  { %v3876_v5 = vadd.f32 %v3875_v36, %v7916_v32 }
 0x525   :  { %v4170_v2 = vmul.f32 0.3, %v3874_v28  ;;  %vm4161_vm1 = vcmp.ge.f32.partialorder %v3874_v28, 0.0 }
 0x526   :  { %v4171_v12 = vmul.f32 0.3, %v3876_v5  ;;  %vm4162_vm6 = vcmp.ge.f32.partialorder %v3876_v5, 0.0 }
 0x527   :  { %v4179_v0 = vsel %vm4161_vm1, %v3874_v28, %v4170_v2  ;;  %vm2087_vm1 = vcmp.ge.f32.partialorder %v2008_v50, 0.0 }
 0x528   :  { %v4180_v18 = vsel %vm4162_vm6, %v3876_v5, %v4171_v12  ;;  %vm2086_vm6 = vcmp.ge.f32.partialorder %v2006_v4, 0.0  ;;  %v2105_v16 = vsel %vm2087_vm1, %v2008_v50, %v2096_v34 }
 0x529   :  { %4192 = vmatprep.subr.mxu1 %v4180_v18  ;;  %v2104_v28 = vsel %vm2086_vm6, %v2006_v4, %v2095_v51 }
 0x52a   :  { %4193 = vmatpush1.msra.mxu1 %v4179_v0 }
 0x52b   :  { %5059 = vmatmul.mubr.msk.f32.vlgmr.msra.gmra.mrb[26].mxu1 %vm4188_vm7, %v7615_v58 }
 0x52c   :  { %4469 = vmatprep.mubr.f32.mxu1 %v8039_v14 }
 0x534   :  { %v4015_v33 = vpop.f32.mrb[22].mxu1 }
 0x535   :  { %v4017_v7 = vpop.f32.mrb[23].mxu1  ;;  %v4016_v27 = vadd.f32 %v4015_v33, %v7916_v32 }
 0x536   :  { %v4018_v62 = vadd.f32 %v4017_v7, %v7916_v32 }
 0x537   :  { %v4174_v46 = vmul.f32 0.3, %v4016_v27  ;;  %vm4165_vm9 = vcmp.ge.f32.partialorder %v4016_v27, 0.0 }
 0x538   :  { %v4175_v23 = vmul.f32 0.3, %v4018_v62  ;;  %vm4166_vm8 = vcmp.ge.f32.partialorder %v4018_v62, 0.0 }
 0x539   :  { %v4183_v56 = vsel %vm4165_vm9, %v4016_v27, %v4174_v46  ;;  %v4917_v27 = vld [vmem:[#allocation4] sm:$0x3]  ;;  %v4919_v46 = vld [vmem:[#allocation4 + $0x10] sm:$0x3] }
 0x53a   :  { %v4184_v59 = vsel %vm4166_vm8, %v4018_v62, %v4175_v23 }
 0x53b   :  { %v3944_v48 = vpop.f32.mrb[18].mxu0 }
 0x53c   :  { %v3945_v24 = vadd.f32 %v3944_v48, %v7916_v32  ;;  %v3946_v39 = vpop.f32.mrb[19].mxu0  ;;  %v7977_v48 = vpop.permute.xlu0 %4905 }
 0x53d   :  { %v3947_v38 = vadd.f32 %v3946_v39, %v7916_v32 }
 0x53e   :  { %v4172_v57 = vmul.f32 0.3, %v3945_v24  ;;  %vm4163_vm10 = vcmp.ge.f32.partialorder %v3945_v24, 0.0 }
 0x53f   :  { %v4173_v8 = vmul.f32 0.3, %v3947_v38  ;;  %vm4164_vm2 = vcmp.ge.f32.partialorder %v3947_v38, 0.0 }
 0x540   :  { %v4181_v1 = vsel %vm4163_vm10, %v3945_v24, %v4172_v57  ;;  %vm2084_vm10 = vcmp.ge.f32.partialorder %v1935_v42, 0.0  ;;  %v6237_v57 = vmov 1983009808  }
 0x541   :  { %v4182_v35 = vsel %vm4164_vm2, %v3947_v38, %v4173_v8  ;;  %v2102_v36 = vsel %vm2084_vm10, %v1935_v42, %v2093_v13  ;;  %v4918_v38 = vld [vmem:[#allocation4 + $0x8] sm:$0x3]  ;;  %v4974_v23 = vunpack.c.l.s4 %v6237_v57 }
 0x542   :  { %4263 = vmatprep.subr.mxu0 %v4182_v35  ;;  %v4976_v35 = vlaneseq }
 0x543   :  { %4264 = vmatpush1.msra.mxu0 %v4181_v1  ;;  %v4975_v21 = vunpack.c.0.s8 %v4974_v23 }
 0x544   :  { %4334 = vmatprep.subr.mxu0 %v4184_v59  ;;  %5060 = vmatmul.mubr.msk.f32.vlgmr.msra.gmra.mrb[22].mxu0 %vm4188_vm7, %v7615_v58  ;;  %v4977_v60 = vshrl.u32 %v4976_v35, 7 }
 0x545   :  { %4335 = vmatpush1.msra.mxu0 %v4183_v56  ;;  %4398 = vmatprep.mubr.f32.mxu0 %v8039_v14 }
 0x546   :  { %5193 = vmatprep.subr.mxu0 %v8039_v14 }
 0x548   :  { %5061 = vmatmul.mubr.msk.f32.vlgmr.msra.gmra.mrb[24].mxu0 %vm4188_vm7, %v7615_v58 }
 0x549   :  { %5195 = vmatprep.mubr.msk.f32.mxu0 %vm6232_vm14, %v8039_v14 }
 0x54a   :  { %v4157_v15 = vpop.f32.mrb[24].mxu1 }
 0x54b   :  { %v4158_v43 = vadd.f32 %v4157_v15, %v7916_v32  ;;  %v5192_v53 = vpop.f32.mrb[25].mxu1  ;;  %v4921_v15 = vld [vmem:[#allocation4 + $0x20] sm:$0x3] }
 0x54c   :  { %v4922_v53 = vld [vmem:[#allocation4 + $0x28] sm:$0x3] }
 0x54d   :  { %vm4169_vm11 = vcmp.ge.f32.partialorder %v4158_v43, 0.0  ;;  %v4178_v3 = vmul.f32 0.3, %v4158_v43  ;;  %v4086_v54 = vpop.f32.mrb[20].mxu0 }
 0x54e   :  { %v4087_v6 = vadd.f32 %v4086_v54, %v7916_v32  ;;  %v4088_v30 = vpop.f32.mrb[21].mxu0 }
 0x54f   :  { %v4089_v47 = vadd.f32 %v4088_v30, %v7916_v32  ;;  %v4187_v10 = vsel %vm4169_vm11, %v4158_v43, %v4178_v3  ;;  %v8071_v32 = vld [vmem:[#allocation20_spill] sm:$0xff] }
 0x550   :  { %v4176_v22 = vmul.f32 0.3, %v4087_v6  ;;  %5194 = vmatpush3.msra.mxu0 %v4187_v10  ;;  %vm4167_vm15 = vcmp.ge.f32.partialorder %v4087_v6, 0.0  ;;  %v2077_v49 = vadd.f32 %v8071_v32, %v7929_v41  ;;  %v4920_v41 = vld [vmem:[#allocation4 + $0x18] sm:$0x3] }
 0x551   :  { %v4177_v40 = vmul.f32 0.3, %v4089_v47  ;;  %5196 = vmatmul.mubr.msk.f32.vlgmr.msra.gmra.mrb[26].mxu0 %vm4188_vm7, %v7615_v58  ;;  %4550 = vmatprep.subr.mxu0 %v2099_v52  ;;  %vm4168_vm0 = vcmp.ge.f32.partialorder %v4089_v47, 0.0 }
 0x552   :  { %4551 = vmatpush1.msra.mxu0 %v2098_v11  ;;  %4614 = vmatprep.mubr.f32.mxu0 %v8039_v14  ;;  %v4185_v17 = vsel %vm4167_vm15, %v4087_v6, %v4176_v22  ;;  %vm2088_vm2 = vcmp.ge.f32.partialorder %v2077_v49, 0.0  ;;  %v4923_v22 = vld [vmem:[#allocation4 + $0x30] sm:$0x3] }
 0x553   :  { %4621 = vmatprep.subr.mxu0 %v2101_v63  ;;  %v4186_v26 = vsel %vm4168_vm0, %v4089_v47, %v4177_v40  ;;  %v4924_v63 = vld [vmem:[#allocation4 + $0x38] sm:$0x3] }
 0x554   :  { %4405 = vmatprep.subr.mxu1 %v4186_v26  ;;  %v4978_v26 = vsub.s32 %v4975_v21, %v4977_v60 }
 0x555   :  { %4406 = vmatpush1.msra.mxu1 %v4185_v17  ;;  %5064 = vmatmul.mubr.msk.f32.vlgmr.msra.gmra.mrb[28].mxu0 %vm4188_vm7, %v4547_v61 }
 0x556   :  { %4622 = vmatpush1.msra.mxu0 %v2100_v37  ;;  %5062 = vmatmul.mubr.msk.f32.vlgmr.msra.gmra.mrb[28].mxu1 %vm4188_vm7, %v7615_v58  ;;  %v2097_v58 = vmul.f32 0.3, %v2077_v49 }
 0x557   :  { %4692 = vmatprep.subr.mxu0 %v2103_v19  ;;  %4763 = vmatprep.subr.mxu1 %v2105_v16 }
 0x558   :  { %4764 = vmatpush1.msra.mxu1 %v2104_v28  ;;  %4685 = vmatprep.mubr.f32.mxu0 %v8039_v14  ;;  %v2106_v5 = vsel %vm2088_vm2, %v2077_v49, %v2097_v58  ;;  %v4925_v58 = vld [vmem:[#allocation4 + $0x40] sm:$0x3] }
 0x559   :  { %5065 = vmatmul.mubr.msk.f32.vlgmr.msra.gmra.mrb[22].mxu0 %vm4188_vm7, %v4547_v61  ;;  %4827 = vmatprep.mubr.f32.mxu1 %v8039_v14 }
 0x55a   :  { %4693 = vmatpush1.msra.mxu0 %v2102_v36  ;;  %4756 = vmatprep.mubr.f32.mxu0 %v8039_v14 }
 0x55b   :  { %5198 = vmatprep.subr.mxu1 %v8039_v14 }
 0x55d   :  { %5066 = vmatmul.mubr.msk.f32.vlgmr.msra.gmra.mrb[24].mxu0 %vm4188_vm7, %v4547_v61 }
 0x55e   :  { %5067 = vmatmul.mubr.msk.f32.vlgmr.msra.gmra.mrb[28].mxu1 %vm4188_vm7, %v4547_v61 }
 0x55f   :  { %5199 = vmatpush3.msra.mxu1 %v2106_v5  ;;  %5200 = vmatprep.mubr.msk.f32.mxu1 %vm6232_vm14, %v8039_v14 }
 0x562   :  { %5201 = vmatmul.mubr.msk.f32.vlgmr.msra.gmra.mrb[30].mxu1 %vm4188_vm7, %v4547_v61 }
 0x5fe   :  { %v4258_v2 = vpop.f32.mrb[26].mxu1 }
 0x5ff   :  { %v4260_v12 = vpop.f32.mrb[27].mxu1 }
 0x624   :  { %v4542_v18 = vpop.f32.mrb[26].mxu0 }
 0x625   :  { %v5197_v0 = vpop.f32.mrb[27].mxu0 }
 0x628   :  { %v4616_v33 = vpop.f32.mrb[28].mxu0 }
 0x629   :  { %v4617_v7 = vadd.f32 %v4616_v33, %v4258_v2  ;;  %v4618_v62 = vpop.f32.mrb[29].mxu0 }
 0x62a   :  { %v4619_v24 = vadd.f32 %v4618_v62, %v4260_v12 }
 0x62b   :  { %v4908_v39 = vadd.f32 %v7977_v48, %v4617_v7 }
 0x62c   :  { %v4909_v14 = vadd.f32 %v7977_v48, %v4619_v24  ;;  %v4687_v8 = vpop.f32.mrb[22].mxu0 }
 0x62d   :  { %v4926_v1 = vadd.f32 %v4917_v27, %v4908_v39  ;;  %v4910_v59 = vadd.f32 %v7977_v48, %v4687_v8  ;;  %v4689_v56 = vpop.f32.mrb[23].mxu0 }
 0x62e   :  { %v4927_v9 = vadd.f32 %v4918_v38, %v4909_v14  ;;  %v4911_v45 = vadd.f32 %v7977_v48, %v4689_v56 }
 0x62f   :  { %vm4935_vm14 = vcmp.ge.f32.partialorder %v4926_v1, 0.0  ;;  %v4944_v44 = vmul.f32 0.3, %v4926_v1  ;;  %v4928_v43 = vadd.f32 %v4919_v46, %v4910_v59 }
 0x630   :  { %vm4936_vm7 = vcmp.ge.f32.partialorder %v4927_v9, 0.0  ;;  %v4945_v25 = vmul.f32 0.3, %v4927_v9  ;;  %v4929_v3 = vadd.f32 %v4920_v41, %v4911_v45  ;;  %v4758_v54 = vpop.f32.mrb[24].mxu0 }
 0x631   :  { %v4953_v20 = vsel %vm4935_vm14, %v4926_v1, %v4944_v44  ;;  %vm4937_vm8 = vcmp.ge.f32.partialorder %v4928_v43, 0.0  ;;  %v4946_v6 = vmul.f32 0.3, %v4928_v43  ;;  %v4912_v30 = vadd.f32 %v7977_v48, %v4758_v54  ;;  %v4760_v55 = vpop.f32.mrb[25].mxu0  ;;  %v4829_v50 = vpop.f32.mrb[28].mxu1 }
 0x632   :  { %v4954_v47 = vsel %vm4936_vm7, %v4927_v9, %v4945_v25  ;;  %vm4938_vm9 = vcmp.ge.f32.partialorder %v4929_v3, 0.0  ;;  %v4947_v10 = vmul.f32 0.3, %v4929_v3  ;;  %v4913_v4 = vadd.f32 %v7977_v48, %v4760_v55  ;;  %v4831_v52 = vpop.f32.mrb[29].mxu1 }
 0x633   :  { %v4971_v29 = vcombine.low %v4953_v20, %v4954_v47  ;;  %v4955_v42 = vsel %vm4937_vm8, %v4928_v43, %v4946_v6  ;;  %v4930_v40 = vadd.f32 %v4921_v15, %v4912_v30  ;;  %v4914_v11 = vadd.f32 %v7977_v48, %v4829_v50 }
 0x634   :  { %v4956_v61 = vsel %vm4938_vm9, %v4929_v3, %v4947_v10  ;;  %v4931_v31 = vadd.f32 %v4922_v53, %v4913_v4  ;;  %v4915_v34 = vadd.f32 %v7977_v48, %v4831_v52 }
 0x635   :  { %v4972_v51 = vcombine.low %v4955_v42, %v4956_v61  ;;  %vm4939_vm5 = vcmp.ge.f32.partialorder %v4930_v40, 0.0  ;;  %v4948_v17 = vmul.f32 0.3, %v4930_v40  ;;  %v4932_v37 = vadd.f32 %v4923_v22, %v4914_v11  ;;  %v4900_v13 = vpop.f32.mrb[30].mxu1 }
 0x636   :  { %vm4940_vm11 = vcmp.ge.f32.partialorder %v4931_v31, 0.0  ;;  %v4949_v19 = vmul.f32 0.3, %v4931_v31  ;;  %v4933_v16 = vadd.f32 %v4924_v63, %v4915_v34  ;;  %v4901_v32 = vadd.f32 %v4900_v13, %v4542_v18  ;;  %v5202_v49 = vpop.f32.mrb[31].mxu1 }
 0x637   :  { %v4957_v28 = vsel %vm4939_vm5, %v4930_v40, %v4948_v17  ;;  %vm4941_vm12 = vcmp.ge.f32.partialorder %v4932_v37, 0.0  ;;  %v4950_v36 = vmul.f32 0.3, %v4932_v37  ;;  %v4979_v7 = vrot.slane %v4971_v29, %v4978_v26 }
 0x638   :  { %v4958_v5 = vsel %vm4940_vm11, %v4931_v31, %v4949_v19  ;;  %vm4942_vm13 = vcmp.ge.f32.partialorder %v4933_v16, 0.0  ;;  %v4951_v2 = vmul.f32 0.3, %v4933_v16  ;;  %v4916_v12 = vadd.f32 %v7977_v48, %v4901_v32 }
 0x639   :  { %v4988_v0 = vcombine.low %v4957_v28, %v4958_v5  ;;  %v4959_v33 = vsel %vm4941_vm12, %v4932_v37, %v4950_v36  ;;  %v4986_v62 = vrot.slane %v4972_v51, %v4978_v26 }
 0x63a   :  { %v4960_v27 = vsel %vm4942_vm13, %v4933_v16, %v4951_v2  ;;  %v4934_v24 = vadd.f32 %v4925_v58, %v4916_v12 }
 0x63b   :  { %v4989_v39 = vcombine.low %v4959_v33, %v4960_v27  ;;  %v4987_v38 = vcombine.low %v4979_v7, %v4986_v62  ;;  %v4996_v57 = vrot.slane %v4988_v0, %v4978_v26 }
 0x63c   :  { %v4952_v18 = vmul.f32 0.3, %v4934_v24  ;;  %vm4943_vm15 = vcmp.ge.f32.partialorder %v4934_v24, 0.0 }
 0x63d   :  { %v5003_v23 = vrot.slane %v4989_v39, %v4978_v26  ;;  %5015 = vst [vmem:[#allocation10] sm:$0xff] %v4987_v38 }
 0x63e   :  { %v4961_v14 = vsel %vm4943_vm15, %v4934_v24, %v4952_v18 }
 0x63f   :  { %v5004_v8 = vcombine.low %v4996_v57, %v5003_v23  ;;  %5069 = vst.sshfl [vmem:[#allocation10 + $0x10] sm:$0x3 pattern:$0x76325410] %v4961_v14 }
 0x641   :  { %5016 = vst [vmem:[#allocation10 + $0x8] sm:$0xff] %v5004_v8 }
 0x642   :  { %6189 = shalt.err (!%p6186_p0)
}
 0x643   :  { %s6190_s19 = scalar_lea.hbm %s8003_s3, 288 }
 0x644   :  { %p6191_p1 = scmp.ne.s32.totalorder %s8003_s3, %s6190_s19  ;;  %p6194_p2 = scmp.lt.u32.totalorder %s6190_s19, %s8003_s3 }
 0x646   :  { %p6196_p3 = pnand %p6194_p2, %p6191_p1 }
 0x648   :  { %6199 = shalt.err (!%p6196_p3)
}
 0x649   :  { %5027 = dma.vmem_to_hbm [thread:$0]  %s5025_s15, 288, %s8003_s3, [#allocation6]  }
 0x64a   :  { %6204 = dma.done.wait [#allocation6], 288  }
 0x64b   :  { %6205 = vsyncadd [#allocation6], 4294967008 }
 0x64c   :  { %5031 = vsyncpa [#allocation5], 1 }
 0x64d   :  { %5032 = vsyncpa [#allocation8], 1 }
 0x64e   :  { %5033 = vsyncpa [#allocation6], 1 }

</bundles_post_ra>
